<compile_context>
chip_gen: v7x
topology: tpu7x:2x2x1
jax: 0.10.0
libtpu: 0.0.40
codegen_flags: <defaults>
</compile_context>

<pallas_src>
import jax
import jax.numpy as jnp
from jax import lax
from jax.experimental import pallas as pl
from jax.experimental.pallas import tpu as pltpu


def _round_up(n, m):
    return ((n + m - 1) // m) * m


# Network geometry implied by affine1 = Linear(2592, 256): 84x84 input,
# conv1 k8 s4 -> 20x20x16, conv2 k4 s2 -> 9x9x32, 32*9*9 = 2592.
H_IN = 84
K1, S1, C1 = 8, 4, 16               # conv1
K2, S2, C2 = 4, 2, 32               # conv2
H1 = (H_IN - K1) // S1 + 1          # 20
H2 = (H1 - K2) // S2 + 1            # 9
N_SPATIAL2 = H2 * H2                # 81 conv2 output positions
N_OFFSETS = K2 * K2                 # 16 conv2 kernel offsets
RF = S1 * (K2 - 1) + K1             # 20: input receptive field of one conv2 output
RS = S1 * S2                        # 8 : input stride between conv2 outputs
HID = 256
SPS = _round_up(N_SPATIAL2, 16)     # 96: per-sample row count (bf16 tile aligned)

# Lane offsets of the packed bias segments (all 128-aligned).
B1_OFF, B2_OFF, BA1_OFF, BA2_OFF = 0, 256, 384, 640


# ----------------------------------------------------------------------------
# Fused Pallas kernel: conv1 + conv2 + affine1 + affine2 (biases + ReLUs)
# One grid step == one batch element.
# ----------------------------------------------------------------------------
def _dqn_fused_kernel(g2_ref, w1_ref, w2_ref, wa1_ref, wa2_ref, b_ref,
                      out_ref, h2f_ref):
    act = wa2_ref.shape[1]

    # conv1 at all 16 conv2 offsets: ONE dot.  g2 rows = conv2-output positions
    # (96 incl. zero padding), cols = flattened 20x20xC receptive-field patch.
    h1 = jnp.dot(g2_ref[...], w1_ref[...],
                 preferred_element_type=jnp.float32)               # (SPS, 256)
    h1 = jnp.maximum(h1 + b_ref[:, B1_OFF:B1_OFF + N_OFFSETS * C1], 0.0)
    h1 = h1.astype(jnp.bfloat16)

    # conv2: ONE K=256 dot (h1 columns are already conv2's im2col (p, c1) order).
    h2 = jnp.dot(h1, w2_ref[...], preferred_element_type=jnp.float32)  # (SPS, 32)
    h2 = jnp.maximum(h2 + b_ref[:, B2_OFF:B2_OFF + C2], 0.0).astype(jnp.bfloat16)

    # Relayout: (s, c2) rows -> one 2592-wide row so affine1 is ONE dot.
    # PyTorch's channel-major flatten is absorbed into wa1p's (s, c2) row order.
    # Rows s >= 81 are padding (finite relu(bias) values) and are never copied,
    # so no garbage can leak into the contraction.
    for s in range(N_SPATIAL2):
        h2f_ref[:, s * C2:(s + 1) * C2] = h2[s:s + 1, :]

    # affine1: ONE (1, 2592) x (2592, 256) dot.
    ha1 = jnp.dot(h2f_ref[...], wa1_ref[...],
                  preferred_element_type=jnp.float32)               # (1, 256)
    ha1 = jnp.maximum(ha1 + b_ref[:, BA1_OFF:BA1_OFF + HID], 0.0)
    ha1 = ha1.astype(jnp.bfloat16)

    # affine2 (no relu).
    out = jnp.dot(ha1, wa2_ref[...], preferred_element_type=jnp.float32)
    out = out + b_ref[:, BA2_OFF:BA2_OFF + act]
    out_ref[...] = out.reshape(1, 1, act).astype(out_ref.dtype)


# ----------------------------------------------------------------------------
# Input-side data movement (XLA): de-duplicated receptive-field patches.
# ----------------------------------------------------------------------------
def _build_patches(x):
    """x: (B, C, 84, 84) f32 NCHW -> (B*SPS, PW) bf16.

    Row b*SPS + s (s = ho*9 + wo < 81) holds the 20x20xC input receptive field
    of conv2 output position (ho, wo), flattened in (c, i, j) order; rows with
    s >= 81 and the lane padding up to PW are zeros.  x is quantized to bf16
    here (extra rounding step; all matmuls use bf16 operands, f32 accumulate).
    """
    B, C = x.shape[0], x.shape[1]
    pw = _round_up(C * RF * RF, 128)
    xb = x.astype(jnp.bfloat16)
    # (B, C, 9, 20, 84): 9 overlapping row bands, stride 8.
    bands = jnp.stack([xb[:, :, RS * i:RS * i + RF, :] for i in range(H2)], axis=2)
    # (B, C, 9, 9, 20, 20): 9 overlapping column bands per row band.
    tiles = jnp.stack([bands[..., RS * j:RS * j + RF] for j in range(H2)], axis=3)
    g = jnp.transpose(tiles, (0, 2, 3, 1, 4, 5))          # (B, ho, wo, C, i, j)
    g = g.reshape(B, N_SPATIAL2, C * RF * RF)
    g = jnp.pad(g, ((0, 0), (0, SPS - N_SPATIAL2), (0, pw - C * RF * RF)))
    return g.reshape(B * SPS, pw)


# ----------------------------------------------------------------------------
# One-time weight repacking (PyTorch layouts -> kernel layouts)
# ----------------------------------------------------------------------------
def pack_params(p):
    bf = lambda a: a.astype(jnp.bfloat16)
    C = p["conv1_w"].shape[1]
    A = p["aff2_w"].shape[0]
    pw = _round_up(C * RF * RF, 128)

    # conv1 (16, C, 8, 8) -> block-Toeplitz (C*400, 256): one dot over a 20x20xC
    # patch yields conv1 outputs at all 16 conv2 offsets, columns (p, c1).
    wt = jnp.transpose(p["conv1_w"], (1, 2, 3, 0))          # (C, 8, 8, 16)
    wb = jnp.zeros((C, RF, RF, N_OFFSETS, C1), jnp.float32)
    for kh in range(K2):
        for kw in range(K2):
            off = kh * K2 + kw
            wb = wb.at[:, S1 * kh:S1 * kh + K1, S1 * kw:S1 * kw + K1, off, :].set(wt)
    w1big = wb.reshape(C * RF * RF, N_OFFSETS * C1)
    w1big = jnp.pad(w1big, ((0, pw - C * RF * RF), (0, 0)))

    # All biases packed into one (1, bw) f32 array at 128-aligned lane offsets.
    bw = BA2_OFF + _round_up(A, 128)
    bias = jnp.zeros((1, bw), jnp.float32)
    bias = bias.at[0, B1_OFF:B1_OFF + N_OFFSETS * C1].set(jnp.tile(p["conv1_b"], N_OFFSETS))
    bias = bias.at[0, B2_OFF:B2_OFF + C2].set(p["conv2_b"])
    bias = bias.at[0, BA1_OFF:BA1_OFF + HID].set(p["aff1_b"])
    bias = bias.at[0, BA2_OFF:BA2_OFF + A].set(p["aff2_b"])

    return {
        "w1big": bf(w1big),                                                   # (pw, 256)
        # conv2 (32, 16, 4, 4) -> (256, 32), rows ordered (kh, kw, c1) = (p, c1)
        "w2p": bf(p["conv2_w"].transpose(2, 3, 1, 0).reshape(N_OFFSETS * C1, C2)),
        # affine1 (256, 2592) with PyTorch (c2, ho, wo) input order
        #   -> (2592, 256) with rows ordered (s, c2) to match the kernel scatter.
        "wa1p": bf(p["aff1_w"].reshape(HID, C2, N_SPATIAL2).transpose(2, 1, 0)
                   .reshape(N_SPATIAL2 * C2, HID)),
        # affine2 (A, 256) -> (256, A)
        "wa2p": bf(p["aff2_w"].T),
        "bias": bias,
    }


# ----------------------------------------------------------------------------
# Forward pass
# ----------------------------------------------------------------------------
def dqn_forward(packed, x):
    """packed = pack_params(params) (one-time); x: (B, C, 84, 84) f32 NCHW."""
    B = x.shape[0]
    A = packed["wa2p"].shape[1]
    g2 = _build_patches(x)                   # (B*SPS, pw) bf16
    pw = g2.shape[1]

    def full(arr):
        return pl.BlockSpec(arr.shape, lambda i: (0,) * arr.ndim)

    out = pl.pallas_call(
        _dqn_fused_kernel,
        out_shape=jax.ShapeDtypeStruct((B, 1, A), jnp.float32),
        grid=(B,),
        in_specs=[
            pl.BlockSpec((SPS, pw), lambda i: (i, 0)),   # per-sample patch block
            full(packed["w1big"]), full(packed["w2p"]),
            full(packed["wa1p"]), full(packed["wa2p"]),
            full(packed["bias"]),
        ],
        out_specs=pl.BlockSpec((1, 1, A), lambda i: (i, 0, 0)),
        scratch_shapes=[pltpu.VMEM((1, N_SPATIAL2 * C2), jnp.bfloat16)],
        compiler_params=pltpu.CompilerParams(
            dimension_semantics=("parallel",)),          # 2nd TensorCore on v7x
    )(g2, packed["w1big"], packed["w2p"], packed["wa1p"], packed["wa2p"],
      packed["bias"])
    return out.reshape(B, A)


# ----------------------------------------------------------------------------
# Parameters (PyTorch-default-like uniform init) and plain-JAX f32 reference
# ----------------------------------------------------------------------------
def init_params(key, frame_num, action_space):
    ks = jax.random.split(key, 8)

    def unif(k, shape, fan_in):
        bound = 1.0 / jnp.sqrt(float(fan_in))
        return jax.random.uniform(k, shape, jnp.float32, -bound, bound)

    p = {}
    p["conv1_w"] = unif(ks[0], (16, frame_num, 8, 8), frame_num * 8 * 8)
    p["conv1_b"] = unif(ks[1], (16,), frame_num * 8 * 8)
    p["conv2_w"] = unif(ks[2], (32, 16, 4, 4), 16 * 4 * 4)
    p["conv2_b"] = unif(ks[3], (32,), 16 * 4 * 4)
    p["aff1_w"] = unif(ks[4], (256, 2592), 2592)        # PyTorch Linear: (out, in)
    p["aff1_b"] = unif(ks[5], (256,), 2592)
    p["aff2_w"] = unif(ks[6], (action_space, 256), 256)
    p["aff2_b"] = unif(ks[7], (action_space,), 256)
    return p


def dqn_reference(params, x):
    h = lax.conv_general_dilated(
        x, params["conv1_w"], (4, 4), "VALID",
        dimension_numbers=("NCHW", "OIHW", "NCHW"))
    h = jax.nn.relu(h + params["conv1_b"][None, :, None, None])
    h = lax.conv_general_dilated(
        h, params["conv2_w"], (2, 2), "VALID",
        dimension_numbers=("NCHW", "OIHW", "NCHW"))
    h = jax.nn.relu(h + params["conv2_b"][None, :, None, None])
    h = h.reshape(h.shape[0], -1)
    h = jax.nn.relu(h @ params["aff1_w"].T + params["aff1_b"])
    return h @ params["aff2_w"].T + params["aff2_b"]


if __name__ == "__main__":
    B, FRAME_NUM, ACTION_SPACE = 2, 4, 4
    key = jax.random.PRNGKey(0)
    k_param, k_x = jax.random.split(key)

    params = init_params(k_param, FRAME_NUM, ACTION_SPACE)
    packed = pack_params(params)              # one-time repack, outside the forward
    x = jax.random.uniform(k_x, (B, FRAME_NUM, 84, 84), jnp.float32)

    fwd = jax.jit(dqn_forward)
    out = jax.block_until_ready(fwd(packed, x))
    ref = jax.block_until_ready(dqn_reference(params, x))

    assert out.shape == (B, ACTION_SPACE), out.shape
    # bf16 operands with f32 accumulation -> loose check vs f32 reference.
    assert jnp.allclose(out, ref, atol=2e-2, rtol=2e-2), (out, ref)
    print("KERNEL_OK")
</pallas_src>

<mosaic_0001>
module attributes {stable_mosaic.version = 11 : i64} {
  func.func @_dqn_fused_kernel(%arg0: i32, %arg1: memref<96x1664xbf16, #tpu.memory_space<vmem>>, %arg2: memref<1664x256xbf16, #tpu.memory_space<vmem>>, %arg3: memref<256x32xbf16, #tpu.memory_space<vmem>>, %arg4: memref<2592x256xbf16, #tpu.memory_space<vmem>>, %arg5: memref<256x4xbf16, #tpu.memory_space<vmem>>, %arg6: memref<1x768xf32, #tpu.memory_space<vmem>>, %arg7: memref<1x1x4xf32, #tpu.memory_space<vmem>>, %arg8: memref<1x2592xbf16, #tpu.memory_space<vmem>>) attributes {dimension_semantics = [#tpu.dimension_semantics<parallel>], iteration_bounds = array<i64: 2>, scalar_prefetch = 0 : i64, scratch_operands = 1 : i64, tpu.core_type = #tpu.core_type<tc>, window_params = [{transform_indices = @transform_0, window_bounds = array<i64: 96, 1664>}, {pipeline_mode = #tpu.pipeline_mode<synchronous>, transform_indices = @transform_1, window_bounds = array<i64: 1664, 256>}, {pipeline_mode = #tpu.pipeline_mode<synchronous>, transform_indices = @transform_2, window_bounds = array<i64: 256, 32>}, {pipeline_mode = #tpu.pipeline_mode<synchronous>, transform_indices = @transform_3, window_bounds = array<i64: 2592, 256>}, {pipeline_mode = #tpu.pipeline_mode<synchronous>, transform_indices = @transform_4, window_bounds = array<i64: 256, 4>}, {pipeline_mode = #tpu.pipeline_mode<synchronous>, transform_indices = @transform_5, window_bounds = array<i64: 1, 768>}, {transform_indices = @transform_6, window_bounds = array<i64: 1, 1, 4>}]} {
    %c0 = arith.constant 0 : index
    %c0_0 = arith.constant 0 : index
    %0 = vector.load %arg1[%c0, %c0_0] : memref<96x1664xbf16, #tpu.memory_space<vmem>>, vector<96x1664xbf16>
    %c0_1 = arith.constant 0 : index
    %c0_2 = arith.constant 0 : index
    %1 = vector.load %arg2[%c0_1, %c0_2] : memref<1664x256xbf16, #tpu.memory_space<vmem>>, vector<1664x256xbf16>
    %cst = arith.constant dense<0.000000e+00> : vector<96x256xf32>
    %2 = tpu.matmul %0, %1, %cst {dimension_numbers = #tpu.dot_dimension_numbers<[1], [0], [0], [1], [0, 0, 1, 1], [], []>} : vector<96x1664xbf16>, vector<1664x256xbf16>, vector<96x256xf32> -> vector<96x256xf32>
    %c0_3 = arith.constant 0 : index
    %c0_4 = arith.constant 0 : index
    %3 = vector.load %arg6[%c0_3, %c0_4] : memref<1x768xf32, #tpu.memory_space<vmem>>, vector<1x256xf32>
    %4 = vector.broadcast %3 : vector<1x256xf32> to vector<96x256xf32>
    %5 = arith.addf %2, %4 : vector<96x256xf32>
    %cst_5 = arith.constant 0.000000e+00 : f32
    %6 = vector.broadcast %cst_5 : f32 to vector<96x256xf32>
    %7 = arith.maximumf %5, %6 : vector<96x256xf32>
    %8 = arith.truncf %7 : vector<96x256xf32> to vector<96x256xbf16>
    %c0_6 = arith.constant 0 : index
    %c0_7 = arith.constant 0 : index
    %9 = vector.load %arg3[%c0_6, %c0_7] : memref<256x32xbf16, #tpu.memory_space<vmem>>, vector<256x32xbf16>
    %cst_8 = arith.constant dense<0.000000e+00> : vector<96x32xf32>
    %10 = tpu.matmul %8, %9, %cst_8 {dimension_numbers = #tpu.dot_dimension_numbers<[1], [0], [0], [1], [0, 0, 1, 1], [], []>} : vector<96x256xbf16>, vector<256x32xbf16>, vector<96x32xf32> -> vector<96x32xf32>
    %c0_9 = arith.constant 0 : index
    %c256 = arith.constant 256 : index
    %11 = vector.load %arg6[%c0_9, %c256] : memref<1x768xf32, #tpu.memory_space<vmem>>, vector<1x32xf32>
    %12 = vector.broadcast %11 : vector<1x32xf32> to vector<96x32xf32>
    %13 = arith.addf %10, %12 : vector<96x32xf32>
    %cst_10 = arith.constant 0.000000e+00 : f32
    %14 = vector.broadcast %cst_10 : f32 to vector<96x32xf32>
    %15 = arith.maximumf %13, %14 : vector<96x32xf32>
    %16 = arith.truncf %15 : vector<96x32xf32> to vector<96x32xbf16>
    %17 = vector.extract_strided_slice %16 {offsets = [0, 0], sizes = [1, 32], strides = [1, 1]} : vector<96x32xbf16> to vector<1x32xbf16>
    %c0_11 = arith.constant 0 : index
    %c0_12 = arith.constant 0 : index
    %18 = vector.load %arg8[%c0_11, %c0_12] : memref<1x2592xbf16, #tpu.memory_space<vmem>>, vector<1x32xbf16>
    tpu.vector_store %arg8[%c0_11, %c0_12], %17 {strides = array<i32>} : memref<1x2592xbf16, #tpu.memory_space<vmem>>, vector<1x32xbf16>,
    %19 = vector.extract_strided_slice %16 {offsets = [1, 0], sizes = [1, 32], strides = [1, 1]} : vector<96x32xbf16> to vector<1x32xbf16>
    %c0_13 = arith.constant 0 : index
    %c32 = arith.constant 32 : index
    %20 = vector.load %arg8[%c0_13, %c32] : memref<1x2592xbf16, #tpu.memory_space<vmem>>, vector<1x32xbf16>
    tpu.vector_store %arg8[%c0_13, %c32], %19 {strides = array<i32>} : memref<1x2592xbf16, #tpu.memory_space<vmem>>, vector<1x32xbf16>,
    %21 = vector.extract_strided_slice %16 {offsets = [2, 0], sizes = [1, 32], strides = [1, 1]} : vector<96x32xbf16> to vector<1x32xbf16>
    %c0_14 = arith.constant 0 : index
    %c64 = arith.constant 64 : index
    %22 = vector.load %arg8[%c0_14, %c64] : memref<1x2592xbf16, #tpu.memory_space<vmem>>, vector<1x32xbf16>
    tpu.vector_store %arg8[%c0_14, %c64], %21 {strides = array<i32>} : memref<1x2592xbf16, #tpu.memory_space<vmem>>, vector<1x32xbf16>,
    %23 = vector.extract_strided_slice %16 {offsets = [3, 0], sizes = [1, 32], strides = [1, 1]} : vector<96x32xbf16> to vector<1x32xbf16>
    %c0_15 = arith.constant 0 : index
    %c96 = arith.constant 96 : index
    %24 = vector.load %arg8[%c0_15, %c96] : memref<1x2592xbf16, #tpu.memory_space<vmem>>, vector<1x32xbf16>
    tpu.vector_store %arg8[%c0_15, %c96], %23 {strides = array<i32>} : memref<1x2592xbf16, #tpu.memory_space<vmem>>, vector<1x32xbf16>,
    %25 = vector.extract_strided_slice %16 {offsets = [4, 0], sizes = [1, 32], strides = [1, 1]} : vector<96x32xbf16> to vector<1x32xbf16>
    %c0_16 = arith.constant 0 : index
    %c128 = arith.constant 128 : index
    %26 = vector.load %arg8[%c0_16, %c128] : memref<1x2592xbf16, #tpu.memory_space<vmem>>, vector<1x32xbf16>
    tpu.vector_store %arg8[%c0_16, %c128], %25 {strides = array<i32>} : memref<1x2592xbf16, #tpu.memory_space<vmem>>, vector<1x32xbf16>,
    %27 = vector.extract_strided_slice %16 {offsets = [5, 0], sizes = [1, 32], strides = [1, 1]} : vector<96x32xbf16> to vector<1x32xbf16>
    %c0_17 = arith.constant 0 : index
    %c160 = arith.constant 160 : index
    %28 = vector.load %arg8[%c0_17, %c160] : memref<1x2592xbf16, #tpu.memory_space<vmem>>, vector<1x32xbf16>
    tpu.vector_store %arg8[%c0_17, %c160], %27 {strides = array<i32>} : memref<1x2592xbf16, #tpu.memory_space<vmem>>, vector<1x32xbf16>,
    %29 = vector.extract_strided_slice %16 {offsets = [6, 0], sizes = [1, 32], strides = [1, 1]} : vector<96x32xbf16> to vector<1x32xbf16>
    %c0_18 = arith.constant 0 : index
    %c192 = arith.constant 192 : index
    %30 = vector.load %arg8[%c0_18, %c192] : memref<1x2592xbf16, #tpu.memory_space<vmem>>, vector<1x32xbf16>
    tpu.vector_store %arg8[%c0_18, %c192], %29 {strides = array<i32>} : memref<1x2592xbf16, #tpu.memory_space<vmem>>, vector<1x32xbf16>,
    %31 = vector.extract_strided_slice %16 {offsets = [7, 0], sizes = [1, 32], strides = [1, 1]} : vector<96x32xbf16> to vector<1x32xbf16>
    %c0_19 = arith.constant 0 : index
    %c224 = arith.constant 224 : index
    %32 = vector.load %arg8[%c0_19, %c224] : memref<1x2592xbf16, #tpu.memory_space<vmem>>, vector<1x32xbf16>
    tpu.vector_store %arg8[%c0_19, %c224], %31 {strides = array<i32>} : memref<1x2592xbf16, #tpu.memory_space<vmem>>, vector<1x32xbf16>,
    %33 = vector.extract_strided_slice %16 {offsets = [8, 0], sizes = [1, 32], strides = [1, 1]} : vector<96x32xbf16> to vector<1x32xbf16>
    %c0_20 = arith.constant 0 : index
    %c256_21 = arith.constant 256 : index
    %34 = vector.load %arg8[%c0_20, %c256_21] : memref<1x2592xbf16, #tpu.memory_space<vmem>>, vector<1x32xbf16>
    tpu.vector_store %arg8[%c0_20, %c256_21], %33 {strides = array<i32>} : memref<1x2592xbf16, #tpu.memory_space<vmem>>, vector<1x32xbf16>,
    %35 = vector.extract_strided_slice %16 {offsets = [9, 0], sizes = [1, 32], strides = [1, 1]} : vector<96x32xbf16> to vector<1x32xbf16>
    %c0_22 = arith.constant 0 : index
    %c288 = arith.constant 288 : index
    %36 = vector.load %arg8[%c0_22, %c288] : memref<1x2592xbf16, #tpu.memory_space<vmem>>, vector<1x32xbf16>
    tpu.vector_store %arg8[%c0_22, %c288], %35 {strides = array<i32>} : memref<1x2592xbf16, #tpu.memory_space<vmem>>, vector<1x32xbf16>,
    %37 = vector.extract_strided_slice %16 {offsets = [10, 0], sizes = [1, 32], strides = [1, 1]} : vector<96x32xbf16> to vector<1x32xbf16>
    %c0_23 = arith.constant 0 : index
    %c320 = arith.constant 320 : index
    %38 = vector.load %arg8[%c0_23, %c320] : memref<1x2592xbf16, #tpu.memory_space<vmem>>, vector<1x32xbf16>
    tpu.vector_store %arg8[%c0_23, %c320], %37 {strides = array<i32>} : memref<1x2592xbf16, #tpu.memory_space<vmem>>, vector<1x32xbf16>,
    %39 = vector.extract_strided_slice %16 {offsets = [11, 0], sizes = [1, 32], strides = [1, 1]} : vector<96x32xbf16> to vector<1x32xbf16>
    %c0_24 = arith.constant 0 : index
    %c352 = arith.constant 352 : index
    %40 = vector.load %arg8[%c0_24, %c352] : memref<1x2592xbf16, #tpu.memory_space<vmem>>, vector<1x32xbf16>
    tpu.vector_store %arg8[%c0_24, %c352], %39 {strides = array<i32>} : memref<1x2592xbf16, #tpu.memory_space<vmem>>, vector<1x32xbf16>,
    %41 = vector.extract_strided_slice %16 {offsets = [12, 0], sizes = [1, 32], strides = [1, 1]} : vector<96x32xbf16> to vector<1x32xbf16>
    %c0_25 = arith.constant 0 : index
    %c384 = arith.constant 384 : index
    %42 = vector.load %arg8[%c0_25, %c384] : memref<1x2592xbf16, #tpu.memory_space<vmem>>, vector<1x32xbf16>
    tpu.vector_store %arg8[%c0_25, %c384], %41 {strides = array<i32>} : memref<1x2592xbf16, #tpu.memory_space<vmem>>, vector<1x32xbf16>,
    %43 = vector.extract_strided_slice %16 {offsets = [13, 0], sizes = [1, 32], strides = [1, 1]} : vector<96x32xbf16> to vector<1x32xbf16>
    %c0_26 = arith.constant 0 : index
    %c416 = arith.constant 416 : index
    %44 = vector.load %arg8[%c0_26, %c416] : memref<1x2592xbf16, #tpu.memory_space<vmem>>, vector<1x32xbf16>
    tpu.vector_store %arg8[%c0_26, %c416], %43 {strides = array<i32>} : memref<1x2592xbf16, #tpu.memory_space<vmem>>, vector<1x32xbf16>,
    %45 = vector.extract_strided_slice %16 {offsets = [14, 0], sizes = [1, 32], strides = [1, 1]} : vector<96x32xbf16> to vector<1x32xbf16>
    %c0_27 = arith.constant 0 : index
    %c448 = arith.constant 448 : index
    %46 = vector.load %arg8[%c0_27, %c448] : memref<1x2592xbf16, #tpu.memory_space<vmem>>, vector<1x32xbf16>
    tpu.vector_store %arg8[%c0_27, %c448], %45 {strides = array<i32>} : memref<1x2592xbf16, #tpu.memory_space<vmem>>, vector<1x32xbf16>,
    %47 = vector.extract_strided_slice %16 {offsets = [15, 0], sizes = [1, 32], strides = [1, 1]} : vector<96x32xbf16> to vector<1x32xbf16>
    %c0_28 = arith.constant 0 : index
    %c480 = arith.constant 480 : index
    %48 = vector.load %arg8[%c0_28, %c480] : memref<1x2592xbf16, #tpu.memory_space<vmem>>, vector<1x32xbf16>
    tpu.vector_store %arg8[%c0_28, %c480], %47 {strides = array<i32>} : memref<1x2592xbf16, #tpu.memory_space<vmem>>, vector<1x32xbf16>,
    %49 = vector.extract_strided_slice %16 {offsets = [16, 0], sizes = [1, 32], strides = [1, 1]} : vector<96x32xbf16> to vector<1x32xbf16>
    %c0_29 = arith.constant 0 : index
    %c512 = arith.constant 512 : index
    %50 = vector.load %arg8[%c0_29, %c512] : memref<1x2592xbf16, #tpu.memory_space<vmem>>, vector<1x32xbf16>
    tpu.vector_store %arg8[%c0_29, %c512], %49 {strides = array<i32>} : memref<1x2592xbf16, #tpu.memory_space<vmem>>, vector<1x32xbf16>,
    %51 = vector.extract_strided_slice %16 {offsets = [17, 0], sizes = [1, 32], strides = [1, 1]} : vector<96x32xbf16> to vector<1x32xbf16>
    %c0_30 = arith.constant 0 : index
    %c544 = arith.constant 544 : index
    %52 = vector.load %arg8[%c0_30, %c544] : memref<1x2592xbf16, #tpu.memory_space<vmem>>, vector<1x32xbf16>
    tpu.vector_store %arg8[%c0_30, %c544], %51 {strides = array<i32>} : memref<1x2592xbf16, #tpu.memory_space<vmem>>, vector<1x32xbf16>,
    %53 = vector.extract_strided_slice %16 {offsets = [18, 0], sizes = [1, 32], strides = [1, 1]} : vector<96x32xbf16> to vector<1x32xbf16>
    %c0_31 = arith.constant 0 : index
    %c576 = arith.constant 576 : index
    %54 = vector.load %arg8[%c0_31, %c576] : memref<1x2592xbf16, #tpu.memory_space<vmem>>, vector<1x32xbf16>
    tpu.vector_store %arg8[%c0_31, %c576], %53 {strides = array<i32>} : memref<1x2592xbf16, #tpu.memory_space<vmem>>, vector<1x32xbf16>,
    %55 = vector.extract_strided_slice %16 {offsets = [19, 0], sizes = [1, 32], strides = [1, 1]} : vector<96x32xbf16> to vector<1x32xbf16>
    %c0_32 = arith.constant 0 : index
    %c608 = arith.constant 608 : index
    %56 = vector.load %arg8[%c0_32, %c608] : memref<1x2592xbf16, #tpu.memory_space<vmem>>, vector<1x32xbf16>
    tpu.vector_store %arg8[%c0_32, %c608], %55 {strides = array<i32>} : memref<1x2592xbf16, #tpu.memory_space<vmem>>, vector<1x32xbf16>,
    %57 = vector.extract_strided_slice %16 {offsets = [20, 0], sizes = [1, 32], strides = [1, 1]} : vector<96x32xbf16> to vector<1x32xbf16>
    %c0_33 = arith.constant 0 : index
    %c640 = arith.constant 640 : index
    %58 = vector.load %arg8[%c0_33, %c640] : memref<1x2592xbf16, #tpu.memory_space<vmem>>, vector<1x32xbf16>
    tpu.vector_store %arg8[%c0_33, %c640], %57 {strides = array<i32>} : memref<1x2592xbf16, #tpu.memory_space<vmem>>, vector<1x32xbf16>,
    %59 = vector.extract_strided_slice %16 {offsets = [21, 0], sizes = [1, 32], strides = [1, 1]} : vector<96x32xbf16> to vector<1x32xbf16>
    %c0_34 = arith.constant 0 : index
    %c672 = arith.constant 672 : index
    %60 = vector.load %arg8[%c0_34, %c672] : memref<1x2592xbf16, #tpu.memory_space<vmem>>, vector<1x32xbf16>
    tpu.vector_store %arg8[%c0_34, %c672], %59 {strides = array<i32>} : memref<1x2592xbf16, #tpu.memory_space<vmem>>, vector<1x32xbf16>,
    %61 = vector.extract_strided_slice %16 {offsets = [22, 0], sizes = [1, 32], strides = [1, 1]} : vector<96x32xbf16> to vector<1x32xbf16>
    %c0_35 = arith.constant 0 : index
    %c704 = arith.constant 704 : index
    %62 = vector.load %arg8[%c0_35, %c704] : memref<1x2592xbf16, #tpu.memory_space<vmem>>, vector<1x32xbf16>
    tpu.vector_store %arg8[%c0_35, %c704], %61 {strides = array<i32>} : memref<1x2592xbf16, #tpu.memory_space<vmem>>, vector<1x32xbf16>,
    %63 = vector.extract_strided_slice %16 {offsets = [23, 0], sizes = [1, 32], strides = [1, 1]} : vector<96x32xbf16> to vector<1x32xbf16>
    %c0_36 = arith.constant 0 : index
    %c736 = arith.constant 736 : index
    %64 = vector.load %arg8[%c0_36, %c736] : memref<1x2592xbf16, #tpu.memory_space<vmem>>, vector<1x32xbf16>
    tpu.vector_store %arg8[%c0_36, %c736], %63 {strides = array<i32>} : memref<1x2592xbf16, #tpu.memory_space<vmem>>, vector<1x32xbf16>,
    %65 = vector.extract_strided_slice %16 {offsets = [24, 0], sizes = [1, 32], strides = [1, 1]} : vector<96x32xbf16> to vector<1x32xbf16>
    %c0_37 = arith.constant 0 : index
    %c768 = arith.constant 768 : index
    %66 = vector.load %arg8[%c0_37, %c768] : memref<1x2592xbf16, #tpu.memory_space<vmem>>, vector<1x32xbf16>
    tpu.vector_store %arg8[%c0_37, %c768], %65 {strides = array<i32>} : memref<1x2592xbf16, #tpu.memory_space<vmem>>, vector<1x32xbf16>,
    %67 = vector.extract_strided_slice %16 {offsets = [25, 0], sizes = [1, 32], strides = [1, 1]} : vector<96x32xbf16> to vector<1x32xbf16>
    %c0_38 = arith.constant 0 : index
    %c800 = arith.constant 800 : index
    %68 = vector.load %arg8[%c0_38, %c800] : memref<1x2592xbf16, #tpu.memory_space<vmem>>, vector<1x32xbf16>
    tpu.vector_store %arg8[%c0_38, %c800], %67 {strides = array<i32>} : memref<1x2592xbf16, #tpu.memory_space<vmem>>, vector<1x32xbf16>,
    %69 = vector.extract_strided_slice %16 {offsets = [26, 0], sizes = [1, 32], strides = [1, 1]} : vector<96x32xbf16> to vector<1x32xbf16>
    %c0_39 = arith.constant 0 : index
    %c832 = arith.constant 832 : index
    %70 = vector.load %arg8[%c0_39, %c832] : memref<1x2592xbf16, #tpu.memory_space<vmem>>, vector<1x32xbf16>
    tpu.vector_store %arg8[%c0_39, %c832], %69 {strides = array<i32>} : memref<1x2592xbf16, #tpu.memory_space<vmem>>, vector<1x32xbf16>,
    %71 = vector.extract_strided_slice %16 {offsets = [27, 0], sizes = [1, 32], strides = [1, 1]} : vector<96x32xbf16> to vector<1x32xbf16>
    %c0_40 = arith.constant 0 : index
    %c864 = arith.constant 864 : index
    %72 = vector.load %arg8[%c0_40, %c864] : memref<1x2592xbf16, #tpu.memory_space<vmem>>, vector<1x32xbf16>
    tpu.vector_store %arg8[%c0_40, %c864], %71 {strides = array<i32>} : memref<1x2592xbf16, #tpu.memory_space<vmem>>, vector<1x32xbf16>,
    %73 = vector.extract_strided_slice %16 {offsets = [28, 0], sizes = [1, 32], strides = [1, 1]} : vector<96x32xbf16> to vector<1x32xbf16>
    %c0_41 = arith.constant 0 : index
    %c896 = arith.constant 896 : index
    %74 = vector.load %arg8[%c0_41, %c896] : memref<1x2592xbf16, #tpu.memory_space<vmem>>, vector<1x32xbf16>
    tpu.vector_store %arg8[%c0_41, %c896], %73 {strides = array<i32>} : memref<1x2592xbf16, #tpu.memory_space<vmem>>, vector<1x32xbf16>,
    %75 = vector.extract_strided_slice %16 {offsets = [29, 0], sizes = [1, 32], strides = [1, 1]} : vector<96x32xbf16> to vector<1x32xbf16>
    %c0_42 = arith.constant 0 : index
    %c928 = arith.constant 928 : index
    %76 = vector.load %arg8[%c0_42, %c928] : memref<1x2592xbf16, #tpu.memory_space<vmem>>, vector<1x32xbf16>
    tpu.vector_store %arg8[%c0_42, %c928], %75 {strides = array<i32>} : memref<1x2592xbf16, #tpu.memory_space<vmem>>, vector<1x32xbf16>,
    %77 = vector.extract_strided_slice %16 {offsets = [30, 0], sizes = [1, 32], strides = [1, 1]} : vector<96x32xbf16> to vector<1x32xbf16>
    %c0_43 = arith.constant 0 : index
    %c960 = arith.constant 960 : index
    %78 = vector.load %arg8[%c0_43, %c960] : memref<1x2592xbf16, #tpu.memory_space<vmem>>, vector<1x32xbf16>
    tpu.vector_store %arg8[%c0_43, %c960], %77 {strides = array<i32>} : memref<1x2592xbf16, #tpu.memory_space<vmem>>, vector<1x32xbf16>,
    %79 = vector.extract_strided_slice %16 {offsets = [31, 0], sizes = [1, 32], strides = [1, 1]} : vector<96x32xbf16> to vector<1x32xbf16>
    %c0_44 = arith.constant 0 : index
    %c992 = arith.constant 992 : index
    %80 = vector.load %arg8[%c0_44, %c992] : memref<1x2592xbf16, #tpu.memory_space<vmem>>, vector<1x32xbf16>
    tpu.vector_store %arg8[%c0_44, %c992], %79 {strides = array<i32>} : memref<1x2592xbf16, #tpu.memory_space<vmem>>, vector<1x32xbf16>,
    %81 = vector.extract_strided_slice %16 {offsets = [32, 0], sizes = [1, 32], strides = [1, 1]} : vector<96x32xbf16> to vector<1x32xbf16>
    %c0_45 = arith.constant 0 : index
    %c1024 = arith.constant 1024 : index
    %82 = vector.load %arg8[%c0_45, %c1024] : memref<1x2592xbf16, #tpu.memory_space<vmem>>, vector<1x32xbf16>
    tpu.vector_store %arg8[%c0_45, %c1024], %81 {strides = array<i32>} : memref<1x2592xbf16, #tpu.memory_space<vmem>>, vector<1x32xbf16>,
    %83 = vector.extract_strided_slice %16 {offsets = [33, 0], sizes = [1, 32], strides = [1, 1]} : vector<96x32xbf16> to vector<1x32xbf16>
    %c0_46 = arith.constant 0 : index
    %c1056 = arith.constant 1056 : index
    %84 = vector.load %arg8[%c0_46, %c1056] : memref<1x2592xbf16, #tpu.memory_space<vmem>>, vector<1x32xbf16>
    tpu.vector_store %arg8[%c0_46, %c1056], %83 {strides = array<i32>} : memref<1x2592xbf16, #tpu.memory_space<vmem>>, vector<1x32xbf16>,
    %85 = vector.extract_strided_slice %16 {offsets = [34, 0], sizes = [1, 32], strides = [1, 1]} : vector<96x32xbf16> to vector<1x32xbf16>
    %c0_47 = arith.constant 0 : index
    %c1088 = arith.constant 1088 : index
    %86 = vector.load %arg8[%c0_47, %c1088] : memref<1x2592xbf16, #tpu.memory_space<vmem>>, vector<1x32xbf16>
    tpu.vector_store %arg8[%c0_47, %c1088], %85 {strides = array<i32>} : memref<1x2592xbf16, #tpu.memory_space<vmem>>, vector<1x32xbf16>,
    %87 = vector.extract_strided_slice %16 {offsets = [35, 0], sizes = [1, 32], strides = [1, 1]} : vector<96x32xbf16> to vector<1x32xbf16>
    %c0_48 = arith.constant 0 : index
    %c1120 = arith.constant 1120 : index
    %88 = vector.load %arg8[%c0_48, %c1120] : memref<1x2592xbf16, #tpu.memory_space<vmem>>, vector<1x32xbf16>
    tpu.vector_store %arg8[%c0_48, %c1120], %87 {strides = array<i32>} : memref<1x2592xbf16, #tpu.memory_space<vmem>>, vector<1x32xbf16>,
    %89 = vector.extract_strided_slice %16 {offsets = [36, 0], sizes = [1, 32], strides = [1, 1]} : vector<96x32xbf16> to vector<1x32xbf16>
    %c0_49 = arith.constant 0 : index
    %c1152 = arith.constant 1152 : index
    %90 = vector.load %arg8[%c0_49, %c1152] : memref<1x2592xbf16, #tpu.memory_space<vmem>>, vector<1x32xbf16>
    tpu.vector_store %arg8[%c0_49, %c1152], %89 {strides = array<i32>} : memref<1x2592xbf16, #tpu.memory_space<vmem>>, vector<1x32xbf16>,
    %91 = vector.extract_strided_slice %16 {offsets = [37, 0], sizes = [1, 32], strides = [1, 1]} : vector<96x32xbf16> to vector<1x32xbf16>
    %c0_50 = arith.constant 0 : index
    %c1184 = arith.constant 1184 : index
    %92 = vector.load %arg8[%c0_50, %c1184] : memref<1x2592xbf16, #tpu.memory_space<vmem>>, vector<1x32xbf16>
    tpu.vector_store %arg8[%c0_50, %c1184], %91 {strides = array<i32>} : memref<1x2592xbf16, #tpu.memory_space<vmem>>, vector<1x32xbf16>,
    %93 = vector.extract_strided_slice %16 {offsets = [38, 0], sizes = [1, 32], strides = [1, 1]} : vector<96x32xbf16> to vector<1x32xbf16>
    %c0_51 = arith.constant 0 : index
    %c1216 = arith.constant 1216 : index
    %94 = vector.load %arg8[%c0_51, %c1216] : memref<1x2592xbf16, #tpu.memory_space<vmem>>, vector<1x32xbf16>
    tpu.vector_store %arg8[%c0_51, %c1216], %93 {strides = array<i32>} : memref<1x2592xbf16, #tpu.memory_space<vmem>>, vector<1x32xbf16>,
    %95 = vector.extract_strided_slice %16 {offsets = [39, 0], sizes = [1, 32], strides = [1, 1]} : vector<96x32xbf16> to vector<1x32xbf16>
    %c0_52 = arith.constant 0 : index
    %c1248 = arith.constant 1248 : index
    %96 = vector.load %arg8[%c0_52, %c1248] : memref<1x2592xbf16, #tpu.memory_space<vmem>>, vector<1x32xbf16>
    tpu.vector_store %arg8[%c0_52, %c1248], %95 {strides = array<i32>} : memref<1x2592xbf16, #tpu.memory_space<vmem>>, vector<1x32xbf16>,
    %97 = vector.extract_strided_slice %16 {offsets = [40, 0], sizes = [1, 32], strides = [1, 1]} : vector<96x32xbf16> to vector<1x32xbf16>
    %c0_53 = arith.constant 0 : index
    %c1280 = arith.constant 1280 : index
    %98 = vector.load %arg8[%c0_53, %c1280] : memref<1x2592xbf16, #tpu.memory_space<vmem>>, vector<1x32xbf16>
    tpu.vector_store %arg8[%c0_53, %c1280], %97 {strides = array<i32>} : memref<1x2592xbf16, #tpu.memory_space<vmem>>, vector<1x32xbf16>,
    %99 = vector.extract_strided_slice %16 {offsets = [41, 0], sizes = [1, 32], strides = [1, 1]} : vector<96x32xbf16> to vector<1x32xbf16>
    %c0_54 = arith.constant 0 : index
    %c1312 = arith.constant 1312 : index
    %100 = vector.load %arg8[%c0_54, %c1312] : memref<1x2592xbf16, #tpu.memory_space<vmem>>, vector<1x32xbf16>
    tpu.vector_store %arg8[%c0_54, %c1312], %99 {strides = array<i32>} : memref<1x2592xbf16, #tpu.memory_space<vmem>>, vector<1x32xbf16>,
    %101 = vector.extract_strided_slice %16 {offsets = [42, 0], sizes = [1, 32], strides = [1, 1]} : vector<96x32xbf16> to vector<1x32xbf16>
    %c0_55 = arith.constant 0 : index
    %c1344 = arith.constant 1344 : index
    %102 = vector.load %arg8[%c0_55, %c1344] : memref<1x2592xbf16, #tpu.memory_space<vmem>>, vector<1x32xbf16>
    tpu.vector_store %arg8[%c0_55, %c1344], %101 {strides = array<i32>} : memref<1x2592xbf16, #tpu.memory_space<vmem>>, vector<1x32xbf16>,
    %103 = vector.extract_strided_slice %16 {offsets = [43, 0], sizes = [1, 32], strides = [1, 1]} : vector<96x32xbf16> to vector<1x32xbf16>
    %c0_56 = arith.constant 0 : index
    %c1376 = arith.constant 1376 : index
    %104 = vector.load %arg8[%c0_56, %c1376] : memref<1x2592xbf16, #tpu.memory_space<vmem>>, vector<1x32xbf16>
    tpu.vector_store %arg8[%c0_56, %c1376], %103 {strides = array<i32>} : memref<1x2592xbf16, #tpu.memory_space<vmem>>, vector<1x32xbf16>,
    %105 = vector.extract_strided_slice %16 {offsets = [44, 0], sizes = [1, 32], strides = [1, 1]} : vector<96x32xbf16> to vector<1x32xbf16>
    %c0_57 = arith.constant 0 : index
    %c1408 = arith.constant 1408 : index
    %106 = vector.load %arg8[%c0_57, %c1408] : memref<1x2592xbf16, #tpu.memory_space<vmem>>, vector<1x32xbf16>
    tpu.vector_store %arg8[%c0_57, %c1408], %105 {strides = array<i32>} : memref<1x2592xbf16, #tpu.memory_space<vmem>>, vector<1x32xbf16>,
    %107 = vector.extract_strided_slice %16 {offsets = [45, 0], sizes = [1, 32], strides = [1, 1]} : vector<96x32xbf16> to vector<1x32xbf16>
    %c0_58 = arith.constant 0 : index
    %c1440 = arith.constant 1440 : index
    %108 = vector.load %arg8[%c0_58, %c1440] : memref<1x2592xbf16, #tpu.memory_space<vmem>>, vector<1x32xbf16>
    tpu.vector_store %arg8[%c0_58, %c1440], %107 {strides = array<i32>} : memref<1x2592xbf16, #tpu.memory_space<vmem>>, vector<1x32xbf16>,
    %109 = vector.extract_strided_slice %16 {offsets = [46, 0], sizes = [1, 32], strides = [1, 1]} : vector<96x32xbf16> to vector<1x32xbf16>
    %c0_59 = arith.constant 0 : index
    %c1472 = arith.constant 1472 : index
    %110 = vector.load %arg8[%c0_59, %c1472] : memref<1x2592xbf16, #tpu.memory_space<vmem>>, vector<1x32xbf16>
    tpu.vector_store %arg8[%c0_59, %c1472], %109 {strides = array<i32>} : memref<1x2592xbf16, #tpu.memory_space<vmem>>, vector<1x32xbf16>,
    %111 = vector.extract_strided_slice %16 {offsets = [47, 0], sizes = [1, 32], strides = [1, 1]} : vector<96x32xbf16> to vector<1x32xbf16>
    %c0_60 = arith.constant 0 : index
    %c1504 = arith.constant 1504 : index
    %112 = vector.load %arg8[%c0_60, %c1504] : memref<1x2592xbf16, #tpu.memory_space<vmem>>, vector<1x32xbf16>
    tpu.vector_store %arg8[%c0_60, %c1504], %111 {strides = array<i32>} : memref<1x2592xbf16, #tpu.memory_space<vmem>>, vector<1x32xbf16>,
    %113 = vector.extract_strided_slice %16 {offsets = [48, 0], sizes = [1, 32], strides = [1, 1]} : vector<96x32xbf16> to vector<1x32xbf16>
    %c0_61 = arith.constant 0 : index
    %c1536 = arith.constant 1536 : index
    %114 = vector.load %arg8[%c0_61, %c1536] : memref<1x2592xbf16, #tpu.memory_space<vmem>>, vector<1x32xbf16>
    tpu.vector_store %arg8[%c0_61, %c1536], %113 {strides = array<i32>} : memref<1x2592xbf16, #tpu.memory_space<vmem>>, vector<1x32xbf16>,
    %115 = vector.extract_strided_slice %16 {offsets = [49, 0], sizes = [1, 32], strides = [1, 1]} : vector<96x32xbf16> to vector<1x32xbf16>
    %c0_62 = arith.constant 0 : index
    %c1568 = arith.constant 1568 : index
    %116 = vector.load %arg8[%c0_62, %c1568] : memref<1x2592xbf16, #tpu.memory_space<vmem>>, vector<1x32xbf16>
    tpu.vector_store %arg8[%c0_62, %c1568], %115 {strides = array<i32>} : memref<1x2592xbf16, #tpu.memory_space<vmem>>, vector<1x32xbf16>,
    %117 = vector.extract_strided_slice %16 {offsets = [50, 0], sizes = [1, 32], strides = [1, 1]} : vector<96x32xbf16> to vector<1x32xbf16>
    %c0_63 = arith.constant 0 : index
    %c1600 = arith.constant 1600 : index
    %118 = vector.load %arg8[%c0_63, %c1600] : memref<1x2592xbf16, #tpu.memory_space<vmem>>, vector<1x32xbf16>
    tpu.vector_store %arg8[%c0_63, %c1600], %117 {strides = array<i32>} : memref<1x2592xbf16, #tpu.memory_space<vmem>>, vector<1x32xbf16>,
    %119 = vector.extract_strided_slice %16 {offsets = [51, 0], sizes = [1, 32], strides = [1, 1]} : vector<96x32xbf16> to vector<1x32xbf16>
    %c0_64 = arith.constant 0 : index
    %c1632 = arith.constant 1632 : index
    %120 = vector.load %arg8[%c0_64, %c1632] : memref<1x2592xbf16, #tpu.memory_space<vmem>>, vector<1x32xbf16>
    tpu.vector_store %arg8[%c0_64, %c1632], %119 {strides = array<i32>} : memref<1x2592xbf16, #tpu.memory_space<vmem>>, vector<1x32xbf16>,
    %121 = vector.extract_strided_slice %16 {offsets = [52, 0], sizes = [1, 32], strides = [1, 1]} : vector<96x32xbf16> to vector<1x32xbf16>
    %c0_65 = arith.constant 0 : index
    %c1664 = arith.constant 1664 : index
    %122 = vector.load %arg8[%c0_65, %c1664] : memref<1x2592xbf16, #tpu.memory_space<vmem>>, vector<1x32xbf16>
    tpu.vector_store %arg8[%c0_65, %c1664], %121 {strides = array<i32>} : memref<1x2592xbf16, #tpu.memory_space<vmem>>, vector<1x32xbf16>,
    %123 = vector.extract_strided_slice %16 {offsets = [53, 0], sizes = [1, 32], strides = [1, 1]} : vector<96x32xbf16> to vector<1x32xbf16>
    %c0_66 = arith.constant 0 : index
    %c1696 = arith.constant 1696 : index
    %124 = vector.load %arg8[%c0_66, %c1696] : memref<1x2592xbf16, #tpu.memory_space<vmem>>, vector<1x32xbf16>
    tpu.vector_store %arg8[%c0_66, %c1696], %123 {strides = array<i32>} : memref<1x2592xbf16, #tpu.memory_space<vmem>>, vector<1x32xbf16>,
    %125 = vector.extract_strided_slice %16 {offsets = [54, 0], sizes = [1, 32], strides = [1, 1]} : vector<96x32xbf16> to vector<1x32xbf16>
    %c0_67 = arith.constant 0 : index
    %c1728 = arith.constant 1728 : index
    %126 = vector.load %arg8[%c0_67, %c1728] : memref<1x2592xbf16, #tpu.memory_space<vmem>>, vector<1x32xbf16>
    tpu.vector_store %arg8[%c0_67, %c1728], %125 {strides = array<i32>} : memref<1x2592xbf16, #tpu.memory_space<vmem>>, vector<1x32xbf16>,
    %127 = vector.extract_strided_slice %16 {offsets = [55, 0], sizes = [1, 32], strides = [1, 1]} : vector<96x32xbf16> to vector<1x32xbf16>
    %c0_68 = arith.constant 0 : index
    %c1760 = arith.constant 1760 : index
    %128 = vector.load %arg8[%c0_68, %c1760] : memref<1x2592xbf16, #tpu.memory_space<vmem>>, vector<1x32xbf16>
    tpu.vector_store %arg8[%c0_68, %c1760], %127 {strides = array<i32>} : memref<1x2592xbf16, #tpu.memory_space<vmem>>, vector<1x32xbf16>,
    %129 = vector.extract_strided_slice %16 {offsets = [56, 0], sizes = [1, 32], strides = [1, 1]} : vector<96x32xbf16> to vector<1x32xbf16>
    %c0_69 = arith.constant 0 : index
    %c1792 = arith.constant 1792 : index
    %130 = vector.load %arg8[%c0_69, %c1792] : memref<1x2592xbf16, #tpu.memory_space<vmem>>, vector<1x32xbf16>
    tpu.vector_store %arg8[%c0_69, %c1792], %129 {strides = array<i32>} : memref<1x2592xbf16, #tpu.memory_space<vmem>>, vector<1x32xbf16>,
    %131 = vector.extract_strided_slice %16 {offsets = [57, 0], sizes = [1, 32], strides = [1, 1]} : vector<96x32xbf16> to vector<1x32xbf16>
    %c0_70 = arith.constant 0 : index
    %c1824 = arith.constant 1824 : index
    %132 = vector.load %arg8[%c0_70, %c1824] : memref<1x2592xbf16, #tpu.memory_space<vmem>>, vector<1x32xbf16>
    tpu.vector_store %arg8[%c0_70, %c1824], %131 {strides = array<i32>} : memref<1x2592xbf16, #tpu.memory_space<vmem>>, vector<1x32xbf16>,
    %133 = vector.extract_strided_slice %16 {offsets = [58, 0], sizes = [1, 32], strides = [1, 1]} : vector<96x32xbf16> to vector<1x32xbf16>
    %c0_71 = arith.constant 0 : index
    %c1856 = arith.constant 1856 : index
    %134 = vector.load %arg8[%c0_71, %c1856] : memref<1x2592xbf16, #tpu.memory_space<vmem>>, vector<1x32xbf16>
    tpu.vector_store %arg8[%c0_71, %c1856], %133 {strides = array<i32>} : memref<1x2592xbf16, #tpu.memory_space<vmem>>, vector<1x32xbf16>,
    %135 = vector.extract_strided_slice %16 {offsets = [59, 0], sizes = [1, 32], strides = [1, 1]} : vector<96x32xbf16> to vector<1x32xbf16>
    %c0_72 = arith.constant 0 : index
    %c1888 = arith.constant 1888 : index
    %136 = vector.load %arg8[%c0_72, %c1888] : memref<1x2592xbf16, #tpu.memory_space<vmem>>, vector<1x32xbf16>
    tpu.vector_store %arg8[%c0_72, %c1888], %135 {strides = array<i32>} : memref<1x2592xbf16, #tpu.memory_space<vmem>>, vector<1x32xbf16>,
    %137 = vector.extract_strided_slice %16 {offsets = [60, 0], sizes = [1, 32], strides = [1, 1]} : vector<96x32xbf16> to vector<1x32xbf16>
    %c0_73 = arith.constant 0 : index
    %c1920 = arith.constant 1920 : index
    %138 = vector.load %arg8[%c0_73, %c1920] : memref<1x2592xbf16, #tpu.memory_space<vmem>>, vector<1x32xbf16>
    tpu.vector_store %arg8[%c0_73, %c1920], %137 {strides = array<i32>} : memref<1x2592xbf16, #tpu.memory_space<vmem>>, vector<1x32xbf16>,
    %139 = vector.extract_strided_slice %16 {offsets = [61, 0], sizes = [1, 32], strides = [1, 1]} : vector<96x32xbf16> to vector<1x32xbf16>
    %c0_74 = arith.constant 0 : index
    %c1952 = arith.constant 1952 : index
    %140 = vector.load %arg8[%c0_74, %c1952] : memref<1x2592xbf16, #tpu.memory_space<vmem>>, vector<1x32xbf16>
    tpu.vector_store %arg8[%c0_74, %c1952], %139 {strides = array<i32>} : memref<1x2592xbf16, #tpu.memory_space<vmem>>, vector<1x32xbf16>,
    %141 = vector.extract_strided_slice %16 {offsets = [62, 0], sizes = [1, 32], strides = [1, 1]} : vector<96x32xbf16> to vector<1x32xbf16>
    %c0_75 = arith.constant 0 : index
    %c1984 = arith.constant 1984 : index
    %142 = vector.load %arg8[%c0_75, %c1984] : memref<1x2592xbf16, #tpu.memory_space<vmem>>, vector<1x32xbf16>
    tpu.vector_store %arg8[%c0_75, %c1984], %141 {strides = array<i32>} : memref<1x2592xbf16, #tpu.memory_space<vmem>>, vector<1x32xbf16>,
    %143 = vector.extract_strided_slice %16 {offsets = [63, 0], sizes = [1, 32], strides = [1, 1]} : vector<96x32xbf16> to vector<1x32xbf16>
    %c0_76 = arith.constant 0 : index
    %c2016 = arith.constant 2016 : index
    %144 = vector.load %arg8[%c0_76, %c2016] : memref<1x2592xbf16, #tpu.memory_space<vmem>>, vector<1x32xbf16>
    tpu.vector_store %arg8[%c0_76, %c2016], %143 {strides = array<i32>} : memref<1x2592xbf16, #tpu.memory_space<vmem>>, vector<1x32xbf16>,
    %145 = vector.extract_strided_slice %16 {offsets = [64, 0], sizes = [1, 32], strides = [1, 1]} : vector<96x32xbf16> to vector<1x32xbf16>
    %c0_77 = arith.constant 0 : index
    %c2048 = arith.constant 2048 : index
    %146 = vector.load %arg8[%c0_77, %c2048] : memref<1x2592xbf16, #tpu.memory_space<vmem>>, vector<1x32xbf16>
    tpu.vector_store %arg8[%c0_77, %c2048], %145 {strides = array<i32>} : memref<1x2592xbf16, #tpu.memory_space<vmem>>, vector<1x32xbf16>,
    %147 = vector.extract_strided_slice %16 {offsets = [65, 0], sizes = [1, 32], strides = [1, 1]} : vector<96x32xbf16> to vector<1x32xbf16>
    %c0_78 = arith.constant 0 : index
    %c2080 = arith.constant 2080 : index
    %148 = vector.load %arg8[%c0_78, %c2080] : memref<1x2592xbf16, #tpu.memory_space<vmem>>, vector<1x32xbf16>
    tpu.vector_store %arg8[%c0_78, %c2080], %147 {strides = array<i32>} : memref<1x2592xbf16, #tpu.memory_space<vmem>>, vector<1x32xbf16>,
    %149 = vector.extract_strided_slice %16 {offsets = [66, 0], sizes = [1, 32], strides = [1, 1]} : vector<96x32xbf16> to vector<1x32xbf16>
    %c0_79 = arith.constant 0 : index
    %c2112 = arith.constant 2112 : index
    %150 = vector.load %arg8[%c0_79, %c2112] : memref<1x2592xbf16, #tpu.memory_space<vmem>>, vector<1x32xbf16>
    tpu.vector_store %arg8[%c0_79, %c2112], %149 {strides = array<i32>} : memref<1x2592xbf16, #tpu.memory_space<vmem>>, vector<1x32xbf16>,
    %151 = vector.extract_strided_slice %16 {offsets = [67, 0], sizes = [1, 32], strides = [1, 1]} : vector<96x32xbf16> to vector<1x32xbf16>
    %c0_80 = arith.constant 0 : index
    %c2144 = arith.constant 2144 : index
    %152 = vector.load %arg8[%c0_80, %c2144] : memref<1x2592xbf16, #tpu.memory_space<vmem>>, vector<1x32xbf16>
    tpu.vector_store %arg8[%c0_80, %c2144], %151 {strides = array<i32>} : memref<1x2592xbf16, #tpu.memory_space<vmem>>, vector<1x32xbf16>,
    %153 = vector.extract_strided_slice %16 {offsets = [68, 0], sizes = [1, 32], strides = [1, 1]} : vector<96x32xbf16> to vector<1x32xbf16>
    %c0_81 = arith.constant 0 : index
    %c2176 = arith.constant 2176 : index
    %154 = vector.load %arg8[%c0_81, %c2176] : memref<1x2592xbf16, #tpu.memory_space<vmem>>, vector<1x32xbf16>
    tpu.vector_store %arg8[%c0_81, %c2176], %153 {strides = array<i32>} : memref<1x2592xbf16, #tpu.memory_space<vmem>>, vector<1x32xbf16>,
    %155 = vector.extract_strided_slice %16 {offsets = [69, 0], sizes = [1, 32], strides = [1, 1]} : vector<96x32xbf16> to vector<1x32xbf16>
    %c0_82 = arith.constant 0 : index
    %c2208 = arith.constant 2208 : index
    %156 = vector.load %arg8[%c0_82, %c2208] : memref<1x2592xbf16, #tpu.memory_space<vmem>>, vector<1x32xbf16>
    tpu.vector_store %arg8[%c0_82, %c2208], %155 {strides = array<i32>} : memref<1x2592xbf16, #tpu.memory_space<vmem>>, vector<1x32xbf16>,
    %157 = vector.extract_strided_slice %16 {offsets = [70, 0], sizes = [1, 32], strides = [1, 1]} : vector<96x32xbf16> to vector<1x32xbf16>
    %c0_83 = arith.constant 0 : index
    %c2240 = arith.constant 2240 : index
    %158 = vector.load %arg8[%c0_83, %c2240] : memref<1x2592xbf16, #tpu.memory_space<vmem>>, vector<1x32xbf16>
    tpu.vector_store %arg8[%c0_83, %c2240], %157 {strides = array<i32>} : memref<1x2592xbf16, #tpu.memory_space<vmem>>, vector<1x32xbf16>,
    %159 = vector.extract_strided_slice %16 {offsets = [71, 0], sizes = [1, 32], strides = [1, 1]} : vector<96x32xbf16> to vector<1x32xbf16>
    %c0_84 = arith.constant 0 : index
    %c2272 = arith.constant 2272 : index
    %160 = vector.load %arg8[%c0_84, %c2272] : memref<1x2592xbf16, #tpu.memory_space<vmem>>, vector<1x32xbf16>
    tpu.vector_store %arg8[%c0_84, %c2272], %159 {strides = array<i32>} : memref<1x2592xbf16, #tpu.memory_space<vmem>>, vector<1x32xbf16>,
    %161 = vector.extract_strided_slice %16 {offsets = [72, 0], sizes = [1, 32], strides = [1, 1]} : vector<96x32xbf16> to vector<1x32xbf16>
    %c0_85 = arith.constant 0 : index
    %c2304 = arith.constant 2304 : index
    %162 = vector.load %arg8[%c0_85, %c2304] : memref<1x2592xbf16, #tpu.memory_space<vmem>>, vector<1x32xbf16>
    tpu.vector_store %arg8[%c0_85, %c2304], %161 {strides = array<i32>} : memref<1x2592xbf16, #tpu.memory_space<vmem>>, vector<1x32xbf16>,
    %163 = vector.extract_strided_slice %16 {offsets = [73, 0], sizes = [1, 32], strides = [1, 1]} : vector<96x32xbf16> to vector<1x32xbf16>
    %c0_86 = arith.constant 0 : index
    %c2336 = arith.constant 2336 : index
    %164 = vector.load %arg8[%c0_86, %c2336] : memref<1x2592xbf16, #tpu.memory_space<vmem>>, vector<1x32xbf16>
    tpu.vector_store %arg8[%c0_86, %c2336], %163 {strides = array<i32>} : memref<1x2592xbf16, #tpu.memory_space<vmem>>, vector<1x32xbf16>,
    %165 = vector.extract_strided_slice %16 {offsets = [74, 0], sizes = [1, 32], strides = [1, 1]} : vector<96x32xbf16> to vector<1x32xbf16>
    %c0_87 = arith.constant 0 : index
    %c2368 = arith.constant 2368 : index
    %166 = vector.load %arg8[%c0_87, %c2368] : memref<1x2592xbf16, #tpu.memory_space<vmem>>, vector<1x32xbf16>
    tpu.vector_store %arg8[%c0_87, %c2368], %165 {strides = array<i32>} : memref<1x2592xbf16, #tpu.memory_space<vmem>>, vector<1x32xbf16>,
    %167 = vector.extract_strided_slice %16 {offsets = [75, 0], sizes = [1, 32], strides = [1, 1]} : vector<96x32xbf16> to vector<1x32xbf16>
    %c0_88 = arith.constant 0 : index
    %c2400 = arith.constant 2400 : index
    %168 = vector.load %arg8[%c0_88, %c2400] : memref<1x2592xbf16, #tpu.memory_space<vmem>>, vector<1x32xbf16>
    tpu.vector_store %arg8[%c0_88, %c2400], %167 {strides = array<i32>} : memref<1x2592xbf16, #tpu.memory_space<vmem>>, vector<1x32xbf16>,
    %169 = vector.extract_strided_slice %16 {offsets = [76, 0], sizes = [1, 32], strides = [1, 1]} : vector<96x32xbf16> to vector<1x32xbf16>
    %c0_89 = arith.constant 0 : index
    %c2432 = arith.constant 2432 : index
    %170 = vector.load %arg8[%c0_89, %c2432] : memref<1x2592xbf16, #tpu.memory_space<vmem>>, vector<1x32xbf16>
    tpu.vector_store %arg8[%c0_89, %c2432], %169 {strides = array<i32>} : memref<1x2592xbf16, #tpu.memory_space<vmem>>, vector<1x32xbf16>,
    %171 = vector.extract_strided_slice %16 {offsets = [77, 0], sizes = [1, 32], strides = [1, 1]} : vector<96x32xbf16> to vector<1x32xbf16>
    %c0_90 = arith.constant 0 : index
    %c2464 = arith.constant 2464 : index
    %172 = vector.load %arg8[%c0_90, %c2464] : memref<1x2592xbf16, #tpu.memory_space<vmem>>, vector<1x32xbf16>
    tpu.vector_store %arg8[%c0_90, %c2464], %171 {strides = array<i32>} : memref<1x2592xbf16, #tpu.memory_space<vmem>>, vector<1x32xbf16>,
    %173 = vector.extract_strided_slice %16 {offsets = [78, 0], sizes = [1, 32], strides = [1, 1]} : vector<96x32xbf16> to vector<1x32xbf16>
    %c0_91 = arith.constant 0 : index
    %c2496 = arith.constant 2496 : index
    %174 = vector.load %arg8[%c0_91, %c2496] : memref<1x2592xbf16, #tpu.memory_space<vmem>>, vector<1x32xbf16>
    tpu.vector_store %arg8[%c0_91, %c2496], %173 {strides = array<i32>} : memref<1x2592xbf16, #tpu.memory_space<vmem>>, vector<1x32xbf16>,
    %175 = vector.extract_strided_slice %16 {offsets = [79, 0], sizes = [1, 32], strides = [1, 1]} : vector<96x32xbf16> to vector<1x32xbf16>
    %c0_92 = arith.constant 0 : index
    %c2528 = arith.constant 2528 : index
    %176 = vector.load %arg8[%c0_92, %c2528] : memref<1x2592xbf16, #tpu.memory_space<vmem>>, vector<1x32xbf16>
    tpu.vector_store %arg8[%c0_92, %c2528], %175 {strides = array<i32>} : memref<1x2592xbf16, #tpu.memory_space<vmem>>, vector<1x32xbf16>,
    %177 = vector.extract_strided_slice %16 {offsets = [80, 0], sizes = [1, 32], strides = [1, 1]} : vector<96x32xbf16> to vector<1x32xbf16>
    %c0_93 = arith.constant 0 : index
    %c2560 = arith.constant 2560 : index
    %178 = vector.load %arg8[%c0_93, %c2560] : memref<1x2592xbf16, #tpu.memory_space<vmem>>, vector<1x32xbf16>
    tpu.vector_store %arg8[%c0_93, %c2560], %177 {strides = array<i32>} : memref<1x2592xbf16, #tpu.memory_space<vmem>>, vector<1x32xbf16>,
    %c0_94 = arith.constant 0 : index
    %c0_95 = arith.constant 0 : index
    %179 = vector.load %arg8[%c0_94, %c0_95] : memref<1x2592xbf16, #tpu.memory_space<vmem>>, vector<1x2592xbf16>
    %c0_96 = arith.constant 0 : index
    %c0_97 = arith.constant 0 : index
    %180 = vector.load %arg4[%c0_96, %c0_97] : memref<2592x256xbf16, #tpu.memory_space<vmem>>, vector<2592x256xbf16>
    %cst_98 = arith.constant dense<0.000000e+00> : vector<1x256xf32>
    %181 = tpu.matmul %179, %180, %cst_98 {dimension_numbers = #tpu.dot_dimension_numbers<[1], [0], [0], [1], [0, 0, 1, 1], [], []>} : vector<1x2592xbf16>, vector<2592x256xbf16>, vector<1x256xf32> -> vector<1x256xf32>
    %c0_99 = arith.constant 0 : index
    %c384_100 = arith.constant 384 : index
    %182 = vector.load %arg6[%c0_99, %c384_100] : memref<1x768xf32, #tpu.memory_space<vmem>>, vector<1x256xf32>
    %183 = arith.addf %181, %182 : vector<1x256xf32>
    %cst_101 = arith.constant 0.000000e+00 : f32
    %184 = vector.broadcast %cst_101 : f32 to vector<1x256xf32>
    %185 = arith.maximumf %183, %184 : vector<1x256xf32>
    %186 = arith.truncf %185 : vector<1x256xf32> to vector<1x256xbf16>
    %c0_102 = arith.constant 0 : index
    %c0_103 = arith.constant 0 : index
    %187 = vector.load %arg5[%c0_102, %c0_103] : memref<256x4xbf16, #tpu.memory_space<vmem>>, vector<256x4xbf16>
    %cst_104 = arith.constant dense<0.000000e+00> : vector<1x4xf32>
    %188 = tpu.matmul %186, %187, %cst_104 {dimension_numbers = #tpu.dot_dimension_numbers<[1], [0], [0], [1], [0, 0, 1, 1], [], []>} : vector<1x256xbf16>, vector<256x4xbf16>, vector<1x4xf32> -> vector<1x4xf32>
    %c0_105 = arith.constant 0 : index
    %c640_106 = arith.constant 640 : index
    %189 = vector.load %arg6[%c0_105, %c640_106] : memref<1x768xf32, #tpu.memory_space<vmem>>, vector<1x4xf32>
    %190 = arith.addf %188, %189 : vector<1x4xf32>
    %191 = vector.shape_cast %190 : vector<1x4xf32> to vector<1x1x4xf32>
    %c0_107 = arith.constant 0 : index
    %c0_108 = arith.constant 0 : index
    %c0_109 = arith.constant 0 : index
    %192 = vector.load %arg7[%c0_107, %c0_108, %c0_109] : memref<1x1x4xf32, #tpu.memory_space<vmem>>, vector<1x1x4xf32>
    tpu.vector_store %arg7[%c0_107, %c0_108, %c0_109], %191 {strides = array<i32>} : memref<1x1x4xf32, #tpu.memory_space<vmem>>, vector<1x1x4xf32>,
    return
  }
  func.func @transform_0(%arg0: i32) -> (i32, i32) {
    %c0_i32 = arith.constant 0 : i32
    %c0_i32_0 = arith.constant 0 : i32
    return %arg0, %c0_i32 : i32, i32
  }
  func.func @transform_1(%arg0: i32) -> (i32, i32) {
    %c0_i32 = arith.constant 0 : i32
    %c0_i32_0 = arith.constant 0 : i32
    %c0_i32_1 = arith.constant 0 : i32
    return %c0_i32, %c0_i32_0 : i32, i32
  }
  func.func @transform_2(%arg0: i32) -> (i32, i32) {
    %c0_i32 = arith.constant 0 : i32
    %c0_i32_0 = arith.constant 0 : i32
    %c0_i32_1 = arith.constant 0 : i32
    return %c0_i32, %c0_i32_0 : i32, i32
  }
  func.func @transform_3(%arg0: i32) -> (i32, i32) {
    %c0_i32 = arith.constant 0 : i32
    %c0_i32_0 = arith.constant 0 : i32
    %c0_i32_1 = arith.constant 0 : i32
    return %c0_i32, %c0_i32_0 : i32, i32
  }
  func.func @transform_4(%arg0: i32) -> (i32, i32) {
    %c0_i32 = arith.constant 0 : i32
    %c0_i32_0 = arith.constant 0 : i32
    %c0_i32_1 = arith.constant 0 : i32
    return %c0_i32, %c0_i32_0 : i32, i32
  }
  func.func @transform_5(%arg0: i32) -> (i32, i32) {
    %c0_i32 = arith.constant 0 : i32
    %c0_i32_0 = arith.constant 0 : i32
    %c0_i32_1 = arith.constant 0 : i32
    return %c0_i32, %c0_i32_0 : i32, i32
  }
  func.func @transform_6(%arg0: i32) -> (i32, i32, i32) {
    %c0_i32 = arith.constant 0 : i32
    %c0_i32_0 = arith.constant 0 : i32
    %c0_i32_1 = arith.constant 0 : i32
    return %arg0, %c0_i32, %c0_i32_0 : i32, i32, i32
  }
}

</mosaic_0001>

<bundles_post_ra>
// kernel: dqn_forward.1
= control target key start
LH: loop header
LB: loop body
LE: loop exit
PB: predicated region body
PF: predicated region fallthrough
CT: control target
= control target key end

     0   :  { %11 = vsyncpa [#allocation4], 0  ;;  %s11183_s0 = inlined_call_operand.vmem [shape: bf16[192,1664], index: 0, kind: input, shape index: {}]   ;;  %s11184_s1 = inlined_call_operand.vmem [shape: bf16[1664,256], index: 1, kind: input, shape index: {}]   ;;  %s11185_s2 = inlined_call_operand.vmem [shape: bf16[256,32], index: 2, kind: input, shape index: {}]   ;;  %s11186_s3 = inlined_call_operand.vmem [shape: bf16[2592,256], index: 3, kind: input, shape index: {}]   ;;  %s11187_s4 = inlined_call_operand.vmem [shape: bf16[256,4], index: 4, kind: input, shape index: {}]   ;;  %s11188_s5 = inlined_call_operand.vmem [shape: f32[1,768], index: 5, kind: input, shape index: {}]   ;;  %s11189_s6 = inlined_call_operand.hbm [shape: f32[2,1,4], index: 6, kind: output, shape index: {}]  }
   0x1   :  { %13 = vsyncpa [#allocation4 + $0x1], 0  ;;  %s8706_s21 = smov 0   ;;  %s8708_s22 = smov 0  }
   0x2   :  { %s8710_s23 = smov 0   ;;  %s8712_s24 = smov 0  }
   0x3 LB: > { %s8727_s25 = sadd.s32 4294967295, %s8663_s24   ;;  %s6630_s26 = sadd.s32 4294967294, %s8663_s24   ;;  %s8663_s24 = sphi %s8712_s24, %s11203_s24   ;;  %s8659_s23 = sphi %s8710_s23, %s11202_s23   ;;  %s8655_s22 = sphi %s8708_s22, %s11201_s22   ;;  %s8651_s21 = sphi %s8706_s21, %s11200_s21  }
   0x4   : > { %s8731_s27 = sadd.s32 1, %s8663_s24   ;;  %s157_s28 = sadd.s32 1, %s8659_s23 }
   0x5   : > { %s154_s29 = ssub.s32 %s8663_s24, %s8731_s27  ;;  %p167_p0 = scmp.ne.s32.totalorder %s8659_s23, %s8655_s22 }
   0x6   : > { %p155_p1 = scmp.eq.s32.totalorder %s154_s29, 0  ;;  %p168_p2 = scmp.eq.s32.totalorder %s8727_s25, 1 }
   0x7   : > { %p173_p3 = scmp.ne.s32.totalorder %s8655_s22, %s8651_s21  ;;  %p174_p4 = scmp.eq.s32.totalorder %s6630_s26, 1 }
   0x8   : > { %s8742_s30 = scalar_select %p155_p1, %s8659_s23, %s157_s28  }
   0x9   : > { %p8744_p5 = por %p168_p2, %p167_p0  ;;  %p8748_p6 = por %p174_p4, %p173_p3 }
   0xa   : > { %p6633_p7 = scmp.ge.s32.totalorder %s8663_s24, 1  ;;  %p217_p8 = scmp.lt.s32.totalorder %s8663_s24, 3 }
   0xc   : > { %p218_p9 = pnand %p6633_p7, %p217_p8 }
   0xd   : > { %v7654_v0 = vld [vmem:[%s11184_s1 + $0x4] ss:$8 sps:$4 sm:$0xff] (!%p218_p9)   ;;  %v7656_v1 = vld [vmem:[%s11184_s1] ss:$8 sps:$4 sm:$0xff] (!%p218_p9)   ;;  %v7657_v2 = vld [vmem:[%s11184_s1 + $0x14] ss:$8 sps:$4 sm:$0xff] (!%p218_p9)  }
   0xe   : > { %221 = sbr.rel (%p218_p9) target bundleno = 2050 (0x802), region = 44  ;;  %1995 = vmatprep.subr.bf16.mxu0 (!%p218_p9), %v7654_v0  ;;  %v7659_v3 = vld [vmem:[%s11184_s1 + $0x10] ss:$8 sps:$4 sm:$0xff] (!%p218_p9)   ;;  %v7660_v4 = vld [vmem:[%s11184_s1 + $0x24] ss:$8 sps:$4 sm:$0xff] (!%p218_p9)   ;;  %vm2916_vm0 = vcmask (!%p218_p9), 253952  }
   0xf   : > { %1996 = vmatpush1.bf16.msra.mxu0 (!%p218_p9), %v7656_v1  ;;  %s247_s17 = smul.u32 (!%p218_p9), 12, %s8727_s25  ;;  %v7662_v5 = vld [vmem:[%s11184_s1 + $0x20] ss:$8 sps:$4 sm:$0xff] (!%p218_p9)   ;;  %v7663_v6 = vld [vmem:[%s11184_s1 + $0x34] ss:$8 sps:$4 sm:$0xff] (!%p218_p9)   ;;  %s8667_s9 = smov (!%p218_p9), 32  }
  0x10   : > { %1997 = vmatprep.subr.bf16.mxu0 (!%p218_p9), %v7657_v2  ;;  %v7665_v7 = vld [vmem:[%s11184_s1 + $0x30] ss:$8 sps:$4 sm:$0xff] (!%p218_p9)   ;;  %v7666_v8 = vld [vmem:[%s11184_s1 + $0x44] ss:$8 sps:$4 sm:$0xff] (!%p218_p9)   ;;  %v7668_v9 = vld [vmem:[%s11184_s1 + $0x40] ss:$8 sps:$4 sm:$0xff] (!%p218_p9)  }
  0x11   : > { %p248_p10 = scmp.lt.s32.totalorder (!%p218_p9), %s247_s17, 23  ;;  %v7669_v10 = vld [vmem:[%s11184_s1 + $0x54] ss:$8 sps:$4 sm:$0xff] (!%p218_p9)   ;;  %v7671_v11 = vld [vmem:[%s11184_s1 + $0x50] ss:$8 sps:$4 sm:$0xff] (!%p218_p9)   ;;  %s8668_s19 = smov (!%p218_p9), 64  }
  0x12   : > { %v7672_v12 = vld [vmem:[%s11184_s1 + $0x64] ss:$8 sps:$4 sm:$0xff] (!%p218_p9)   ;;  %v7674_v14 = vld [vmem:[%s11184_s1 + $0x60] ss:$8 sps:$4 sm:$0xff] (!%p218_p9)   ;;  %v7675_v15 = vld [vmem:[%s11184_s1 + $0x74] ss:$8 sps:$4 sm:$0xff] (!%p218_p9)  }
  0x13   : > { %1998 = vmatpush1.bf16.msra.mxu0 (!%p218_p9), %v7659_v3  ;;  %v7677_v16 = vld [vmem:[%s11184_s1 + $0x70] ss:$8 sps:$4 sm:$0xff] (!%p218_p9)   ;;  %v7678_v17 = vld [vmem:[%s11184_s1 + $0x84] ss:$8 sps:$4 sm:$0xff] (!%p218_p9)   ;;  %v7680_v18 = vld [vmem:[%s11184_s1 + $0x80] ss:$8 sps:$4 sm:$0xff] (!%p218_p9)  }
  0x14   : > { %1999 = vmatprep.subr.bf16.mxu0 (!%p218_p9), %v7660_v4  ;;  %v7681_v19 = vld [vmem:[%s11184_s1 + $0x94] ss:$8 sps:$4 sm:$0xff] (!%p218_p9)   ;;  %v7683_v20 = vld [vmem:[%s11184_s1 + $0x90] ss:$8 sps:$4 sm:$0xff] (!%p218_p9)   ;;  %v7684_v21 = vld [vmem:[%s11184_s1 + $0xa4] ss:$8 sps:$4 sm:$0xff] (!%p218_p9)  }
  0x15   : > { %s11205_s17 = smov (!%p248_p10, %s247_s17), 23  ;;  %v7686_v22 = vld [vmem:[%s11184_s1 + $0xa0] ss:$8 sps:$4 sm:$0xff]   ;;  %v7687_v23 = vld [vmem:[%s11184_s1 + $0xb4] ss:$8 sps:$4 sm:$0xff]   ;;  %s8669_s11 = smov 96  }
  0x16   : > { %s7609_s15 = smul.u32 52, %s11205_s17  ;;  %v7689_v24 = vld [vmem:[%s11184_s1 + $0xb0] ss:$8 sps:$4 sm:$0xff]   ;;  %v7690_v25 = vld [vmem:[%s11184_s1 + $0xc4] ss:$8 sps:$4 sm:$0xff]   ;;  %vm2945_vm3 = vcmask 516352  }
  0x17   : > { %2000 = vmatpush1.bf16.msra.mxu0 %v7662_v5  ;;  %v7692_v26 = vld [vmem:[%s11184_s1 + $0xc0] ss:$8 sps:$4 sm:$0xff]   ;;  %v7693_v27 = vld [vmem:[%s11184_s1 + $0xd4] ss:$8 sps:$4 sm:$0xff]   ;;  %v7695_v28 = vld [vmem:[%s11184_s1 + $0xd0] ss:$8 sps:$4 sm:$0xff]  }
  0x18   : > { %2001 = vmatprep.subr.bf16.mxu0 %v7663_v6  ;;  %s8794_s29 = scalar_lea.vmem %s11183_s0, %s7609_s15  ;;  %v7696_v29 = vld [vmem:[%s11184_s1 + $0xe4] ss:$8 sps:$4 sm:$0xff]   ;;  %v7698_v30 = vld [vmem:[%s11184_s1 + $0xe0] ss:$8 sps:$4 sm:$0xff]   ;;  %v7699_v31 = vld [vmem:[%s11184_s1 + $0xf4] ss:$8 sps:$4 sm:$0xff]  }
  0x19   : > { %v7704_v13 = vld [vmem:[%s8794_s29 + $0x4] ss:$52 sps:$4 sm:$0xff]   ;;  %v7702_v34 = vld [vmem:[%s8794_s29] ss:$52 sps:$4 sm:$0xff]   ;;  %v7728_v40 = vld [vmem:[%s8794_s29 + $0x68] ss:$52 sps:$4 sm:$0xff]  }
  0x1a   : > { %2027 = vmatprep.mubr.bf16.mxu0 %v7704_v13  ;;  %v7701_v32 = vld [vmem:[%s11184_s1 + $0xf0] ss:$8 sps:$4 sm:$0xff]   ;;  %v7707_v33 = vld [vmem:[%s11184_s1 + $0x104] ss:$8 sps:$4 sm:$0xff]   ;;  %v7705_v35 = vld [vmem:[%s11184_s1 + $0x100] ss:$8 sps:$4 sm:$0xff]  }
  0x1b   : > { %2002 = vmatpush1.bf16.msra.mxu0 %v7665_v7  ;;  %v7723_v36 = vld [vmem:[%s8794_s29 + $0x6c] ss:$52 sps:$4 sm:$0xff]   ;;  %v7710_v37 = vld [vmem:[%s11184_s1 + $0x114] ss:$8 sps:$4 sm:$0xff]   ;;  %v7708_v38 = vld [vmem:[%s11184_s1 + $0x110] ss:$8 sps:$4 sm:$0xff]  }
  0x1c   : > { %2003 = vmatprep.subr.bf16.mxu0 %v7666_v8  ;;  %v7713_v39 = vld [vmem:[%s11184_s1 + $0x124] ss:$8 sps:$4 sm:$0xff]   ;;  %v7711_v41 = vld [vmem:[%s11184_s1 + $0x120] ss:$8 sps:$4 sm:$0xff]   ;;  %v7716_v43 = vld [vmem:[%s11184_s1 + $0x134] ss:$8 sps:$4 sm:$0xff]  }
  0x1d   : > { %v7732_v42 = vld [vmem:[%s8794_s29 + $0xd4] ss:$52 sps:$4 sm:$0xff]   ;;  %v7714_v44 = vld [vmem:[%s11184_s1 + $0x130] ss:$8 sps:$4 sm:$0xff]   ;;  %v7719_v45 = vld [vmem:[%s11184_s1 + $0x144] ss:$8 sps:$4 sm:$0xff]  }
  0x1e   : > { %v7737_v46 = vld [vmem:[%s8794_s29 + $0xd0] ss:$52 sps:$4 sm:$0xff]   ;;  %v7717_v47 = vld [vmem:[%s11184_s1 + $0x140] ss:$8 sps:$4 sm:$0xff]   ;;  %v7722_v49 = vld [vmem:[%s11184_s1 + $0x154] ss:$8 sps:$4 sm:$0xff]  }
  0x1f   : > { %2004 = vmatpush1.bf16.msra.mxu0 %v7668_v9  ;;  %v7741_v48 = vld [vmem:[%s8794_s29 + $0x13c] ss:$52 sps:$4 sm:$0xff]   ;;  %v7727_v51 = vld [vmem:[%s11184_s1 + $0x164] ss:$8 sps:$4 sm:$0xff]   ;;  %v7725_v53 = vld [vmem:[%s11184_s1 + $0x160] ss:$8 sps:$4 sm:$0xff]  }
  0x20   : > { %2005 = vmatprep.subr.bf16.mxu0 %v7669_v10  ;;  %v7720_v50 = vld [vmem:[%s11184_s1 + $0x150] ss:$8 sps:$4 sm:$0xff]   ;;  %v7731_v55 = vld [vmem:[%s11184_s1 + $0x174] ss:$8 sps:$4 sm:$0xff]   ;;  %v7736_v57 = vld [vmem:[%s11184_s1 + $0x184] ss:$8 sps:$4 sm:$0xff]  }
  0x21   : > { %v7746_v52 = vld [vmem:[%s8794_s29 + $0x138] ss:$52 sps:$4 sm:$0xff]   ;;  %v7755_v58 = vld [vmem:[%s8794_s29 + $0x1a0] ss:$52 sps:$4 sm:$0xff]   ;;  %v7764_v0 = vld [vmem:[%s8794_s29 + $0x208] ss:$52 sps:$4 sm:$0xff]  }
  0x22   : > { %v7750_v54 = vld [vmem:[%s8794_s29 + $0x1a4] ss:$52 sps:$4 sm:$0xff]   ;;  %v7734_v59 = vld [vmem:[%s11184_s1 + $0x180] ss:$8 sps:$4 sm:$0xff]   ;;  %v7740_v61 = vld [vmem:[%s11184_s1 + $0x194] ss:$8 sps:$4 sm:$0xff]  }
  0x23   : > { %2006 = vmatpush1.bf16.msra.mxu0 %v7671_v11  ;;  %v7729_v56 = vld [vmem:[%s11184_s1 + $0x170] ss:$8 sps:$4 sm:$0xff]   ;;  %v7759_v60 = vld [vmem:[%s8794_s29 + $0x20c] ss:$52 sps:$4 sm:$0xff]   ;;  %v7749_v3 = vld [vmem:[%s11184_s1 + $0x1b4] ss:$8 sps:$4 sm:$0xff]  }
  0x24   : > { %2007 = vmatprep.subr.bf16.mxu0 %v7672_v12  ;;  %v7738_v62 = vld [vmem:[%s11184_s1 + $0x190] ss:$8 sps:$4 sm:$0xff]   ;;  %v7745_v63 = vld [vmem:[%s11184_s1 + $0x1a4] ss:$8 sps:$4 sm:$0xff]   ;;  %v7743_v1 = vld [vmem:[%s11184_s1 + $0x1a0] ss:$8 sps:$4 sm:$0xff]  }
  0x25   : > { %v7770_v2 = vld [vmem:[%s8794_s29 + $0xc] ss:$52 sps:$4 sm:$0xff]   ;;  %v7747_v4 = vld [vmem:[%s11184_s1 + $0x1b0] ss:$8 sps:$4 sm:$0xff]   ;;  %v7758_v7 = vld [vmem:[%s11184_s1 + $0x1d4] ss:$8 sps:$4 sm:$0xff]  }
  0x26   : > { %v7754_v5 = vld [vmem:[%s11184_s1 + $0x1c4] ss:$8 sps:$4 sm:$0xff]   ;;  %v7752_v6 = vld [vmem:[%s11184_s1 + $0x1c0] ss:$8 sps:$4 sm:$0xff]   ;;  %v7756_v8 = vld [vmem:[%s11184_s1 + $0x1d0] ss:$8 sps:$4 sm:$0xff]  }
  0x27   : > { %2008 = vmatpush1.bf16.msra.mxu0 %v7674_v14  ;;  %v7763_v9 = vld [vmem:[%s11184_s1 + $0x1e4] ss:$8 sps:$4 sm:$0xff]   ;;  %v7761_v10 = vld [vmem:[%s11184_s1 + $0x1e0] ss:$8 sps:$4 sm:$0xff]   ;;  %v7767_v11 = vld [vmem:[%s11184_s1 + $0x1f4] ss:$8 sps:$4 sm:$0xff]  }
  0x28   : > { %2009 = vmatprep.subr.bf16.mxu0 %v7675_v15  ;;  %v7765_v12 = vld [vmem:[%s11184_s1 + $0x1f0] ss:$8 sps:$4 sm:$0xff]   ;;  %v7773_v13 = vld [vmem:[%s11184_s1 + $0x204] ss:$8 sps:$4 sm:$0xff]   ;;  %v7768_v14 = vld [vmem:[%s8794_s29 + $0x8] ss:$52 sps:$4 sm:$0xff]  }
  0x29   : > { %v7771_v15 = vld [vmem:[%s11184_s1 + $0x200] ss:$8 sps:$4 sm:$0xff]   ;;  %vm2917_vm1 = vsmask.f32 256  ;;  %vm2961_vm5 = vcmask 778752   ;;  %vm2974_vm7 = vcmask 1041152  }
  0x2a   : > { %vm9590_vm2 = vmand %vm2916_vm0, %vm2917_vm1  ;;  %vm5932_vm9 = vcmask 261120   ;;  %s245_s16 = sand.u32 1, %s8655_s22   ;;  %vm6560_vm10 = vcmask 24576  }
  0x2b   : > { %2010 = vmatpush1.bf16.msra.mxu0 %v7677_v16  ;;  %v7789_v16 = vld [vmem:[%s8794_s29 + $0x74] ss:$52 sps:$4 sm:$0xff]   ;;  %vm10070_vm4 = vmand %vm2945_vm3, %vm2917_vm1  ;;  %s6563_s17 = scalar_lea.sflag [#allocation4], %s245_s16 }
  0x2c   : > { %2011 = vmatprep.subr.bf16.mxu0 %v7678_v17  ;;  %v7776_v17 = vld [vmem:[%s11184_s1 + $0x214] ss:$8 sps:$4 sm:$0xff]   ;;  %vm10084_vm6 = vmand %vm2961_vm5, %vm2917_vm1 }
  0x2d   : > { %vm10097_vm8 = vmand %vm2974_vm7, %vm2917_vm1 }
  0x2f   : > { %2012 = vmatpush1.bf16.msra.mxu0 %v7680_v18  ;;  %v7774_v18 = vld [vmem:[%s11184_s1 + $0x210] ss:$8 sps:$4 sm:$0xff]  }
  0x30   : > { %2013 = vmatprep.subr.bf16.mxu0 %v7681_v19  ;;  %v7779_v19 = vld [vmem:[%s11184_s1 + $0x224] ss:$8 sps:$4 sm:$0xff]  }
  0x33   : > { %2014 = vmatpush1.bf16.msra.mxu0 %v7683_v20  ;;  %v7794_v20 = vld [vmem:[%s8794_s29 + $0x70] ss:$52 sps:$4 sm:$0xff]  }
  0x34   : > { %2015 = vmatprep.subr.bf16.mxu0 %v7684_v21  ;;  %v7777_v21 = vld [vmem:[%s11184_s1 + $0x220] ss:$8 sps:$4 sm:$0xff]  }
  0x37   : > { %2016 = vmatpush1.bf16.msra.mxu0 %v7686_v22  ;;  %v7782_v22 = vld [vmem:[%s11184_s1 + $0x234] ss:$8 sps:$4 sm:$0xff]  }
  0x38   : > { %2017 = vmatprep.subr.bf16.mxu0 %v7687_v23  ;;  %v7798_v23 = vld [vmem:[%s8794_s29 + $0xdc] ss:$52 sps:$4 sm:$0xff]  }
  0x3b   : > { %2018 = vmatpush1.bf16.msra.mxu0 %v7689_v24  ;;  %v7780_v24 = vld [vmem:[%s11184_s1 + $0x230] ss:$8 sps:$4 sm:$0xff]  }
  0x3c   : > { %2019 = vmatprep.subr.bf16.mxu0 %v7690_v25  ;;  %v7785_v25 = vld [vmem:[%s11184_s1 + $0x244] ss:$8 sps:$4 sm:$0xff]  }
  0x3f   : > { %2020 = vmatpush1.bf16.msra.mxu0 %v7692_v26  ;;  %v7803_v26 = vld [vmem:[%s8794_s29 + $0xd8] ss:$52 sps:$4 sm:$0xff]  }
  0x40   : > { %2021 = vmatprep.subr.bf16.mxu0 %v7693_v27  ;;  %v7783_v27 = vld [vmem:[%s11184_s1 + $0x240] ss:$8 sps:$4 sm:$0xff]  }
  0x43   : > { %2022 = vmatpush1.bf16.msra.mxu0 %v7695_v28  ;;  %v7788_v28 = vld [vmem:[%s11184_s1 + $0x254] ss:$8 sps:$4 sm:$0xff]  }
  0x44   : > { %2023 = vmatprep.subr.bf16.mxu0 %v7696_v29  ;;  %v7807_v29 = vld [vmem:[%s8794_s29 + $0x144] ss:$52 sps:$4 sm:$0xff]  }
  0x47   : > { %2024 = vmatpush1.bf16.msra.mxu0 %v7698_v30  ;;  %v7786_v30 = vld [vmem:[%s11184_s1 + $0x250] ss:$8 sps:$4 sm:$0xff]  }
  0x48   : > { %2025 = vmatprep.subr.bf16.mxu0 %v7699_v31  ;;  %v7793_v31 = vld [vmem:[%s11184_s1 + $0x264] ss:$8 sps:$4 sm:$0xff]  }
  0x4b   : > { %2026 = vmatpush1.bf16.msra.mxu0 %v7701_v32  ;;  %v7812_v32 = vld [vmem:[%s8794_s29 + $0x140] ss:$52 sps:$4 sm:$0xff]  }
  0x4c   : > { %2088 = vmatprep.subr.bf16.mxu0 %v7707_v33  ;;  %v7791_v33 = vld [vmem:[%s11184_s1 + $0x260] ss:$8 sps:$4 sm:$0xff]  }
  0x4e   : > { %2028 = vmatmul.mubr.bf16.vlgmr.msra.gmra.mrb[0].mxu0 %v7702_v34  ;;  %v7816_v34 = vld [vmem:[%s8794_s29 + $0x1ac] ss:$52 sps:$4 sm:$0xff]  }
  0x4f   : > { %2089 = vmatpush1.bf16.msra.mxu0 %v7705_v35  ;;  %2037 = vmatprep.mubr.bf16.mxu0 %v7723_v36  ;;  %v7797_v35 = vld [vmem:[%s11184_s1 + $0x274] ss:$8 sps:$4 sm:$0xff]   ;;  %v7795_v36 = vld [vmem:[%s11184_s1 + $0x270] ss:$8 sps:$4 sm:$0xff]  }
  0x50   : > { %2090 = vmatprep.subr.bf16.mxu0 %v7710_v37  ;;  %v7802_v37 = vld [vmem:[%s11184_s1 + $0x284] ss:$8 sps:$4 sm:$0xff]  }
  0x53   : > { %2091 = vmatpush1.bf16.msra.mxu0 %v7708_v38  ;;  %v7821_v38 = vld [vmem:[%s8794_s29 + $0x1a8] ss:$52 sps:$4 sm:$0xff]  }
  0x54   : > { %2092 = vmatprep.subr.bf16.mxu0 %v7713_v39  ;;  %v7800_v39 = vld [vmem:[%s11184_s1 + $0x280] ss:$8 sps:$4 sm:$0xff]  }
  0x56   : > { %2038 = vmatmul.mubr.bf16.gmra.mrb[4].mxu0 %v7728_v40  ;;  %v7825_v40 = vld [vmem:[%s8794_s29 + $0x214] ss:$52 sps:$4 sm:$0xff]  }
  0x57   : > { %2093 = vmatpush1.bf16.msra.mxu0 %v7711_v41  ;;  %2047 = vmatprep.mubr.bf16.mxu0 %v7732_v42  ;;  %v7806_v41 = vld [vmem:[%s11184_s1 + $0x294] ss:$8 sps:$4 sm:$0xff]   ;;  %v7804_v42 = vld [vmem:[%s11184_s1 + $0x290] ss:$8 sps:$4 sm:$0xff]  }
  0x58   : > { %2094 = vmatprep.subr.bf16.mxu0 %v7716_v43  ;;  %v7811_v43 = vld [vmem:[%s11184_s1 + $0x2a4] ss:$8 sps:$4 sm:$0xff]  }
  0x5b   : > { %2095 = vmatpush1.bf16.msra.mxu0 %v7714_v44  ;;  %v7830_v44 = vld [vmem:[%s8794_s29 + $0x210] ss:$52 sps:$4 sm:$0xff]  }
  0x5c   : > { %2096 = vmatprep.subr.bf16.mxu0 %v7719_v45  ;;  %v7809_v45 = vld [vmem:[%s11184_s1 + $0x2a0] ss:$8 sps:$4 sm:$0xff]  }
  0x5e   : > { %2048 = vmatmul.mubr.bf16.gmra.mrb[8].mxu0 %v7737_v46  ;;  %v7836_v46 = vld [vmem:[%s8794_s29 + $0x14] ss:$52 sps:$4 sm:$0xff]  }
  0x5f   : > { %2097 = vmatpush1.bf16.msra.mxu0 %v7717_v47  ;;  %2057 = vmatprep.mubr.bf16.mxu0 %v7741_v48  ;;  %v7815_v47 = vld [vmem:[%s11184_s1 + $0x2b4] ss:$8 sps:$4 sm:$0xff]   ;;  %v7813_v48 = vld [vmem:[%s11184_s1 + $0x2b0] ss:$8 sps:$4 sm:$0xff]  }
  0x60   : > { %2098 = vmatprep.subr.bf16.mxu0 %v7722_v49  ;;  %v7820_v49 = vld [vmem:[%s11184_s1 + $0x2c4] ss:$8 sps:$4 sm:$0xff]  }
  0x63   : > { %2099 = vmatpush1.bf16.msra.mxu0 %v7720_v50  ;;  %v7818_v50 = vld [vmem:[%s11184_s1 + $0x2c0] ss:$8 sps:$4 sm:$0xff]  }
  0x64   : > { %2100 = vmatprep.subr.bf16.mxu0 %v7727_v51  ;;  %v7824_v51 = vld [vmem:[%s11184_s1 + $0x2d4] ss:$8 sps:$4 sm:$0xff]  }
  0x66   : > { %2058 = vmatmul.mubr.bf16.gmra.mrb[12].mxu0 %v7746_v52  ;;  %v7822_v52 = vld [vmem:[%s11184_s1 + $0x2d0] ss:$8 sps:$4 sm:$0xff]  }
  0x67   : > { %2101 = vmatpush1.bf16.msra.mxu0 %v7725_v53  ;;  %2067 = vmatprep.mubr.bf16.mxu0 %v7750_v54  ;;  %v7829_v53 = vld [vmem:[%s11184_s1 + $0x2e4] ss:$8 sps:$4 sm:$0xff]   ;;  %v7827_v54 = vld [vmem:[%s11184_s1 + $0x2e0] ss:$8 sps:$4 sm:$0xff]  }
  0x68   : > { %2102 = vmatprep.subr.bf16.mxu0 %v7731_v55  ;;  %v7833_v55 = vld [vmem:[%s11184_s1 + $0x2f4] ss:$8 sps:$4 sm:$0xff]  }
  0x6b   : > { %2103 = vmatpush1.bf16.msra.mxu0 %v7729_v56  ;;  %v7831_v56 = vld [vmem:[%s11184_s1 + $0x2f0] ss:$8 sps:$4 sm:$0xff]  }
  0x6c   : > { %2104 = vmatprep.subr.bf16.mxu0 %v7736_v57  ;;  %v7839_v57 = vld [vmem:[%s11184_s1 + $0x304] ss:$8 sps:$4 sm:$0xff]  }
  0x6e   : > { %2068 = vmatmul.mubr.bf16.gmra.mrb[16].mxu0 %v7755_v58  ;;  %v7834_v58 = vld [vmem:[%s8794_s29 + $0x10] ss:$52 sps:$4 sm:$0xff]  }
  0x6f   : > { %2105 = vmatpush1.bf16.msra.mxu0 %v7734_v59  ;;  %2077 = vmatprep.mubr.bf16.mxu0 %v7759_v60  ;;  %v7837_v59 = vld [vmem:[%s11184_s1 + $0x300] ss:$8 sps:$4 sm:$0xff]   ;;  %v7855_v60 = vld [vmem:[%s8794_s29 + $0x7c] ss:$52 sps:$4 sm:$0xff]  }
  0x70   : > { %2106 = vmatprep.subr.bf16.mxu0 %v7740_v61  ;;  %v7842_v61 = vld [vmem:[%s11184_s1 + $0x314] ss:$8 sps:$4 sm:$0xff]  }
  0x73   : > { %2107 = vmatpush1.bf16.msra.mxu0 %v7738_v62  ;;  %v7840_v62 = vld [vmem:[%s11184_s1 + $0x310] ss:$8 sps:$4 sm:$0xff]  }
  0x74   : > { %2108 = vmatprep.subr.bf16.mxu0 %v7745_v63  ;;  %v7845_v63 = vld [vmem:[%s11184_s1 + $0x324] ss:$8 sps:$4 sm:$0xff]  }
  0x76   : > { %2078 = vmatmul.mubr.bf16.gmra.mrb[20].mxu0 %v7764_v0  ;;  %v7860_v0 = vld [vmem:[%s8794_s29 + $0x78] ss:$52 sps:$4 sm:$0xff]  }
  0x77   : > { %2109 = vmatpush1.bf16.msra.mxu0 %v7743_v1  ;;  %2120 = vmatprep.mubr.bf16.mxu0 %v7770_v2  ;;  %v7843_v1 = vld [vmem:[%s11184_s1 + $0x320] ss:$8 sps:$4 sm:$0xff]   ;;  %v7848_v2 = vld [vmem:[%s11184_s1 + $0x334] ss:$8 sps:$4 sm:$0xff]  }
  0x78   : > { %2110 = vmatprep.subr.bf16.mxu0 %v7749_v3  ;;  %v7864_v3 = vld [vmem:[%s8794_s29 + $0xe4] ss:$52 sps:$4 sm:$0xff]  }
  0x7b   : > { %2111 = vmatpush1.bf16.msra.mxu0 %v7747_v4  ;;  %v7846_v4 = vld [vmem:[%s11184_s1 + $0x330] ss:$8 sps:$4 sm:$0xff]  }
  0x7c   : > { %2112 = vmatprep.subr.bf16.mxu0 %v7754_v5  ;;  %v7851_v5 = vld [vmem:[%s11184_s1 + $0x344] ss:$8 sps:$4 sm:$0xff]  }
  0x7f   : > { %2113 = vmatpush1.bf16.msra.mxu0 %v7752_v6  ;;  %v7869_v6 = vld [vmem:[%s8794_s29 + $0xe0] ss:$52 sps:$4 sm:$0xff]  }
  0x80   : > { %2114 = vmatprep.subr.bf16.mxu0 %v7758_v7  ;;  %v7849_v7 = vld [vmem:[%s11184_s1 + $0x340] ss:$8 sps:$4 sm:$0xff]  }
  0x83   : > { %2115 = vmatpush1.bf16.msra.mxu0 %v7756_v8  ;;  %v7854_v8 = vld [vmem:[%s11184_s1 + $0x354] ss:$8 sps:$4 sm:$0xff]  }
  0x84   : > { %2116 = vmatprep.subr.bf16.mxu0 %v7763_v9  ;;  %v7873_v9 = vld [vmem:[%s8794_s29 + $0x14c] ss:$52 sps:$4 sm:$0xff]  }
  0x87   : > { %2117 = vmatpush1.bf16.msra.mxu0 %v7761_v10  ;;  %v7852_v10 = vld [vmem:[%s11184_s1 + $0x350] ss:$8 sps:$4 sm:$0xff]  }
  0x88   : > { %2118 = vmatprep.subr.bf16.mxu0 %v7767_v11  ;;  %v7859_v11 = vld [vmem:[%s11184_s1 + $0x364] ss:$8 sps:$4 sm:$0xff]  }
  0x8b   : > { %2119 = vmatpush1.bf16.msra.mxu0 %v7765_v12  ;;  %v7878_v12 = vld [vmem:[%s8794_s29 + $0x148] ss:$52 sps:$4 sm:$0xff]  }
  0x8c   : > { %2181 = vmatprep.subr.bf16.mxu0 %v7773_v13  ;;  %v7857_v13 = vld [vmem:[%s11184_s1 + $0x360] ss:$8 sps:$4 sm:$0xff]  }
  0x8e   : > { %2121 = vmatmul.mubr.bf16.vlgmr.msra.gmra.mrb[0].mxu0 %v7768_v14  ;;  %v7882_v14 = vld [vmem:[%s8794_s29 + $0x1b4] ss:$52 sps:$4 sm:$0xff]  }
  0x8f   : > { %2182 = vmatpush1.bf16.msra.mxu0 %v7771_v15  ;;  %2130 = vmatprep.mubr.bf16.mxu0 %v7789_v16  ;;  %v7863_v15 = vld [vmem:[%s11184_s1 + $0x374] ss:$8 sps:$4 sm:$0xff]   ;;  %v7861_v16 = vld [vmem:[%s11184_s1 + $0x370] ss:$8 sps:$4 sm:$0xff]  }
  0x90   : > { %2183 = vmatprep.subr.bf16.mxu0 %v7776_v17  ;;  %v7868_v17 = vld [vmem:[%s11184_s1 + $0x384] ss:$8 sps:$4 sm:$0xff]  }
  0x93   : > { %2184 = vmatpush1.bf16.msra.mxu0 %v7774_v18  ;;  %v7887_v18 = vld [vmem:[%s8794_s29 + $0x1b0] ss:$52 sps:$4 sm:$0xff]  }
  0x94   : > { %2185 = vmatprep.subr.bf16.mxu0 %v7779_v19  ;;  %v7866_v19 = vld [vmem:[%s11184_s1 + $0x380] ss:$8 sps:$4 sm:$0xff]  }
  0x96   : > { %2131 = vmatmul.mubr.bf16.gmra.mrb[4].mxu0 %v7794_v20  ;;  %v7891_v20 = vld [vmem:[%s8794_s29 + $0x21c] ss:$52 sps:$4 sm:$0xff]  }
  0x97   : > { %2186 = vmatpush1.bf16.msra.mxu0 %v7777_v21  ;;  %2140 = vmatprep.mubr.bf16.mxu0 %v7798_v23  ;;  %v7872_v21 = vld [vmem:[%s11184_s1 + $0x394] ss:$8 sps:$4 sm:$0xff]   ;;  %v7877_v23 = vld [vmem:[%s11184_s1 + $0x3a4] ss:$8 sps:$4 sm:$0xff]  }
  0x98   : > { %2187 = vmatprep.subr.bf16.mxu0 %v7782_v22  ;;  %v7870_v22 = vld [vmem:[%s11184_s1 + $0x390] ss:$8 sps:$4 sm:$0xff]  }
  0x9b   : > { %2188 = vmatpush1.bf16.msra.mxu0 %v7780_v24  ;;  %v7896_v24 = vld [vmem:[%s8794_s29 + $0x218] ss:$52 sps:$4 sm:$0xff]  }
  0x9c   : > { %2189 = vmatprep.subr.bf16.mxu0 %v7785_v25  ;;  %v7875_v25 = vld [vmem:[%s11184_s1 + $0x3a0] ss:$8 sps:$4 sm:$0xff]  }
  0x9e   : > { %2141 = vmatmul.mubr.bf16.gmra.mrb[8].mxu0 %v7803_v26  ;;  %v7902_v26 = vld [vmem:[%s8794_s29 + $0x1c] ss:$52 sps:$4 sm:$0xff]  }
  0x9f   : > { %2190 = vmatpush1.bf16.msra.mxu0 %v7783_v27  ;;  %2150 = vmatprep.mubr.bf16.mxu0 %v7807_v29  ;;  %v7881_v27 = vld [vmem:[%s11184_s1 + $0x3b4] ss:$8 sps:$4 sm:$0xff]   ;;  %v7886_v29 = vld [vmem:[%s11184_s1 + $0x3c4] ss:$8 sps:$4 sm:$0xff]  }
  0xa0   : > { %2191 = vmatprep.subr.bf16.mxu0 %v7788_v28  ;;  %v7879_v28 = vld [vmem:[%s11184_s1 + $0x3b0] ss:$8 sps:$4 sm:$0xff]  }
  0xa3   : > { %2192 = vmatpush1.bf16.msra.mxu0 %v7786_v30  ;;  %v7884_v30 = vld [vmem:[%s11184_s1 + $0x3c0] ss:$8 sps:$4 sm:$0xff]  }
  0xa4   : > { %2193 = vmatprep.subr.bf16.mxu0 %v7793_v31  ;;  %v7890_v31 = vld [vmem:[%s11184_s1 + $0x3d4] ss:$8 sps:$4 sm:$0xff]  }
  0xa6   : > { %2151 = vmatmul.mubr.bf16.gmra.mrb[12].mxu0 %v7812_v32  ;;  %v7888_v32 = vld [vmem:[%s11184_s1 + $0x3d0] ss:$8 sps:$4 sm:$0xff]  }
  0xa7   : > { %2194 = vmatpush1.bf16.msra.mxu0 %v7791_v33  ;;  %2160 = vmatprep.mubr.bf16.mxu0 %v7816_v34  ;;  %v7895_v33 = vld [vmem:[%s11184_s1 + $0x3e4] ss:$8 sps:$4 sm:$0xff]   ;;  %v7893_v34 = vld [vmem:[%s11184_s1 + $0x3e0] ss:$8 sps:$4 sm:$0xff]  }
  0xa8   : > { %2195 = vmatprep.subr.bf16.mxu0 %v7797_v35  ;;  %v7899_v35 = vld [vmem:[%s11184_s1 + $0x3f4] ss:$8 sps:$4 sm:$0xff]  }
  0xab   : > { %2196 = vmatpush1.bf16.msra.mxu0 %v7795_v36  ;;  %v7897_v36 = vld [vmem:[%s11184_s1 + $0x3f0] ss:$8 sps:$4 sm:$0xff]  }
  0xac   : > { %2197 = vmatprep.subr.bf16.mxu0 %v7802_v37  ;;  %v7905_v37 = vld [vmem:[%s11184_s1 + $0x404] ss:$8 sps:$4 sm:$0xff]  }
  0xae   : > { %2161 = vmatmul.mubr.bf16.gmra.mrb[16].mxu0 %v7821_v38  ;;  %v7900_v38 = vld [vmem:[%s8794_s29 + $0x18] ss:$52 sps:$4 sm:$0xff]  }
  0xaf   : > { %2198 = vmatpush1.bf16.msra.mxu0 %v7800_v39  ;;  %2170 = vmatprep.mubr.bf16.mxu0 %v7825_v40  ;;  %v7903_v39 = vld [vmem:[%s11184_s1 + $0x400] ss:$8 sps:$4 sm:$0xff]   ;;  %v7908_v40 = vld [vmem:[%s11184_s1 + $0x414] ss:$8 sps:$4 sm:$0xff]  }
  0xb0   : > { %2199 = vmatprep.subr.bf16.mxu0 %v7806_v41  ;;  %v7921_v41 = vld [vmem:[%s8794_s29 + $0x84] ss:$52 sps:$4 sm:$0xff]  }
  0xb3   : > { %2200 = vmatpush1.bf16.msra.mxu0 %v7804_v42  ;;  %v7906_v42 = vld [vmem:[%s11184_s1 + $0x410] ss:$8 sps:$4 sm:$0xff]  }
  0xb4   : > { %2201 = vmatprep.subr.bf16.mxu0 %v7811_v43  ;;  %v7911_v43 = vld [vmem:[%s11184_s1 + $0x424] ss:$8 sps:$4 sm:$0xff]  }
  0xb6   : > { %2171 = vmatmul.mubr.bf16.gmra.mrb[20].mxu0 %v7830_v44  ;;  %v7926_v44 = vld [vmem:[%s8794_s29 + $0x80] ss:$52 sps:$4 sm:$0xff]  }
  0xb7   : > { %2202 = vmatpush1.bf16.msra.mxu0 %v7809_v45  ;;  %2213 = vmatprep.mubr.bf16.mxu0 %v7836_v46  ;;  %v7909_v45 = vld [vmem:[%s11184_s1 + $0x420] ss:$8 sps:$4 sm:$0xff]   ;;  %v7914_v46 = vld [vmem:[%s11184_s1 + $0x434] ss:$8 sps:$4 sm:$0xff]  }
  0xb8   : > { %2203 = vmatprep.subr.bf16.mxu0 %v7815_v47  ;;  %v7930_v47 = vld [vmem:[%s8794_s29 + $0xec] ss:$52 sps:$4 sm:$0xff]  }
  0xbb   : > { %2204 = vmatpush1.bf16.msra.mxu0 %v7813_v48  ;;  %v7912_v48 = vld [vmem:[%s11184_s1 + $0x430] ss:$8 sps:$4 sm:$0xff]  }
  0xbc   : > { %2205 = vmatprep.subr.bf16.mxu0 %v7820_v49  ;;  %v7917_v49 = vld [vmem:[%s11184_s1 + $0x444] ss:$8 sps:$4 sm:$0xff]  }
  0xbf   : > { %2206 = vmatpush1.bf16.msra.mxu0 %v7818_v50  ;;  %v7935_v50 = vld [vmem:[%s8794_s29 + $0xe8] ss:$52 sps:$4 sm:$0xff]  }
  0xc0   : > { %2207 = vmatprep.subr.bf16.mxu0 %v7824_v51  ;;  %v7915_v51 = vld [vmem:[%s11184_s1 + $0x440] ss:$8 sps:$4 sm:$0xff]  }
  0xc3   : > { %2208 = vmatpush1.bf16.msra.mxu0 %v7822_v52  ;;  %v7939_v52 = vld [vmem:[%s8794_s29 + $0x154] ss:$52 sps:$4 sm:$0xff]  }
  0xc4   : > { %2209 = vmatprep.subr.bf16.mxu0 %v7829_v53  ;;  %v7920_v53 = vld [vmem:[%s11184_s1 + $0x454] ss:$8 sps:$4 sm:$0xff]  }
  0xc7   : > { %2210 = vmatpush1.bf16.msra.mxu0 %v7827_v54  ;;  %v7918_v54 = vld [vmem:[%s11184_s1 + $0x450] ss:$8 sps:$4 sm:$0xff]  }
  0xc8   : > { %2211 = vmatprep.subr.bf16.mxu0 %v7833_v55  ;;  %v7925_v55 = vld [vmem:[%s11184_s1 + $0x464] ss:$8 sps:$4 sm:$0xff]  }
  0xcb   : > { %2212 = vmatpush1.bf16.msra.mxu0 %v7831_v56  ;;  %v7944_v56 = vld [vmem:[%s8794_s29 + $0x150] ss:$52 sps:$4 sm:$0xff]  }
  0xcc   : > { %2274 = vmatprep.subr.bf16.mxu0 %v7839_v57  ;;  %v7923_v57 = vld [vmem:[%s11184_s1 + $0x460] ss:$8 sps:$4 sm:$0xff]  }
  0xce   : > { %2214 = vmatmul.mubr.bf16.vlgmr.msra.gmra.mrb[0].mxu0 %v7834_v58  ;;  %v7948_v58 = vld [vmem:[%s8794_s29 + $0x1bc] ss:$52 sps:$4 sm:$0xff]  }
  0xcf   : > { %2275 = vmatpush1.bf16.msra.mxu0 %v7837_v59  ;;  %2223 = vmatprep.mubr.bf16.mxu0 %v7855_v60  ;;  %v7929_v59 = vld [vmem:[%s11184_s1 + $0x474] ss:$8 sps:$4 sm:$0xff]   ;;  %v7927_v60 = vld [vmem:[%s11184_s1 + $0x470] ss:$8 sps:$4 sm:$0xff]  }
  0xd0   : > { %2276 = vmatprep.subr.bf16.mxu0 %v7842_v61  ;;  %v7934_v61 = vld [vmem:[%s11184_s1 + $0x484] ss:$8 sps:$4 sm:$0xff]  }
  0xd3   : > { %2277 = vmatpush1.bf16.msra.mxu0 %v7840_v62  ;;  %v7953_v62 = vld [vmem:[%s8794_s29 + $0x1b8] ss:$52 sps:$4 sm:$0xff]  }
  0xd4   : > { %2278 = vmatprep.subr.bf16.mxu0 %v7845_v63  ;;  %v7932_v63 = vld [vmem:[%s11184_s1 + $0x480] ss:$8 sps:$4 sm:$0xff]  }
  0xd6   : > { %2224 = vmatmul.mubr.bf16.gmra.mrb[4].mxu0 %v7860_v0  ;;  %v7957_v0 = vld [vmem:[%s8794_s29 + $0x224] ss:$52 sps:$4 sm:$0xff]  }
  0xd7   : > { %2279 = vmatpush1.bf16.msra.mxu0 %v7843_v1  ;;  %2233 = vmatprep.mubr.bf16.mxu0 %v7864_v3  ;;  %v7938_v1 = vld [vmem:[%s11184_s1 + $0x494] ss:$8 sps:$4 sm:$0xff]   ;;  %v7943_v3 = vld [vmem:[%s11184_s1 + $0x4a4] ss:$8 sps:$4 sm:$0xff]  }
  0xd8   : > { %2280 = vmatprep.subr.bf16.mxu0 %v7848_v2  ;;  %v7936_v2 = vld [vmem:[%s11184_s1 + $0x490] ss:$8 sps:$4 sm:$0xff]  }
  0xdb   : > { %2281 = vmatpush1.bf16.msra.mxu0 %v7846_v4  ;;  %v7962_v4 = vld [vmem:[%s8794_s29 + $0x220] ss:$52 sps:$4 sm:$0xff]  }
  0xdc   : > { %2282 = vmatprep.subr.bf16.mxu0 %v7851_v5  ;;  %v7941_v5 = vld [vmem:[%s11184_s1 + $0x4a0] ss:$8 sps:$4 sm:$0xff]  }
  0xde   : > { %2234 = vmatmul.mubr.bf16.gmra.mrb[8].mxu0 %v7869_v6  ;;  %v7968_v6 = vld [vmem:[%s8794_s29 + $0x24] ss:$52 sps:$4 sm:$0xff]  }
  0xdf   : > { %2283 = vmatpush1.bf16.msra.mxu0 %v7849_v7  ;;  %2243 = vmatprep.mubr.bf16.mxu0 %v7873_v9  ;;  %v7947_v7 = vld [vmem:[%s11184_s1 + $0x4b4] ss:$8 sps:$4 sm:$0xff]   ;;  %v7952_v9 = vld [vmem:[%s11184_s1 + $0x4c4] ss:$8 sps:$4 sm:$0xff]  }
  0xe0   : > { %2284 = vmatprep.subr.bf16.mxu0 %v7854_v8  ;;  %v7945_v8 = vld [vmem:[%s11184_s1 + $0x4b0] ss:$8 sps:$4 sm:$0xff]  }
  0xe3   : > { %2285 = vmatpush1.bf16.msra.mxu0 %v7852_v10  ;;  %v7950_v10 = vld [vmem:[%s11184_s1 + $0x4c0] ss:$8 sps:$4 sm:$0xff]  }
  0xe4   : > { %2286 = vmatprep.subr.bf16.mxu0 %v7859_v11  ;;  %v7956_v11 = vld [vmem:[%s11184_s1 + $0x4d4] ss:$8 sps:$4 sm:$0xff]  }
  0xe6   : > { %2244 = vmatmul.mubr.bf16.gmra.mrb[12].mxu0 %v7878_v12  ;;  %v7954_v12 = vld [vmem:[%s11184_s1 + $0x4d0] ss:$8 sps:$4 sm:$0xff]  }
  0xe7   : > { %2287 = vmatpush1.bf16.msra.mxu0 %v7857_v13  ;;  %2253 = vmatprep.mubr.bf16.mxu0 %v7882_v14  ;;  %v7961_v13 = vld [vmem:[%s11184_s1 + $0x4e4] ss:$8 sps:$4 sm:$0xff]   ;;  %v7959_v14 = vld [vmem:[%s11184_s1 + $0x4e0] ss:$8 sps:$4 sm:$0xff]  }
  0xe8   : > { %2288 = vmatprep.subr.bf16.mxu0 %v7863_v15  ;;  %v7965_v15 = vld [vmem:[%s11184_s1 + $0x4f4] ss:$8 sps:$4 sm:$0xff]  }
  0xeb   : > { %2289 = vmatpush1.bf16.msra.mxu0 %v7861_v16  ;;  %v7963_v16 = vld [vmem:[%s11184_s1 + $0x4f0] ss:$8 sps:$4 sm:$0xff]  }
  0xec   : > { %2290 = vmatprep.subr.bf16.mxu0 %v7868_v17  ;;  %v7971_v17 = vld [vmem:[%s11184_s1 + $0x504] ss:$8 sps:$4 sm:$0xff]  }
  0xee   : > { %2254 = vmatmul.mubr.bf16.gmra.mrb[16].mxu0 %v7887_v18  ;;  %v7966_v18 = vld [vmem:[%s8794_s29 + $0x20] ss:$52 sps:$4 sm:$0xff]  }
  0xef   : > { %2291 = vmatpush1.bf16.msra.mxu0 %v7866_v19  ;;  %2263 = vmatprep.mubr.bf16.mxu0 %v7891_v20  ;;  %v7969_v19 = vld [vmem:[%s11184_s1 + $0x500] ss:$8 sps:$4 sm:$0xff]  }
  0xf0   : > { %2292 = vmatprep.subr.bf16.mxu0 %v7872_v21  ;;  %v7987_v20 = vld [vmem:[%s8794_s29 + $0x8c] ss:$52 sps:$4 sm:$0xff]   ;;  %v7974_v21 = vld [vmem:[%s11184_s1 + $0x514] ss:$8 sps:$4 sm:$0xff]  }
  0xf3   : > { %2293 = vmatpush1.bf16.msra.mxu0 %v7870_v22  ;;  %v7972_v22 = vld [vmem:[%s11184_s1 + $0x510] ss:$8 sps:$4 sm:$0xff]  }
  0xf4   : > { %2294 = vmatprep.subr.bf16.mxu0 %v7877_v23  ;;  %v7977_v23 = vld [vmem:[%s11184_s1 + $0x524] ss:$8 sps:$4 sm:$0xff]  }
  0xf6   : > { %2264 = vmatmul.mubr.bf16.gmra.mrb[20].mxu0 %v7896_v24  ;;  %v7989_v24 = vld [vmem:[%s8794_s29 + $0x88] ss:$52 sps:$4 sm:$0xff]  }
  0xf7   : > { %2295 = vmatpush1.bf16.msra.mxu0 %v7875_v25  ;;  %2306 = vmatprep.mubr.bf16.mxu0 %v7902_v26  ;;  %v7975_v25 = vld [vmem:[%s11184_s1 + $0x520] ss:$8 sps:$4 sm:$0xff]  }
  0xf8   : > { %2296 = vmatprep.subr.bf16.mxu0 %v7881_v27  ;;  %v7996_v26 = vld [vmem:[%s8794_s29 + $0xf4] ss:$52 sps:$4 sm:$0xff]  }
  0xf9   : > { %v7980_v27 = vld [vmem:[%s11184_s1 + $0x534] ss:$8 sps:$4 sm:$0xff]  }
  0xfb   : > { %2297 = vmatpush1.bf16.msra.mxu0 %v7879_v28  ;;  %v7978_v28 = vld [vmem:[%s11184_s1 + $0x530] ss:$8 sps:$4 sm:$0xff]  }
  0xfc   : > { %2298 = vmatprep.subr.bf16.mxu0 %v7886_v29  ;;  %v7983_v29 = vld [vmem:[%s11184_s1 + $0x544] ss:$8 sps:$4 sm:$0xff]  }
  0xff   : > { %2299 = vmatpush1.bf16.msra.mxu0 %v7884_v30  ;;  %v7998_v30 = vld [vmem:[%s8794_s29 + $0xf0] ss:$52 sps:$4 sm:$0xff]  }
 0x100   : > { %2300 = vmatprep.subr.bf16.mxu0 %v7890_v31  ;;  %v7981_v31 = vld [vmem:[%s11184_s1 + $0x540] ss:$8 sps:$4 sm:$0xff]  }
 0x103   : > { %2301 = vmatpush1.bf16.msra.mxu0 %v7888_v32  ;;  %v8005_v32 = vld [vmem:[%s8794_s29 + $0x15c] ss:$52 sps:$4 sm:$0xff]  }
 0x104   : > { %2302 = vmatprep.subr.bf16.mxu0 %v7895_v33  ;;  %v7986_v33 = vld [vmem:[%s11184_s1 + $0x554] ss:$8 sps:$4 sm:$0xff]  }
 0x107   : > { %2303 = vmatpush1.bf16.msra.mxu0 %v7893_v34  ;;  %v7984_v34 = vld [vmem:[%s11184_s1 + $0x550] ss:$8 sps:$4 sm:$0xff]  }
 0x108   : > { %2304 = vmatprep.subr.bf16.mxu0 %v7899_v35  ;;  %v7992_v35 = vld [vmem:[%s11184_s1 + $0x564] ss:$8 sps:$4 sm:$0xff]  }
 0x10b   : > { %2305 = vmatpush1.bf16.msra.mxu0 %v7897_v36  ;;  %v8007_v36 = vld [vmem:[%s8794_s29 + $0x158] ss:$52 sps:$4 sm:$0xff]  }
 0x10c   : > { %2367 = vmatprep.subr.bf16.mxu0 %v7905_v37  ;;  %v7990_v37 = vld [vmem:[%s11184_s1 + $0x560] ss:$8 sps:$4 sm:$0xff]  }
 0x10e   : > { %2307 = vmatmul.mubr.bf16.vlgmr.msra.gmra.mrb[0].mxu0 %v7900_v38  ;;  %v8014_v38 = vld [vmem:[%s8794_s29 + $0x1c4] ss:$52 sps:$4 sm:$0xff]  }
 0x10f   : > { %2368 = vmatpush1.bf16.msra.mxu0 %v7903_v39  ;;  %2316 = vmatprep.mubr.bf16.mxu0 %v7921_v41  ;;  %v7995_v39 = vld [vmem:[%s11184_s1 + $0x574] ss:$8 sps:$4 sm:$0xff]   ;;  %v8001_v41 = vld [vmem:[%s11184_s1 + $0x584] ss:$8 sps:$4 sm:$0xff]  }
 0x110   : > { %2369 = vmatprep.subr.bf16.mxu0 %v7908_v40  ;;  %v7993_v40 = vld [vmem:[%s11184_s1 + $0x570] ss:$8 sps:$4 sm:$0xff]  }
 0x113   : > { %2370 = vmatpush1.bf16.msra.mxu0 %v7906_v42  ;;  %v8016_v42 = vld [vmem:[%s8794_s29 + $0x1c0] ss:$52 sps:$4 sm:$0xff]  }
 0x114   : > { %2371 = vmatprep.subr.bf16.mxu0 %v7911_v43  ;;  %v7999_v43 = vld [vmem:[%s11184_s1 + $0x580] ss:$8 sps:$4 sm:$0xff]  }
 0x116   : > { %2317 = vmatmul.mubr.bf16.gmra.mrb[4].mxu0 %v7926_v44  ;;  %v8023_v44 = vld [vmem:[%s8794_s29 + $0x22c] ss:$52 sps:$4 sm:$0xff]  }
 0x117   : > { %2372 = vmatpush1.bf16.msra.mxu0 %v7909_v45  ;;  %2326 = vmatprep.mubr.bf16.mxu0 %v7930_v47  ;;  %v8004_v45 = vld [vmem:[%s11184_s1 + $0x594] ss:$8 sps:$4 sm:$0xff]   ;;  %v8010_v47 = vld [vmem:[%s11184_s1 + $0x5a4] ss:$8 sps:$4 sm:$0xff]  }
 0x118   : > { %2373 = vmatprep.subr.bf16.mxu0 %v7914_v46  ;;  %v8002_v46 = vld [vmem:[%s11184_s1 + $0x590] ss:$8 sps:$4 sm:$0xff]  }
 0x11b   : > { %2374 = vmatpush1.bf16.msra.mxu0 %v7912_v48  ;;  %v8025_v48 = vld [vmem:[%s8794_s29 + $0x228] ss:$52 sps:$4 sm:$0xff]  }
 0x11c   : > { %2375 = vmatprep.subr.bf16.mxu0 %v7917_v49  ;;  %v8008_v49 = vld [vmem:[%s11184_s1 + $0x5a0] ss:$8 sps:$4 sm:$0xff]  }
 0x11e   : > { %2327 = vmatmul.mubr.bf16.gmra.mrb[8].mxu0 %v7935_v50  ;;  %v8034_v50 = vld [vmem:[%s8794_s29 + $0x2c] ss:$52 sps:$4 sm:$0xff]  }
 0x11f   : > { %2376 = vmatpush1.bf16.msra.mxu0 %v7915_v51  ;;  %2336 = vmatprep.mubr.bf16.mxu0 %v7939_v52  ;;  %v8013_v51 = vld [vmem:[%s11184_s1 + $0x5b4] ss:$8 sps:$4 sm:$0xff]   ;;  %v8011_v52 = vld [vmem:[%s11184_s1 + $0x5b0] ss:$8 sps:$4 sm:$0xff]  }
 0x120   : > { %2377 = vmatprep.subr.bf16.mxu0 %v7920_v53  ;;  %v8019_v53 = vld [vmem:[%s11184_s1 + $0x5c4] ss:$8 sps:$4 sm:$0xff]  }
 0x123   : > { %2378 = vmatpush1.bf16.msra.mxu0 %v7918_v54  ;;  %v8017_v54 = vld [vmem:[%s11184_s1 + $0x5c0] ss:$8 sps:$4 sm:$0xff]  }
 0x124   : > { %2379 = vmatprep.subr.bf16.mxu0 %v7925_v55  ;;  %v8022_v55 = vld [vmem:[%s11184_s1 + $0x5d4] ss:$8 sps:$4 sm:$0xff]  }
 0x126   : > { %2337 = vmatmul.mubr.bf16.gmra.mrb[12].mxu0 %v7944_v56  ;;  %v8020_v56 = vld [vmem:[%s11184_s1 + $0x5d0] ss:$8 sps:$4 sm:$0xff]  }
 0x127   : > { %2380 = vmatpush1.bf16.msra.mxu0 %v7923_v57  ;;  %2346 = vmatprep.mubr.bf16.mxu0 %v7948_v58  ;;  %v8028_v57 = vld [vmem:[%s11184_s1 + $0x5e4] ss:$8 sps:$4 sm:$0xff]   ;;  %v8026_v58 = vld [vmem:[%s11184_s1 + $0x5e0] ss:$8 sps:$4 sm:$0xff]  }
 0x128   : > { %2381 = vmatprep.subr.bf16.mxu0 %v7929_v59  ;;  %v8031_v59 = vld [vmem:[%s11184_s1 + $0x5f4] ss:$8 sps:$4 sm:$0xff]  }
 0x12b   : > { %2382 = vmatpush1.bf16.msra.mxu0 %v7927_v60  ;;  %v8029_v60 = vld [vmem:[%s11184_s1 + $0x5f0] ss:$8 sps:$4 sm:$0xff]  }
 0x12c   : > { %2383 = vmatprep.subr.bf16.mxu0 %v7934_v61  ;;  %v8037_v61 = vld [vmem:[%s11184_s1 + $0x604] ss:$8 sps:$4 sm:$0xff]  }
 0x12e   : > { %2347 = vmatmul.mubr.bf16.gmra.mrb[16].mxu0 %v7953_v62  ;;  %v8032_v62 = vld [vmem:[%s8794_s29 + $0x28] ss:$52 sps:$4 sm:$0xff]  }
 0x12f   : > { %2384 = vmatpush1.bf16.msra.mxu0 %v7932_v63  ;;  %2356 = vmatprep.mubr.bf16.mxu0 %v7957_v0  ;;  %v8035_v63 = vld [vmem:[%s11184_s1 + $0x600] ss:$8 sps:$4 sm:$0xff]  }
 0x130   : > { %2385 = vmatprep.subr.bf16.mxu0 %v7938_v1  ;;  %v8041_v0 = vld [vmem:[%s8794_s29 + $0x94] ss:$52 sps:$4 sm:$0xff]  }
 0x131   : > { %v8040_v1 = vld [vmem:[%s11184_s1 + $0x614] ss:$8 sps:$4 sm:$0xff]  }
 0x133   : > { %2386 = vmatpush1.bf16.msra.mxu0 %v7936_v2  ;;  %v8038_v2 = vld [vmem:[%s11184_s1 + $0x610] ss:$8 sps:$4 sm:$0xff]  }
 0x134   : > { %2387 = vmatprep.subr.bf16.mxu0 %v7943_v3  ;;  %v8046_v3 = vld [vmem:[%s11184_s1 + $0x624] ss:$8 sps:$4 sm:$0xff]  }
 0x136   : > { %2357 = vmatmul.mubr.bf16.gmra.mrb[20].mxu0 %v7962_v4  ;;  %v8043_v4 = vld [vmem:[%s8794_s29 + $0x90] ss:$52 sps:$4 sm:$0xff]  }
 0x137   : > { %2388 = vmatpush1.bf16.msra.mxu0 %v7941_v5  ;;  %2399 = vmatprep.mubr.bf16.mxu0 %v7968_v6  ;;  %v8044_v5 = vld [vmem:[%s11184_s1 + $0x620] ss:$8 sps:$4 sm:$0xff]   ;;  %v8047_v6 = vld [vmem:[%s8794_s29 + $0xfc] ss:$52 sps:$4 sm:$0xff]  }
 0x138   : > { %2389 = vmatprep.subr.bf16.mxu0 %v7947_v7  ;;  %v8052_v7 = vld [vmem:[%s11184_s1 + $0x634] ss:$8 sps:$4 sm:$0xff]  }
 0x13b   : > { %2390 = vmatpush1.bf16.msra.mxu0 %v7945_v8  ;;  %v8050_v8 = vld [vmem:[%s11184_s1 + $0x630] ss:$8 sps:$4 sm:$0xff]  }
 0x13c   : > { %2391 = vmatprep.subr.bf16.mxu0 %v7952_v9  ;;  %v8058_v9 = vld [vmem:[%s11184_s1 + $0x644] ss:$8 sps:$4 sm:$0xff]  }
 0x13f   : > { %2392 = vmatpush1.bf16.msra.mxu0 %v7950_v10  ;;  %v8049_v10 = vld [vmem:[%s8794_s29 + $0xf8] ss:$52 sps:$4 sm:$0xff]  }
 0x140   : > { %2393 = vmatprep.subr.bf16.mxu0 %v7956_v11  ;;  %v8053_v11 = vld [vmem:[%s8794_s29 + $0x164] ss:$52 sps:$4 sm:$0xff]  }
 0x143   : > { %2394 = vmatpush1.bf16.msra.mxu0 %v7954_v12  ;;  %v8056_v12 = vld [vmem:[%s11184_s1 + $0x640] ss:$8 sps:$4 sm:$0xff]  }
 0x144   : > { %2395 = vmatprep.subr.bf16.mxu0 %v7961_v13  ;;  %v8061_v13 = vld [vmem:[%s11184_s1 + $0x654] ss:$8 sps:$4 sm:$0xff]  }
 0x147   : > { %2396 = vmatpush1.bf16.msra.mxu0 %v7959_v14  ;;  %v8059_v14 = vld [vmem:[%s11184_s1 + $0x650] ss:$8 sps:$4 sm:$0xff]  }
 0x148   : > { %2397 = vmatprep.subr.bf16.mxu0 %v7965_v15  ;;  %v8067_v15 = vld [vmem:[%s11184_s1 + $0x664] ss:$8 sps:$4 sm:$0xff]  }
 0x14b   : > { %2398 = vmatpush1.bf16.msra.mxu0 %v7963_v16  ;;  %v8055_v16 = vld [vmem:[%s8794_s29 + $0x160] ss:$52 sps:$4 sm:$0xff]  }
 0x14c   : > { %2460 = vmatprep.subr.bf16.mxu0 %v7971_v17  ;;  %v8062_v17 = vld [vmem:[%s8794_s29 + $0x1cc] ss:$52 sps:$4 sm:$0xff]  }
 0x14e   : > { %2400 = vmatmul.mubr.bf16.vlgmr.msra.gmra.mrb[0].mxu0 %v7966_v18  ;;  %v8065_v18 = vld [vmem:[%s11184_s1 + $0x660] ss:$8 sps:$4 sm:$0xff]  }
 0x14f   : > { %2461 = vmatpush1.bf16.msra.mxu0 %v7969_v19  ;;  %2409 = vmatprep.mubr.bf16.mxu0 %v7987_v20  ;;  %v8073_v19 = vld [vmem:[%s11184_s1 + $0x674] ss:$8 sps:$4 sm:$0xff]   ;;  %v8071_v20 = vld [vmem:[%s11184_s1 + $0x670] ss:$8 sps:$4 sm:$0xff]  }
 0x150   : > { %2462 = vmatprep.subr.bf16.mxu0 %v7974_v21  ;;  %v8080_v21 = vld [vmem:[%s11185_s2 + $0x40] sm:$0xff]  }
 0x153   : > { %2463 = vmatpush1.bf16.msra.mxu0 %v7972_v22  ;;  %v8064_v22 = vld [vmem:[%s8794_s29 + $0x1c8] ss:$52 sps:$4 sm:$0xff]  }
 0x154   : > { %2464 = vmatprep.subr.bf16.mxu0 %v7977_v23  ;;  %v8068_v23 = vld [vmem:[%s8794_s29 + $0x234] ss:$52 sps:$4 sm:$0xff]  }
 0x156   : > { %2410 = vmatmul.mubr.bf16.gmra.mrb[4].mxu0 %v7989_v24  ;;  %v8070_v24 = vld [vmem:[%s8794_s29 + $0x230] ss:$52 sps:$4 sm:$0xff]  }
 0x157   : > { %2465 = vmatpush1.bf16.msra.mxu0 %v7975_v25  ;;  %2419 = vmatprep.mubr.bf16.mxu0 %v7996_v26  ;;  %v8665_v25 = vmov 0   ;;  %v8074_v26 = vld [vmem:[%s8794_s29 + $0x30] ss:$52 sps:$4 sm:$0xff]  }
 0x158   : > { %2466 = vmatprep.subr.bf16.mxu0 %v7980_v27  ;;  %v8081_v27 = vld [vmem:[%s11185_s2] sm:$0xff]  }
 0x15b   : > { %2467 = vmatpush1.bf16.msra.mxu0 %v7978_v28  ;;  %v8082_v28 = vld [vmem:[%s11185_s2 + $0x48] sm:$0xff]  }
 0x15c   : > { %2468 = vmatprep.subr.bf16.mxu0 %v7983_v29  ;;  %v8083_v29 = vld [vmem:[%s11185_s2 + $0x8] sm:$0xff]  }
 0x15e   : > { %2420 = vmatmul.mubr.bf16.gmra.mrb[8].mxu0 %v7998_v30  ;;  %v8084_v30 = vld [vmem:[%s11185_s2 + $0x50] sm:$0xff]  }
 0x15f   : > { %2469 = vmatpush1.bf16.msra.mxu0 %v7981_v31  ;;  %2429 = vmatprep.mubr.bf16.mxu0 %v8005_v32  ;;  %v8075_v31 = vld [vmem:[%s8794_s29 + $0x98] ss:$52 sps:$4 sm:$0xff]   ;;  %v8085_v32 = vld [vmem:[%s11185_s2 + $0x10] sm:$0xff]  }
 0x160   : > { %2470 = vmatprep.subr.bf16.mxu0 %v7986_v33  ;;  %v8086_v33 = vld [vmem:[%s11185_s2 + $0x58] sm:$0xff]  }
 0x163   : > { %2471 = vmatpush1.bf16.msra.mxu0 %v7984_v34  ;;  %v8087_v34 = vld [vmem:[%s11185_s2 + $0x18] sm:$0xff]  }
 0x164   : > { %2472 = vmatprep.subr.bf16.mxu0 %v7992_v35  ;;  %v8088_v35 = vld [vmem:[%s11185_s2 + $0x60] sm:$0xff]  }
 0x166   : > { %2430 = vmatmul.mubr.bf16.gmra.mrb[12].mxu0 %v8007_v36  ;;  %v8076_v36 = vld [vmem:[%s8794_s29 + $0x100] ss:$52 sps:$4 sm:$0xff]  }
 0x167   : > { %2473 = vmatpush1.bf16.msra.mxu0 %v7990_v37  ;;  %2439 = vmatprep.mubr.bf16.mxu0 %v8014_v38  ;;  %v8089_v37 = vld [vmem:[%s11185_s2 + $0x20] sm:$0xff]   ;;  %v8090_v38 = vld [vmem:[%s11185_s2 + $0x68] sm:$0xff]  }
 0x168   : > { %2474 = vmatprep.subr.bf16.mxu0 %v7995_v39  ;;  %v8091_v39 = vld [vmem:[%s11185_s2 + $0x28] sm:$0xff]  }
 0x16b   : > { %2475 = vmatpush1.bf16.msra.mxu0 %v7993_v40  ;;  %v8092_v40 = vld [vmem:[%s11185_s2 + $0x70] sm:$0xff]  }
 0x16c   : > { %2476 = vmatprep.subr.bf16.mxu0 %v8001_v41  ;;  %v8077_v41 = vld [vmem:[%s8794_s29 + $0x168] ss:$52 sps:$4 sm:$0xff]  }
 0x16e   : > { %2440 = vmatmul.mubr.bf16.gmra.mrb[16].mxu0 %v8016_v42  ;;  %v8078_v42 = vld [vmem:[%s8794_s29 + $0x1d0] ss:$52 sps:$4 sm:$0xff]  }
 0x16f   : > { %2477 = vmatpush1.bf16.msra.mxu0 %v7999_v43  ;;  %2449 = vmatprep.mubr.bf16.mxu0 %v8023_v44  ;;  %v8079_v43 = vld [vmem:[%s8794_s29 + $0x238] ss:$52 sps:$4 sm:$0xff]   ;;  %v8093_v44 = vld [vmem:[%s11185_s2 + $0x30] sm:$0xff]   ;;  %s8670_s29 = smov [#allocation3]  }
 0x170   : > { %2478 = vmatprep.subr.bf16.mxu0 %v8004_v45  ;;  %v8094_v45 = vld [vmem:[%s11185_s2 + $0x78] sm:$0xff]   ;;  %s8605_s12 = sshll.u32 %s8670_s29, 4  ;;  %s8606_s12 = int_to_ptr.vmem [resolvable:$false] %s8605_s12 }
 0x171   : > { %s8607_s13 = scalar_lea.vmem %s8606_s12, 32 }
 0x173   : > { %2479 = vmatpush1.bf16.msra.mxu0 %v8002_v46  ;;  %v8095_v46 = vld [vmem:[%s11185_s2 + $0x38] sm:$0xff]  }
 0x174   : > { %2480 = vmatprep.subr.bf16.mxu0 %v8010_v47  ;;  %v549_v47 = vlaneseq }
 0x176   : > { %2450 = vmatmul.mubr.bf16.gmra.mrb[20].mxu0 %v8025_v48  ;;  %v9516_v48 = vshrl.u32 %v549_v47, 7 }
 0x177   : > { %2481 = vmatpush1.bf16.msra.mxu0 %v8008_v49  ;;  %2492 = vmatprep.mubr.bf16.mxu0 %v8034_v50  ;;  %v547_v50 = vld [vmem:[%s11188_s5] sm:$0x3] }
 0x178   : > { %2482 = vmatprep.subr.bf16.mxu0 %v8013_v51  ;;  %v551_v49 = vsub.s32 0, %v9516_v48  ;;  %v555_v51 = vsub.s32 1, %v9516_v48 }
 0x17b   : > { %2483 = vmatpush1.bf16.msra.mxu0 %v8011_v52  ;;  %v9525_v52 = vrot.slane %v547_v50, %v551_v49 }
 0x17c   : > { %2484 = vmatprep.subr.bf16.mxu0 %v8019_v53  ;;  %v9529_v53 = vrot.slane %v547_v50, %v555_v51 }
 0x17f   : > { %2485 = vmatpush1.bf16.msra.mxu0 %v8017_v54 }
 0x180   : > { %2486 = vmatprep.subr.bf16.mxu0 %v8022_v55 }
 0x183   : > { %2487 = vmatpush1.bf16.msra.mxu0 %v8020_v56 }
 0x184   : > { %2488 = vmatprep.subr.bf16.mxu0 %v8028_v57 }
 0x187   : > { %2489 = vmatpush1.bf16.msra.mxu0 %v8026_v58 }
 0x188   : > { %2490 = vmatprep.subr.bf16.mxu0 %v8031_v59 }
 0x18b   : > { %2491 = vmatpush1.bf16.msra.mxu0 %v8029_v60 }
 0x18c   : > { %2553 = vmatprep.subr.bf16.mxu0 %v8037_v61 }
 0x18e   : > { %2493 = vmatmul.mubr.bf16.vlgmr.msra.gmra.mrb[0].mxu0 %v8032_v62 }
 0x18f   : > { %2554 = vmatpush1.bf16.msra.mxu0 %v8035_v63  ;;  %2502 = vmatprep.mubr.bf16.mxu0 %v8041_v0 }
 0x190   : > { %2555 = vmatprep.subr.bf16.mxu0 %v8040_v1 }
 0x193   : > { %2556 = vmatpush1.bf16.msra.mxu0 %v8038_v2 }
 0x194   : > { %2557 = vmatprep.subr.bf16.mxu0 %v8046_v3 }
 0x196   : > { %2503 = vmatmul.mubr.bf16.gmra.mrb[4].mxu0 %v8043_v4 }
 0x197   : > { %2558 = vmatpush1.bf16.msra.mxu0 %v8044_v5  ;;  %2512 = vmatprep.mubr.bf16.mxu0 %v8047_v6 }
 0x198   : > { %2559 = vmatprep.subr.bf16.mxu0 %v8052_v7 }
 0x19b   : > { %2560 = vmatpush1.bf16.msra.mxu0 %v8050_v8 }
 0x19c   : > { %2561 = vmatprep.subr.bf16.mxu0 %v8058_v9 }
 0x19e   : > { %2513 = vmatmul.mubr.bf16.gmra.mrb[8].mxu0 %v8049_v10 }
 0x19f   : > { %2522 = vmatprep.mubr.bf16.mxu0 %v8053_v11  ;;  %2562 = vmatpush1.bf16.msra.mxu0 %v8056_v12 }
 0x1a0   : > { %2563 = vmatprep.subr.bf16.mxu0 %v8061_v13 }
 0x1a3   : > { %2564 = vmatpush1.bf16.msra.mxu0 %v8059_v14 }
 0x1a4   : > { %2565 = vmatprep.subr.bf16.mxu0 %v8067_v15 }
 0x1a6   : > { %2523 = vmatmul.mubr.bf16.gmra.mrb[12].mxu0 %v8055_v16 }
 0x1a7   : > { %2532 = vmatprep.mubr.bf16.mxu0 %v8062_v17  ;;  %2566 = vmatpush1.bf16.msra.mxu0 %v8065_v18 }
 0x1a8   : > { %2567 = vmatprep.subr.bf16.mxu0 %v8073_v19 }
 0x1ab   : > { %2568 = vmatpush1.bf16.msra.mxu0 %v8071_v20 }
 0x1ac   : > { %7327 = vmatprep.subr.bf16.mxu0 %v8080_v21 }
 0x1ae   : > { %2533 = vmatmul.mubr.bf16.gmra.mrb[16].mxu0 %v8064_v22 }
 0x1af   : > { %2542 = vmatprep.mubr.bf16.mxu0 %v8068_v23 }
 0x1b6   : > { %2543 = vmatmul.mubr.bf16.gmra.mrb[20].mxu0 %v8070_v24 }
 0x1b7   : > { %2585 = vmatprep.mubr.bf16.mxu0 %v8665_v25 }
 0x1be   : > { %2586 = vmatmul.mubr.bf16.vlgmr.msra.gmra.mrb[0].mxu0 %v8074_v26 }
 0x1bf   : > { %2595 = vmatprep.mubr.bf16.mxu0 %v8665_v25  ;;  %7328 = vmatpush3.bf16.msra.mxu0 %v8081_v27 }
 0x1c0   : > { %7329 = vmatprep.subr.bf16.mxu0 %v8082_v28 }
 0x1c3   : > { %7330 = vmatpush3.bf16.msra.mxu0 %v8083_v29 }
 0x1c4   : > { %7331 = vmatprep.subr.bf16.mxu0 %v8084_v30 }
 0x1c6   : > { %2596 = vmatmul.mubr.bf16.gmra.mrb[4].mxu0 %v8075_v31 }
 0x1c7   : > { %2605 = vmatprep.mubr.bf16.mxu0 %v8665_v25  ;;  %7332 = vmatpush3.bf16.msra.mxu0 %v8085_v32 }
 0x1c8   : > { %7333 = vmatprep.subr.bf16.mxu0 %v8086_v33 }
 0x1cb   : > { %7334 = vmatpush3.bf16.msra.mxu0 %v8087_v34 }
 0x1cc   : > { %7335 = vmatprep.subr.bf16.mxu0 %v8088_v35 }
 0x1ce   : > { %2606 = vmatmul.mubr.bf16.gmra.mrb[8].mxu0 %v8076_v36 }
 0x1cf   : > { %2615 = vmatprep.mubr.bf16.mxu0 %v8665_v25  ;;  %7336 = vmatpush3.bf16.msra.mxu0 %v8089_v37 }
 0x1d0   : > { %7337 = vmatprep.subr.bf16.mxu0 %v8090_v38 }
 0x1d3   : > { %7338 = vmatpush3.bf16.msra.mxu0 %v8091_v39 }
 0x1d4   : > { %7339 = vmatprep.subr.bf16.mxu0 %v8092_v40 }
 0x1d6   : > { %2616 = vmatmul.mubr.bf16.gmra.mrb[12].mxu0 %v8077_v41 }
 0x1d7   : > { %2625 = vmatprep.mubr.bf16.mxu0 %v8665_v25  ;;  %7340 = vmatpush3.bf16.msra.mxu0 %v8093_v44 }
 0x1d8   : > { %7341 = vmatprep.subr.bf16.mxu0 %v8094_v45 }
 0x1db   : > { %7342 = vmatpush3.bf16.msra.mxu0 %v8095_v46 }
 0x1de   : > { %2626 = vmatmul.mubr.bf16.gmra.mrb[16].mxu0 %v8078_v42 }
 0x1df   : > { %2635 = vmatprep.mubr.bf16.mxu0 %v8665_v25 }
 0x1e6   : > { %2636 = vmatmul.mubr.bf16.gmra.mrb[20].mxu0 %v8079_v43 }
 0x291   : > { %v2587_v54 = vpop.f32.mrb[0].mxu0 }
 0x292   : > { %v7401_v55 = vadd.f32 %v2587_v54, %v9525_v52  ;;  %v2589_v56 = vpop.f32.mrb[1].mxu0 }
 0x293   : > { %v7402_v57 = vadd.f32 %v2589_v56, %v9529_v53  ;;  %v2591_v58 = vpop.f32.mrb[2].mxu0 }
 0x294   : > { %v7403_v59 = vadd.f32 %v2591_v58, %v9525_v52  ;;  %v2593_v60 = vpop.f32.mrb[3].mxu0  ;;  %v2646_v62 = vmax.f32 %v7401_v55, 0.0 }
 0x295   : > { %v7404_v61 = vadd.f32 %v2593_v60, %v9529_v53  ;;  %v2647_v0 = vmax.f32 %v7402_v57, 0.0 }
 0x296   : > { %v2648_v63 = vmax.f32 %v7403_v59, 0.0 }
 0x297   : > { %v2649_v1 = vmax.f32 %v7404_v61, 0.0 }
 0x298   : > { %v2670_v2 = vpack.c.bf16 %v2648_v63, %v2646_v62 }
 0x299   : > { %v2671_v3 = vpack.c.bf16 %v2649_v1, %v2647_v0  ;;  %v2597_v4 = vpop.f32.mrb[4].mxu0 }
 0x29a   : > { %v7405_v5 = vadd.f32 %v2597_v4, %v9525_v52  ;;  %v2599_v6 = vpop.f32.mrb[5].mxu0 }
 0x29b   : > { %v7406_v7 = vadd.f32 %v2599_v6, %v9529_v53  ;;  %v2601_v8 = vpop.f32.mrb[6].mxu0  ;;  %2849 = vmatprep.mubr.bf16.mxu0 %v2671_v3 }
 0x29c   : > { %v7407_v9 = vadd.f32 %v2601_v8, %v9525_v52  ;;  %v2603_v10 = vpop.f32.mrb[7].mxu0  ;;  %2850 = vmatmul.mubr.bf16.vlgmr.msra.gmra.mrb[24].mxu0 %v2670_v2  ;;  %v2650_v12 = vmax.f32 %v7405_v5, 0.0 }
 0x29d   : > { %v7408_v11 = vadd.f32 %v2603_v10, %v9529_v53  ;;  %v2651_v14 = vmax.f32 %v7406_v7, 0.0 }
 0x29e   : > { %v2652_v13 = vmax.f32 %v7407_v9, 0.0 }
 0x29f   : > { %v2653_v15 = vmax.f32 %v7408_v11, 0.0 }
 0x2a0   : > { %v2672_v16 = vpack.c.bf16 %v2652_v13, %v2650_v12 }
 0x2a1   : > { %v2673_v17 = vpack.c.bf16 %v2653_v15, %v2651_v14  ;;  %v2607_v18 = vpop.f32.mrb[8].mxu0 }
 0x2a2   : > { %v7409_v19 = vadd.f32 %v2607_v18, %v9525_v52  ;;  %v2609_v20 = vpop.f32.mrb[9].mxu0 }
 0x2a3   : > { %v7410_v21 = vadd.f32 %v2609_v20, %v9529_v53  ;;  %v2611_v22 = vpop.f32.mrb[10].mxu0  ;;  %2857 = vmatprep.mubr.bf16.mxu0 %v2673_v17  ;;  %v8666_v17 = vmov 1966171168   ;;  %v9567_v20 = vld [vmem:[%s11188_s5 + $0x2] ss:$0 sm:$0xff] }
 0x2a4   : > { %v7411_v23 = vadd.f32 %v2611_v22, %v9525_v52  ;;  %v2613_v24 = vpop.f32.mrb[11].mxu0  ;;  %2858 = vmatmul.mubr.bf16.gmra.mrb[28].mxu0 %v2672_v16  ;;  %v2654_v27 = vmax.f32 %v7409_v19, 0.0  ;;  %v8096_v16 = vld [vmem:[%s11186_s3] ss:$8 sps:$4 sm:$0xff]   ;;  %v2924_v18 = vunpack.c.l.s4 %v8666_v17 }
 0x2a5   : > { %v7412_v26 = vadd.f32 %v2613_v24, %v9529_v53  ;;  %v2655_v29 = vmax.f32 %v7410_v21, 0.0 }
 0x2a6   : > { %v2656_v28 = vmax.f32 %v7411_v23, 0.0 }
 0x2a7   : > { %v2657_v30 = vmax.f32 %v7412_v26, 0.0  ;;  %v8101_v26 = vld [vmem:[%s11186_s3 + $0x100] ss:$8 sps:$4 sm:$0xff]  }
 0x2a8   : > { %v2674_v31 = vpack.c.bf16 %v2656_v28, %v2654_v27  ;;  %v2925_v27 = vunpack.c.0.s8 %v2924_v18 }
 0x2a9   : > { %v2675_v32 = vpack.c.bf16 %v2657_v30, %v2655_v29  ;;  %v2617_v33 = vpop.f32.mrb[12].mxu0 }
 0x2aa   : > { %v7413_v34 = vadd.f32 %v2617_v33, %v9525_v52  ;;  %v2619_v35 = vpop.f32.mrb[13].mxu0  ;;  %v8105_v33 = vld [vmem:[%s11186_s3 + $0x114] ss:$8 sps:$4 sm:$0xff]  }
 0x2ab   : > { %v7414_v36 = vadd.f32 %v2619_v35, %v9529_v53  ;;  %v2621_v37 = vpop.f32.mrb[14].mxu0  ;;  %2865 = vmatprep.mubr.bf16.mxu0 %v2675_v32  ;;  %v8104_v32 = vld [vmem:[%s11186_s3 + $0x14] ss:$8 sps:$4 sm:$0xff]  }
 0x2ac   : > { %v7415_v38 = vadd.f32 %v2621_v37, %v9525_v52  ;;  %v2623_v39 = vpop.f32.mrb[15].mxu0  ;;  %2866 = vmatmul.mubr.bf16.gmra.mrb[32].mxu0 %v2674_v31  ;;  %v2658_v41 = vmax.f32 %v7413_v34, 0.0  ;;  %v8102_v31 = vld [vmem:[%s11186_s3 + $0x10] ss:$8 sps:$4 sm:$0xff]   ;;  %v9584_v34 = vsub.s32 %v2925_v27, %v9516_v48 }
 0x2ad   : > { %v7416_v40 = vadd.f32 %v2623_v39, %v9529_v53  ;;  %v2659_v43 = vmax.f32 %v7414_v36, 0.0  ;;  %v8170_v39 = vld [vmem:[%s11186_s3 + $0xc4] ss:$8 sps:$4 sm:$0xff]  }
 0x2ae   : > { %v2660_v42 = vmax.f32 %v7415_v38, 0.0  ;;  %v8107_v38 = vld [vmem:[%s11186_s3 + $0x110] ss:$8 sps:$4 sm:$0xff]  }
 0x2af   : > { %v2661_v44 = vmax.f32 %v7416_v40, 0.0  ;;  %v2919_v40 = vld [vmem:[#allocation2] sm:$0x1] }
 0x2b0   : > { %v2676_v45 = vpack.c.bf16 %v2660_v42, %v2658_v41 }
 0x2b1   : > { %v2677_v46 = vpack.c.bf16 %v2661_v44, %v2659_v43  ;;  %v2627_v47 = vpop.f32.mrb[16].mxu0 }
 0x2b2   : > { %v7417_v50 = vadd.f32 %v2627_v47, %v9525_v52  ;;  %v2629_v54 = vpop.f32.mrb[17].mxu0 }
 0x2b3   : > { %v7418_v55 = vadd.f32 %v2629_v54, %v9529_v53  ;;  %v2631_v56 = vpop.f32.mrb[18].mxu0  ;;  %2873 = vmatprep.mubr.bf16.mxu0 %v2677_v46 }
 0x2b4   : > { %v7419_v57 = vadd.f32 %v2631_v56, %v9525_v52  ;;  %v2633_v58 = vpop.f32.mrb[19].mxu0  ;;  %2874 = vmatmul.mubr.bf16.gmra.mrb[36].mxu0 %v2676_v45  ;;  %v2662_v60 = vmax.f32 %v7417_v50, 0.0  ;;  %v3029_v56 = vld [vmem:[#allocation2 + $0x2] sm:$0x1] }
 0x2b5   : > { %v7420_v59 = vadd.f32 %v2633_v58, %v9529_v53  ;;  %v2663_v62 = vmax.f32 %v7418_v55, 0.0 }
 0x2b6   : > { %v2664_v61 = vmax.f32 %v7419_v57, 0.0 }
 0x2b7   : > { %v2665_v63 = vmax.f32 %v7420_v59, 0.0 }
 0x2b8   : > { %v2678_v0 = vpack.c.bf16 %v2664_v61, %v2662_v60  ;;  %v3102_v61 = vld [vmem:[#allocation2 + $0x4] sm:$0x1] }
 0x2b9   : > { %v2679_v1 = vpack.c.bf16 %v2665_v63, %v2663_v62  ;;  %v2637_v2 = vpop.f32.mrb[20].mxu0  ;;  %v2981_v63 = vld [vmem:[#allocation2 + $0x1] sm:$0x1] }
 0x2ba   : > { %v7421_v3 = vadd.f32 %v2637_v2, %v9525_v52  ;;  %v2639_v4 = vpop.f32.mrb[21].mxu0 }
 0x2bb   : > { %v7422_v5 = vadd.f32 %v2639_v4, %v9529_v53  ;;  %v2641_v6 = vpop.f32.mrb[22].mxu0  ;;  %2881 = vmatprep.mubr.bf16.mxu0 %v2679_v1 }
 0x2bc   : > { %v7423_v7 = vadd.f32 %v2641_v6, %v9525_v52  ;;  %v2643_v8 = vpop.f32.mrb[23].mxu0  ;;  %2882 = vmatmul.mubr.bf16.gmra.mrb[40].mxu0 %v2678_v0  ;;  %v2666_v10 = vmax.f32 %v7421_v3, 0.0  ;;  %v8098_v52 = vld [vmem:[%s11186_s3 + $0x4] ss:$8 sps:$4 sm:$0xff]   ;;  %v3070_v0 = vld [vmem:[#allocation2 + $0x3] sm:$0x1] }
 0x2bd   : > { %v7424_v9 = vadd.f32 %v2643_v8, %v9529_v53  ;;  %v2667_v12 = vmax.f32 %v7422_v5, 0.0  ;;  %v8099_v53 = vld [vmem:[%s11186_s3 + $0x104] ss:$8 sps:$4 sm:$0xff]   ;;  %5936 = vmatprep.subr.bf16.mxu0 %v8098_v52 }
 0x2be   : > { %v2668_v11 = vmax.f32 %v7423_v7, 0.0  ;;  %5977 = vmatprep.subr.bf16.mxu1 %v8099_v53  ;;  %5937 = vmatpush1.bf16.msra.mxu0 %v8096_v16  ;;  %v8108_v7 = vld [vmem:[%s11186_s3 + $0x20] ss:$8 sps:$4 sm:$0xff]  }
 0x2bf   : > { %v2669_v13 = vmax.f32 %v7424_v9, 0.0  ;;  %5978 = vmatpush1.bf16.msra.mxu1 %v8101_v26  ;;  %5938 = vmatprep.subr.bf16.mxu0 %v8104_v32  ;;  %v8113_v53 = vld [vmem:[%s11186_s3 + $0x120] ss:$8 sps:$4 sm:$0xff]  }
 0x2c0   : > { %v2680_v14 = vpack.c.bf16 %v2668_v11, %v2666_v10  ;;  %5979 = vmatprep.subr.bf16.mxu1 %v8105_v33  ;;  %v8110_v11 = vld [vmem:[%s11186_s3 + $0x24] ss:$8 sps:$4 sm:$0xff]   ;;  %v8119_v33 = vld [vmem:[%s11186_s3 + $0x130] ss:$8 sps:$4 sm:$0xff]  }
 0x2c1   : > { %v2681_v15 = vpack.c.bf16 %v2669_v13, %v2667_v12  ;;  %v8111_v12 = vld [vmem:[%s11186_s3 + $0x124] ss:$8 sps:$4 sm:$0xff]  }
 0x2c2   : > { %5939 = vmatpush1.bf16.msra.mxu0 %v8102_v31 }
 0x2c3   : > { %2889 = vmatprep.mubr.bf16.mxu0 %v2681_v15  ;;  %5980 = vmatpush1.bf16.msra.mxu1 %v8107_v38  ;;  %v3247_v38 = vld [vmem:[#allocation2 + $0x7] sm:$0x1] }
 0x2c4   : > { %2890 = vmatmul.mubr.bf16.gmra.mrb[44].mxu0 %v2680_v14  ;;  %5940 = vmatprep.subr.bf16.mxu0 %v8110_v11  ;;  %v8128_v11 = vld [vmem:[%s11186_s3 + $0x54] ss:$8 sps:$4 sm:$0xff]  }
 0x2c5   : > { %5981 = vmatprep.subr.bf16.mxu1 %v8111_v12 }
 0x2c6   : > { %5941 = vmatpush1.bf16.msra.mxu0 %v8108_v7 }
 0x2c7   : > { %5982 = vmatpush1.bf16.msra.mxu1 %v8113_v53 }
 0x36f   : > { %v7343_v19 = vpop.f32.mrb[24].mxu0 }
 0x370   : > { %v7344_v21 = vpop.f32.mrb[25].mxu0 }
 0x371   : > { %v7345_v22 = vadd.f32 %v7344_v21, %v7343_v19  ;;  %v7346_v23 = vpop.f32.mrb[26].mxu0 }
 0x372   : > { %v7347_v24 = vpop.f32.mrb[27].mxu0 }
 0x373   : > { %v2852_v28 = vadd.f32 %v7345_v22, %v9567_v20  ;;  %v7348_v29 = vadd.f32 %v7347_v24, %v7346_v23  ;;  %v8116_v22 = vld [vmem:[%s11186_s3 + $0x34] ss:$8 sps:$4 sm:$0xff]  }
 0x374   : > { %v8117_v23 = vld [vmem:[%s11186_s3 + $0x134] ss:$8 sps:$4 sm:$0xff]   ;;  %5942 = vmatprep.subr.bf16.mxu0 %v8116_v22  ;;  %v3424_v22 = vld [vmem:[#allocation2 + $0xb] sm:$0x1] }
 0x375   : > { %v2855_v30 = vadd.f32 %v7348_v29, %v9567_v20  ;;  %v2898_v35 = vmax.f32 %v2852_v28, 0.0  ;;  %v8114_v29 = vld [vmem:[%s11186_s3 + $0x30] ss:$8 sps:$4 sm:$0xff]   ;;  %5983 = vmatprep.subr.bf16.mxu1 %v8117_v23  ;;  %v3456_v23 = vld [vmem:[#allocation2 + $0xc] sm:$0x1] }
 0x376   : > { %5943 = vmatpush1.bf16.msra.mxu0 %v8114_v29  ;;  %5984 = vmatpush1.bf16.msra.mxu1 %v8119_v33 }
 0x377   : > { %v2899_v36 = vmax.f32 %v2855_v30, 0.0  ;;  %v7349_v37 = vpop.f32.mrb[28].mxu0 }
 0x378   : > { %v7350_v41 = vpop.f32.mrb[29].mxu0 }
 0x379   : > { %v2910_v42 = vpack.c.bf16 %v2899_v36, %v2898_v35  ;;  %v6942_v43 = vpack.c.bf16 %v2899_v36, %v2899_v36  ;;  %v7351_v44 = vadd.f32 %v7350_v41, %v7349_v37  ;;  %v7352_v45 = vpop.f32.mrb[30].mxu0  ;;  %v3206_v35 = vld [vmem:[#allocation2 + $0x6] sm:$0x1] }
 0x37a   : > { %v7353_v46 = vpop.f32.mrb[31].mxu0 }
 0x37b   : > { %v2920_v47 = vsel %vm9590_vm2, %v2910_v42, %v2919_v40  ;;  %v9597_v50 = vrot.slane %v6942_v43, %v9584_v34  ;;  %v2860_v54 = vadd.f32 %v7351_v44, %v9567_v20  ;;  %v7354_v55 = vadd.f32 %v7353_v46, %v7352_v45  ;;  %v3158_v43 = vld [vmem:[#allocation2 + $0x5] sm:$0x1] }
 0x37c   : > { %2921 = vst [vmem:[#allocation2] sm:$0x1] %v2920_v47  ;;  %v2929_v57 = vrot.slane %v2910_v42, %v9584_v34 }
 0x37d   : > { %v2863_v58 = vadd.f32 %v7354_v55, %v9567_v20  ;;  %v3027_v59 = vrot.slane %v9597_v50, %v9584_v34  ;;  %v2900_v60 = vmax.f32 %v2860_v54, 0.0  ;;  %v3043_v21 = vcombine.high %v9597_v50, %v9597_v50  ;;  %v8122_v54 = vld [vmem:[%s11186_s3 + $0x44] ss:$8 sps:$4 sm:$0xff]  }
 0x37e   : > { %v2936_v62 = vrot.slane %v2929_v57, %v9584_v34  ;;  %v2950_v1 = vcombine.high %v2929_v57, %v2929_v57  ;;  %5944 = vmatprep.subr.bf16.mxu0 %v8122_v54 }
 0x37f   : > { %v2901_v2 = vmax.f32 %v2863_v58, 0.0  ;;  %v7355_v3 = vpop.f32.mrb[32].mxu0  ;;  %v3033_v4 = vshrl.u32 %v3027_v59, 16  ;;  %v3030_v5 = vsel %vm9590_vm2, %v3027_v59, %v3029_v56  ;;  %v3068_v6 = vcombine.high %v3027_v59, %v3027_v59  ;;  %v3279_v56 = vld [vmem:[#allocation2 + $0x8] sm:$0x1] }
 0x380   : > { %v7356_v8 = vpop.f32.mrb[33].mxu0  ;;  %3031 = vst [vmem:[#allocation2 + $0x2] sm:$0x1] %v3030_v5  ;;  %v2938_v9 = vshrl.u32 %v2936_v62, 16  ;;  %v9610_v10 = vcombine.high %v2936_v62, %v2936_v62  ;;  %v9629_v19 = vrot.slane %v2950_v1, %v9584_v34  ;;  %v9671_v42 = vrot.slane %v3043_v21, %v9584_v34  ;;  %v8123_v1 = vld [vmem:[%s11186_s3 + $0x144] ss:$8 sps:$4 sm:$0xff]  }
 0x381   : > { %v2911_v13 = vpack.c.bf16 %v2901_v2, %v2900_v60  ;;  %v6951_v14 = vpack.c.bf16 %v2901_v2, %v2901_v2  ;;  %v7357_v15 = vadd.f32 %v7356_v8, %v7355_v3  ;;  %v7358_v16 = vpop.f32.mrb[34].mxu0  ;;  %3037 = vrot.lane.b32.xlu1 %v3033_v4, %s8667_s9  ;;  %v3071_v52 = vsel %vm9590_vm2, %v3068_v6, %v3070_v0  ;;  %v8120_v60 = vld [vmem:[%s11186_s3 + $0x40] ss:$8 sps:$4 sm:$0xff]  }
 0x382   : > { %v2982_v17 = vsel %vm9590_vm2, %v9610_v10, %v2981_v63  ;;  %2942 = vrot.lane.b32.xlu0 %v2938_v9, %s8667_s9  ;;  %v7359_v18 = vpop.f32.mrb[35].mxu0  ;;  %3072 = vst [vmem:[#allocation2 + $0x3] sm:$0x1] %v3071_v52  ;;  %v3074_v28 = vshrl.u32 %v3068_v6, 16  ;;  %v9668_v41 = vcombine.high %v9629_v19, %v9629_v19  ;;  %v9706_v4 = vcombine.high %v9671_v42, %v9671_v42  ;;  %v8125_v5 = vld [vmem:[%s11186_s3 + $0x140] ss:$8 sps:$4 sm:$0xff]  }
 0x383   : > { %v3103_v24 = vsel %vm9590_vm2, %v2911_v13, %v3102_v61  ;;  %v9642_v26 = vrot.slane %v2911_v13, %v9584_v34  ;;  %v9645_v27 = vrot.slane %v6951_v14, %v9584_v34  ;;  %2983 = vst [vmem:[#allocation2 + $0x1] sm:$0x1] %v2982_v17  ;;  %v2868_v30 = vadd.f32 %v7357_v15, %v9567_v20  ;;  %v8126_v13 = vld [vmem:[%s11186_s3 + $0x50] ss:$8 sps:$4 sm:$0xff]   ;;  %v3335_v15 = vld [vmem:[#allocation2 + $0x9] sm:$0x1] }
 0x384   : > { %3104 = vst [vmem:[#allocation2 + $0x4] sm:$0x1] %v3103_v24  ;;  %v7360_v31 = vadd.f32 %v7359_v18, %v7358_v16  ;;  %5945 = vmatpush1.bf16.msra.mxu0 %v8120_v60  ;;  %v2985_v9 = vshrl.u32 %v9610_v10, 16  ;;  %5985 = vmatprep.subr.bf16.mxu1 %v8123_v1  ;;  %v8129_v16 = vld [vmem:[%s11186_s3 + $0x154] ss:$8 sps:$4 sm:$0xff]   ;;  %v3003_v21 = vshrl.u32 %v9668_v41, 16 }
 0x385   : > { %v9653_v32 = vrot.slane %v9645_v27, %v9584_v34  ;;  %3078 = vrot.lane.b32.xlu1 %v3074_v28, %s8667_s9  ;;  %v9664_v37 = vrot.slane %v9642_v26, %v9584_v34  ;;  %v2902_v45 = vmax.f32 %v2868_v30, 0.0  ;;  %5986 = vmatpush1.bf16.msra.mxu1 %v8125_v5  ;;  %v8131_v52 = vld [vmem:[%s11186_s3 + $0x150] ss:$8 sps:$4 sm:$0xff]   ;;  %v2967_v28 = vshrl.u32 %v9629_v19, 16  ;;  %v3601_v1 = vld [vmem:[#allocation2 + $0xf] sm:$0x1] }
 0x386   : > { %v2871_v36 = vadd.f32 %v7360_v31, %v9567_v20  ;;  %2958 = vrot.lane.b32.xlu0 %v9629_v19, %s8668_s19  ;;  %5946 = vmatprep.subr.bf16.mxu0 %v8128_v11  ;;  %v8134_v31 = vld [vmem:[%s11186_s3 + $0x64] ss:$8 sps:$4 sm:$0xff]   ;;  %v8132_v19 = vld [vmem:[%s11186_s3 + $0x60] ss:$8 sps:$4 sm:$0xff]   ;;  %v8138_v60 = vld [vmem:[%s11186_s3 + $0x70] ss:$8 sps:$4 sm:$0xff]  }
 0x387   : > { %v7361_v40 = vpop.f32.mrb[36].mxu0  ;;  %v9675_v44 = vcombine.high %v9653_v32, %v9653_v32  ;;  %v9679_v50 = vcombine.high %v9664_v37, %v9664_v37  ;;  %v3207_v55 = vsel %vm9590_vm2, %v9653_v32, %v3206_v35  ;;  %5987 = vmatprep.subr.bf16.mxu1 %v8129_v16 }
 0x388   : > { %v2903_v46 = vmax.f32 %v2871_v36, 0.0  ;;  %v7362_v47 = vpop.f32.mrb[37].mxu0  ;;  %3208 = vst [vmem:[#allocation2 + $0x6] sm:$0x1] %v3207_v55  ;;  %5947 = vmatpush1.bf16.msra.mxu0 %v8126_v13 }
 0x389   : > { %v7363_v57 = vadd.f32 %v7362_v47, %v7361_v40  ;;  %v7364_v58 = vpop.f32.mrb[38].mxu0  ;;  %2996 = vrot.lane.b32.xlu1 %v9668_v41, %s8668_s19  ;;  %v3248_v59 = vsel %vm9590_vm2, %v9675_v44, %v3247_v38  ;;  %v3159_v0 = vsel %vm9590_vm2, %v9679_v50, %v3158_v43  ;;  %v8135_v40 = vld [vmem:[%s11186_s3 + $0x164] ss:$8 sps:$4 sm:$0xff]   ;;  %v3131_v41 = vcombine.high %v9642_v26, %v9642_v26 }
 0x38a   : > { %v2912_v61 = vpack.c.bf16 %v2903_v46, %v2902_v45  ;;  %v6960_v62 = vpack.c.bf16 %v2903_v46, %v2903_v46  ;;  %3051 = vrot.lane.b32.xlu0 %v9671_v42, %s8668_s19  ;;  %v7365_v63 = vpop.f32.mrb[39].mxu0  ;;  %3249 = vst [vmem:[#allocation2 + $0x7] sm:$0x1] %v3248_v59  ;;  %3160 = vst [vmem:[#allocation2 + $0x5] sm:$0x1] %v3159_v0  ;;  %5988 = vmatpush1.bf16.msra.mxu1 %v8131_v52  ;;  %v3162_v55 = vshrl.u32 %v9679_v50, 16 }
 0x38b   : > { %v2876_v2 = vadd.f32 %v7363_v57, %v9567_v20  ;;  %v7366_v3 = vadd.f32 %v7365_v63, %v7364_v58  ;;  %5948 = vmatprep.subr.bf16.mxu0 %v8134_v31  ;;  %v3121_v59 = vshrl.u32 %v9664_v37, 16  ;;  %5989 = vmatprep.subr.bf16.mxu1 %v8135_v40  ;;  %v8140_v50 = vld [vmem:[%s11186_s3 + $0x74] ss:$8 sps:$4 sm:$0xff]   ;;  %v3251_v5 = vshrl.u32 %v9675_v44, 16 }
 0x38c   : > { %v3280_v6 = vsel %vm9590_vm2, %v2912_v61, %v3279_v56  ;;  %v9714_v7 = vrot.slane %v2912_v61, %v9584_v34  ;;  %v9717_v8 = vrot.slane %v6960_v62, %v9584_v34  ;;  %v8137_v56 = vld [vmem:[%s11186_s3 + $0x160] ss:$8 sps:$4 sm:$0xff]   ;;  %5949 = vmatpush1.bf16.msra.mxu0 %v8132_v19  ;;  %v3220_v61 = vcombine.high %v9645_v27, %v9645_v27  ;;  %v8141_v37 = vld [vmem:[%s11186_s3 + $0x174] ss:$8 sps:$4 sm:$0xff]   ;;  %v8143_v27 = vld [vmem:[%s11186_s3 + $0x170] ss:$8 sps:$4 sm:$0xff]  }
 0x38d   : > { %3281 = vst [vmem:[#allocation2 + $0x8] sm:$0x1] %v3280_v6  ;;  %v2879_v12 = vadd.f32 %v7366_v3, %v9567_v20  ;;  %3085 = vrot.lane.b32.xlu1 %v9706_v4, %s8668_s19  ;;  %v2904_v53 = vmax.f32 %v2876_v2, 0.0  ;;  %v8146_v2 = vld [vmem:[%s11186_s3 + $0x84] ss:$8 sps:$4 sm:$0xff]   ;;  %v9817_v6 = vrot.slane %v3131_v41, %v9584_v34  ;;  %5950 = vmatprep.subr.bf16.mxu0 %v8140_v50  ;;  %v3210_v52 = vshrl.u32 %v9653_v32, 16 }
 0x38e   : > { %v9731_v14 = vrot.slane %v9717_v8, %v9584_v34  ;;  %2989 = vrot.lane.b32.xlu0 %v2985_v9, %s8667_s9  ;;  %v9736_v10 = vrot.slane %v9714_v7, %v9584_v34  ;;  %5990 = vmatpush1.bf16.msra.mxu1 %v8137_v56  ;;  %v3512_v9 = vld [vmem:[#allocation2 + $0xd] sm:$0x1]  ;;  %v8153_v40 = vld [vmem:[%s11186_s3 + $0x194] ss:$8 sps:$4 sm:$0xff]   ;;  %v3737_v50 = vld [vmem:[#allocation2 + $0x12] sm:$0x1] }
 0x38f   : > { %v2905_v17 = vmax.f32 %v2879_v12, 0.0  ;;  %v7367_v18 = vpop.f32.mrb[40].mxu0  ;;  %5991 = vmatprep.subr.bf16.mxu1 %v8141_v37  ;;  %v8147_v12 = vld [vmem:[%s11186_s3 + $0x184] ss:$8 sps:$4 sm:$0xff]   ;;  %v9854_v19 = vcombine.high %v9817_v6, %v9817_v6 }
 0x390   : > { %v7368_v24 = vpop.f32.mrb[41].mxu0  ;;  %v9748_v29 = vcombine.high %v9736_v10, %v9736_v10  ;;  %v9752_v30 = vcombine.high %v9731_v14, %v9731_v14  ;;  %5951 = vmatpush1.bf16.msra.mxu0 %v8138_v60 }
 0x391   : > { %v2913_v33 = vpack.c.bf16 %v2905_v17, %v2904_v53  ;;  %v6969_v35 = vpack.c.bf16 %v2905_v17, %v2905_v17  ;;  %v7369_v36 = vadd.f32 %v7368_v24, %v7367_v18  ;;  %v7370_v38 = vpop.f32.mrb[42].mxu0  ;;  %3007 = vrot.lane.b32.xlu1 %v3003_v21, %s8669_s11  ;;  %v8144_v53 = vld [vmem:[%s11186_s3 + $0x80] ss:$8 sps:$4 sm:$0xff]   ;;  %v3633_v17 = vld [vmem:[#allocation2 + $0x10] sm:$0x1]  ;;  %5952 = vmatprep.subr.bf16.mxu0 %v8146_v2 }
 0x392   : > { %2971 = vrot.lane.b32.xlu0 %v2967_v28, %s8669_s11  ;;  %v7371_v43 = vpop.f32.mrb[43].mxu0  ;;  %v3336_v45 = vsel %vm9590_vm2, %v9748_v29, %v3335_v15  ;;  %v3425_v46 = vsel %vm9590_vm2, %v9752_v30, %v3424_v22  ;;  %v9836_v22 = vrot.slane %v3220_v61, %v9584_v34  ;;  %5992 = vmatpush1.bf16.msra.mxu1 %v8143_v27 }
 0x393   : > { %v3457_v47 = vsel %vm9590_vm2, %v2913_v33, %v3456_v23  ;;  %v9776_v54 = vrot.slane %v2913_v33, %v9584_v34  ;;  %v9779_v26 = vrot.slane %v6969_v35, %v9584_v34  ;;  %3337 = vst [vmem:[#allocation2 + $0x9] sm:$0x1] %v3336_v45  ;;  %3426 = vst [vmem:[#allocation2 + $0xb] sm:$0x1] %v3425_v46  ;;  %v8152_v23 = vld [vmem:[%s11186_s3 + $0x94] ss:$8 sps:$4 sm:$0xff]   ;;  %5993 = vmatprep.subr.bf16.mxu1 %v8147_v12 }
 0x394   : > { %3458 = vst [vmem:[#allocation2 + $0xc] sm:$0x1] %v3457_v47  ;;  %v2884_v57 = vadd.f32 %v7369_v36, %v9567_v20  ;;  %v7372_v58 = vadd.f32 %v7371_v43, %v7370_v38  ;;  %v8149_v35 = vld [vmem:[%s11186_s3 + $0x180] ss:$8 sps:$4 sm:$0xff]   ;;  %5953 = vmatpush1.bf16.msra.mxu0 %v8144_v53  ;;  %v8150_v46 = vld [vmem:[%s11186_s3 + $0x90] ss:$8 sps:$4 sm:$0xff]   ;;  %v9884_v60 = vcombine.high %v9836_v22, %v9836_v22 }
 0x395   : > { %v9797_v62 = vrot.slane %v9779_v26, %v9584_v34  ;;  %3166 = vrot.lane.b32.xlu1 %v3162_v55, %s8667_s9  ;;  %v9807_v0 = vrot.slane %v9776_v54, %v9584_v34  ;;  %v3383_v47 = vld [vmem:[#allocation2 + $0xa] sm:$0x1]  ;;  %v3560_v55 = vld [vmem:[#allocation2 + $0xe] sm:$0x1]  ;;  %5954 = vmatprep.subr.bf16.mxu0 %v8152_v23  ;;  %v8165_v23 = vld [vmem:[%s11186_s3 + $0x1b4] ss:$8 sps:$4 sm:$0xff]  }
 0x396   : > { %v2887_v63 = vadd.f32 %v7372_v58, %v9567_v20  ;;  %3125 = vrot.lane.b32.xlu0 %v3121_v59, %s8667_s9  ;;  %v2906_v13 = vmax.f32 %v2884_v57, 0.0  ;;  %v8158_v57 = vld [vmem:[%s11186_s3 + $0xa4] ss:$8 sps:$4 sm:$0xff]   ;;  %5994 = vmatpush1.bf16.msra.mxu1 %v8149_v35  ;;  %v3384_v27 = vsel %vm9590_vm2, %v9731_v14, %v3383_v47  ;;  %v8156_v12 = vld [vmem:[%s11186_s3 + $0xa0] ss:$8 sps:$4 sm:$0xff]  }
 0x397   : > { %v7373_v3 = vpop.f32.mrb[44].mxu0  ;;  %v9821_v11 = vcombine.high %v9797_v62, %v9797_v62  ;;  %v9829_v44 = vcombine.high %v9807_v0, %v9807_v0  ;;  %5995 = vmatprep.subr.bf16.mxu1 %v8153_v40  ;;  %v3561_v2 = vsel %vm9590_vm2, %v9797_v62, %v3560_v55  ;;  %3385 = vst [vmem:[#allocation2 + $0xa] sm:$0x1] %v3384_v27  ;;  %v8168_v35 = vld [vmem:[%s11186_s3 + $0xc0] ss:$8 sps:$4 sm:$0xff]   ;;  %v3235_v40 = vshrl.u32 %v9836_v22, 16 }
 0x398   : > { %v2907_v15 = vmax.f32 %v2887_v63, 0.0  ;;  %v7374_v16 = vpop.f32.mrb[45].mxu0  ;;  %v3778_v63 = vld [vmem:[#allocation2 + $0x13] sm:$0x1]  ;;  %5955 = vmatpush1.bf16.msra.mxu0 %v8150_v46  ;;  %3562 = vst [vmem:[#allocation2 + $0xe] sm:$0x1] %v3561_v2 }
 0x399   : > { %v7375_v18 = vadd.f32 %v7374_v16, %v7373_v3  ;;  %v7376_v21 = vpop.f32.mrb[46].mxu0  ;;  %3255 = vrot.lane.b32.xlu1 %v3251_v5, %s8667_s9  ;;  %v3602_v32 = vsel %vm9590_vm2, %v9821_v11, %v3601_v1  ;;  %v3513_v33 = vsel %vm9590_vm2, %v9829_v44, %v3512_v9  ;;  %v8159_v1 = vld [vmem:[%s11186_s3 + $0x1a4] ss:$8 sps:$4 sm:$0xff]   ;;  %v3810_v3 = vld [vmem:[#allocation2 + $0x14] sm:$0x1]  ;;  %5956 = vmatprep.subr.bf16.mxu0 %v8158_v57  ;;  %v3339_v55 = vshrl.u32 %v9748_v29, 16 }
 0x39a   : > { %v2914_v24 = vpack.c.bf16 %v2907_v15, %v2906_v13  ;;  %v6978_v28 = vpack.c.bf16 %v2907_v15, %v2907_v15  ;;  %3214 = vrot.lane.b32.xlu0 %v3210_v52, %s8667_s9  ;;  %v7377_v31 = vpop.f32.mrb[47].mxu0  ;;  %3603 = vst [vmem:[#allocation2 + $0xf] sm:$0x1] %v3602_v32  ;;  %3514 = vst [vmem:[#allocation2 + $0xd] sm:$0x1] %v3513_v33  ;;  %v3146_v33 = vshrl.u32 %v9817_v6, 16 }
 0x39b   : > { %v2892_v36 = vadd.f32 %v7375_v18, %v9567_v20  ;;  %v7378_v38 = vadd.f32 %v7377_v31, %v7376_v21  ;;  %v3689_v5 = vld [vmem:[#allocation2 + $0x11] sm:$0x1]  ;;  %v8164_v16 = vld [vmem:[%s11186_s3 + $0xb4] ss:$8 sps:$4 sm:$0xff]   ;;  %v3092_v21 = vshrl.u32 %v9706_v4, 16  ;;  %v3180_v4 = vshrl.u32 %v9854_v19, 16 }
 0x39c   : > { %v3634_v41 = vsel %vm9590_vm2, %v2914_v24, %v3633_v17  ;;  %v9862_v43 = vrot.slane %v2914_v24, %v9584_v34  ;;  %v9865_v45 = vrot.slane %v6978_v28, %v9584_v34  ;;  %v8161_v17 = vld [vmem:[%s11186_s3 + $0x1a0] ss:$8 sps:$4 sm:$0xff]   ;;  %v3058_v24 = vshrl.u32 %v9671_v42, 16  ;;  %5957 = vmatpush1.bf16.msra.mxu0 %v8156_v12  ;;  %v8162_v28 = vld [vmem:[%s11186_s3 + $0xb0] ss:$8 sps:$4 sm:$0xff]  }
 0x39d   : > { %3635 = vst [vmem:[#allocation2 + $0x10] sm:$0x1] %v3634_v41  ;;  %v2895_v56 = vadd.f32 %v7378_v38, %v9567_v20  ;;  %3173 = vrot.lane.b32.xlu1 %v9854_v19, %s8668_s19  ;;  %v2908_v59 = vmax.f32 %v2892_v36, 0.0  ;;  %v8155_v20 = vld [vmem:[%s11186_s3 + $0x190] ss:$8 sps:$4 sm:$0xff]   ;;  %5958 = vmatprep.subr.bf16.mxu0 %v8164_v16  ;;  %v3298_v57 = vshrl.u32 %v9736_v10, 16  ;;  %v3397_v10 = vcombine.high %v9717_v8, %v9717_v8 }
 0x39e   : > { %v9878_v58 = vrot.slane %v9865_v45, %v9584_v34  ;;  %3139 = vrot.lane.b32.xlu0 %v9817_v6, %s8668_s19  ;;  %v9891_v37 = vrot.slane %v9862_v43, %v9584_v34  ;;  %5996 = vmatpush1.bf16.msra.mxu1 %v8155_v20  ;;  %v8167_v42 = vld [vmem:[%s11186_s3 + $0x1b0] ss:$8 sps:$4 sm:$0xff]   ;;  %v8171_v31 = vld [vmem:[%s11186_s3 + $0x1c4] ss:$8 sps:$4 sm:$0xff]   ;;  %v8176_v36 = vld [vmem:[%s11186_s3 + $0xd4] ss:$8 sps:$4 sm:$0xff]   ;;  %v3574_v16 = vcombine.high %v9779_v26, %v9779_v26 }
 0x39f   : > { %v2909_v61 = vmax.f32 %v2895_v56, 0.0  ;;  %5997 = vmatprep.subr.bf16.mxu1 %v8159_v1  ;;  %v8173_v38 = vld [vmem:[%s11186_s3 + $0x1c0] ss:$8 sps:$4 sm:$0xff]   ;;  %v3269_v6 = vshrl.u32 %v9884_v60, 16  ;;  %v8177_v19 = vld [vmem:[%s11186_s3 + $0x1d4] ss:$8 sps:$4 sm:$0xff]   ;;  %v3404_v1 = vrot.slane %v3397_v10, %v9584_v34 }
 0x3a0   : > { %v9904_v9 = vcombine.high %v9878_v58, %v9878_v58  ;;  %v9913_v15 = vcombine.high %v9891_v37, %v9891_v37  ;;  %v3738_v52 = vsel %vm9590_vm2, %v9878_v58, %v3737_v50  ;;  %5959 = vmatpush1.bf16.msra.mxu0 %v8162_v28  ;;  %v8174_v41 = vld [vmem:[%s11186_s3 + $0xd0] ss:$8 sps:$4 sm:$0xff]   ;;  %v8182_v46 = vld [vmem:[%s11186_s3 + $0xe4] ss:$8 sps:$4 sm:$0xff]   ;;  %v8185_v29 = vld [vmem:[%s11186_s3 + $0x1e0] ss:$8 sps:$4 sm:$0xff]  }
 0x3a1   : > { %v2915_v13 = vpack.c.bf16 %v2909_v61, %v2908_v59  ;;  %3262 = vrot.lane.b32.xlu1 %v9884_v60, %s8668_s19  ;;  %3739 = vst [vmem:[#allocation2 + $0x12] sm:$0x1] %v3738_v52  ;;  %5960 = vmatprep.subr.bf16.mxu0 %v8170_v39  ;;  %v8179_v47 = vld [vmem:[%s11186_s3 + $0x1d0] ss:$8 sps:$4 sm:$0xff]   ;;  %v8183_v56 = vld [vmem:[%s11186_s3 + $0x1e4] ss:$8 sps:$4 sm:$0xff]   ;;  %v3438_v27 = vcombine.high %v3404_v1, %v3404_v1 }
 0x3a2   : > { %3228 = vrot.lane.b32.xlu0 %v9836_v22, %s8668_s19  ;;  %v3779_v53 = vsel %vm9590_vm2, %v9904_v9, %v3778_v63  ;;  %v3690_v32 = vsel %vm9590_vm2, %v9913_v15, %v3689_v5  ;;  %5998 = vmatpush1.bf16.msra.mxu1 %v8161_v17  ;;  %v3308_v22 = vcombine.high %v9714_v7, %v9714_v7  ;;  %v8180_v59 = vld [vmem:[%s11186_s3 + $0xe0] ss:$8 sps:$4 sm:$0xff]   ;;  %v8188_v7 = vld [vmem:[%s11186_s3 + $0xf4] ss:$8 sps:$4 sm:$0xff]   ;;  %v3428_v60 = vshrl.u32 %v9752_v30, 16 }
 0x3a3   : > { %v3811_v18 = vsel %vm9590_vm2, %v2915_v13, %v3810_v3  ;;  %3780 = vst [vmem:[#allocation2 + $0x13] sm:$0x1] %v3779_v53  ;;  %3691 = vst [vmem:[#allocation2 + $0x11] sm:$0x1] %v3690_v32  ;;  %5999 = vmatprep.subr.bf16.mxu1 %v8165_v23  ;;  %v8189_v50 = vld [vmem:[%s11186_s3 + $0x1f4] ss:$8 sps:$4 sm:$0xff]   ;;  %v3485_v5 = vcombine.high %v9776_v54, %v9776_v54  ;;  %v3662_v23 = vcombine.high %v9862_v43, %v9862_v43 }
 0x3a4   : > { %3812 = vst [vmem:[#allocation2 + $0x14] sm:$0x1] %v3811_v18  ;;  %5961 = vmatpush1.bf16.msra.mxu0 %v8168_v35  ;;  %v3315_v20 = vrot.slane %v3308_v22, %v9584_v34  ;;  %v3387_v61 = vshrl.u32 %v9731_v14, 16  ;;  %v8186_v63 = vld [vmem:[%s11186_s3 + $0xf0] ss:$8 sps:$4 sm:$0xff]   ;;  %v3516_v12 = vshrl.u32 %v9829_v44, 16  ;;  %v3751_v39 = vcombine.high %v9865_v45, %v9865_v45 }
 0x3a5   : > { %3096 = vrot.lane.b32.xlu1 %v3092_v21, %s8669_s11  ;;  %5962 = vmatprep.subr.bf16.mxu0 %v8176_v36  ;;  %v8191_v8 = vld [vmem:[%s11186_s3 + $0x1f0] ss:$8 sps:$4 sm:$0xff]   ;;  %v8194_v14 = vld [vmem:[%s11186_s3 + $0x204] ss:$8 sps:$4 sm:$0xff]   ;;  %v3475_v13 = vshrl.u32 %v9807_v0, 16  ;;  %v3605_v52 = vshrl.u32 %v9821_v11, 16  ;;  %v3492_v53 = vrot.slane %v3485_v5, %v9584_v34  ;;  %v3581_v0 = vrot.slane %v3574_v16, %v9584_v34 }
 0x3a6   : > { %3062 = vrot.lane.b32.xlu0 %v3058_v24, %s8669_s11  ;;  %6000 = vmatpush1.bf16.msra.mxu1 %v8167_v42  ;;  %v3349_v30 = vcombine.high %v3315_v20, %v3315_v20  ;;  %v3323_v3 = vshrl.u32 %v3315_v20, 16  ;;  %v3564_v17 = vshrl.u32 %v9797_v62, 16  ;;  %v3446_v26 = vshrl.u32 %v3438_v27, 16  ;;  %v3040_v35 = vld [vmem:[#allocation2 + $0x2] sm:$0x1] }
 0x3a7   : > { %6001 = vmatprep.subr.bf16.mxu1 %v8171_v31  ;;  %v3526_v54 = vcombine.high %v3492_v53, %v3492_v53  ;;  %v3615_v44 = vcombine.high %v3581_v0, %v3581_v0  ;;  %v3412_v11 = vshrl.u32 %v3404_v1, 16  ;;  %v3500_v18 = vshrl.u32 %v3492_v53, 16  ;;  %v3169_v5 = vld [vmem:[#allocation2 + $0x5] sm:$0x1]  ;;  %v3128_v16 = vld [vmem:[#allocation2 + $0x4] sm:$0x1] }
 0x3a8   : > { %5963 = vmatpush1.bf16.msra.mxu0 %v8174_v41  ;;  %v3357_v2 = vshrl.u32 %v3349_v30, 16  ;;  %v3589_v32 = vshrl.u32 %v3581_v0, 16  ;;  %v3693_v24 = vshrl.u32 %v9913_v15, 16  ;;  %v3652_v28 = vshrl.u32 %v9891_v37, 16 }
 0x3a9   : > { %3184 = vrot.lane.b32.xlu1 %v3180_v4, %s8669_s11  ;;  %5964 = vmatprep.subr.bf16.mxu0 %v8182_v46  ;;  %v3534_v62 = vshrl.u32 %v3526_v54, 16  ;;  %v3623_v21 = vshrl.u32 %v3615_v44, 16  ;;  %v3782_v42 = vshrl.u32 %v9904_v9, 16  ;;  %v3669_v4 = vrot.slane %v3662_v23, %v9584_v34  ;;  %v3081_v46 = vld [vmem:[#allocation2 + $0x3] sm:$0x1] }
 0x3aa   : > { %3150 = vrot.lane.b32.xlu0 %v3146_v33, %s8669_s11  ;;  %6002 = vmatpush1.bf16.msra.mxu1 %v8173_v38  ;;  %v3741_v31 = vshrl.u32 %v9878_v58, 16  ;;  %v3758_v37 = vrot.slane %v3751_v39, %v9584_v34  ;;  %v8231_v58 = vld [vmem:[%s11186_s3 + $0x2c4] ss:$8 sps:$4 sm:$0xff]  }
 0x3ab   : > { %6003 = vmatprep.subr.bf16.mxu1 %v8177_v19  ;;  %v3703_v43 = vcombine.high %v3669_v4, %v3669_v4  ;;  %v3677_v9 = vshrl.u32 %v3669_v4, 16  ;;  %v2947_v19 = vld [vmem:[#allocation2] sm:$0x1] }
 0x3ac   : > { %5965 = vmatpush1.bf16.msra.mxu0 %v8180_v59  ;;  %v3792_v15 = vcombine.high %v3758_v37, %v3758_v37 }
 0x3ad   : > { %3273 = vrot.lane.b32.xlu1 %v3269_v6, %s8669_s11  ;;  %5966 = vmatprep.subr.bf16.mxu0 %v8188_v7  ;;  %v3711_v45 = vshrl.u32 %v3703_v43, 16 }
 0x3ae   : > { %3239 = vrot.lane.b32.xlu0 %v3235_v40, %s8669_s11  ;;  %6004 = vmatpush1.bf16.msra.mxu1 %v8179_v47  ;;  %v3800_v36 = vshrl.u32 %v3792_v15, 16  ;;  %v3766_v40 = vshrl.u32 %v3758_v37, 16 }
 0x3af   : > { %6005 = vmatprep.subr.bf16.mxu1 %v8183_v56 }
 0x3b0   : > { %5967 = vmatpush1.bf16.msra.mxu0 %v8186_v63 }
 0x3b1   : > { %3343 = vrot.lane.b32.xlu1 %v3339_v55, %s8667_s9 }
 0x3b2   : > { %3302 = vrot.lane.b32.xlu0 %v3298_v57, %s8667_s9  ;;  %6006 = vmatpush1.bf16.msra.mxu1 %v8185_v29 }
 0x3b3   : > { %6007 = vmatprep.subr.bf16.mxu1 %v8189_v50 }
 0x3b5   : > { %3432 = vrot.lane.b32.xlu1 %v3428_v60, %s8667_s9 }
 0x3b6   : > { %3391 = vrot.lane.b32.xlu0 %v3387_v61, %s8667_s9  ;;  %6008 = vmatpush1.bf16.msra.mxu1 %v8191_v8  ;;  %v2992_v61 = vld [vmem:[#allocation2 + $0x1] sm:$0x1] }
 0x3b7   : > { %6018 = vmatprep.subr.bf16.mxu1 %v8194_v14 }
 0x3b9   : > { %3350 = vrot.lane.b32.xlu1 %v3349_v30, %s8668_s19 }
 0x3ba   : > { %3316 = vrot.lane.b32.xlu0 %v3315_v20, %s8668_s19 }
 0x3bd   : > { %3439 = vrot.lane.b32.xlu1 %v3438_v27, %s8668_s19 }
 0x3be   : > { %3405 = vrot.lane.b32.xlu0 %v3404_v1, %s8668_s19 }
 0x3c1   : > { %3361 = vrot.lane.b32.xlu1 %v3357_v2, %s8669_s11 }
 0x3c2   : > { %3327 = vrot.lane.b32.xlu0 %v3323_v3, %s8669_s11 }
 0x3c5   : > { %3520 = vrot.lane.b32.xlu1 %v3516_v12, %s8667_s9 }
 0x3c6   : > { %3479 = vrot.lane.b32.xlu0 %v3475_v13, %s8667_s9 }
 0x3c9   : > { %3609 = vrot.lane.b32.xlu1 %v3605_v52, %s8667_s9 }
 0x3ca   : > { %3568 = vrot.lane.b32.xlu0 %v3564_v17, %s8667_s9 }
 0x3cd   : > { %3527 = vrot.lane.b32.xlu1 %v3526_v54, %s8668_s19 }
 0x3ce   : > { %3493 = vrot.lane.b32.xlu0 %v3492_v53, %s8668_s19 }
 0x3d1   : > { %3616 = vrot.lane.b32.xlu1 %v3615_v44, %s8668_s19 }
 0x3d2   : > { %3582 = vrot.lane.b32.xlu0 %v3581_v0, %s8668_s19  ;;  %v3258_v0 = vld [vmem:[#allocation2 + $0x7] sm:$0x1] }
 0x3d5   : > { %3450 = vrot.lane.b32.xlu1 %v3446_v26, %s8669_s11 }
 0x3d6   : > { %3416 = vrot.lane.b32.xlu0 %v3412_v11, %s8669_s11  ;;  %v3217_v11 = vld [vmem:[#allocation2 + $0x6] sm:$0x1] }
 0x3d9   : > { %3538 = vrot.lane.b32.xlu1 %v3534_v62, %s8669_s11 }
 0x3da   : > { %3504 = vrot.lane.b32.xlu0 %v3500_v18, %s8669_s11 }
 0x3dd   : > { %3627 = vrot.lane.b32.xlu1 %v3623_v21, %s8669_s11 }
 0x3de   : > { %3593 = vrot.lane.b32.xlu0 %v3589_v32, %s8669_s11 }
 0x3e1   : > { %3697 = vrot.lane.b32.xlu1 %v3693_v24, %s8667_s9 }
 0x3e2   : > { %3656 = vrot.lane.b32.xlu0 %v3652_v28, %s8667_s9 }
 0x3e5   : > { %3786 = vrot.lane.b32.xlu1 %v3782_v42, %s8667_s9 }
 0x3e6   : > { %3745 = vrot.lane.b32.xlu0 %v3741_v31, %s8667_s9  ;;  %s7324_s9 = sshll.u32 %s8727_s25, 4 }
 0x3e7   : > { %s11141_s10 = scalar_lea.hbm %s11189_s6, %s7324_s9 }
 0x3e9   : > { %3704 = vrot.lane.b32.xlu1 %v3703_v43, %s8668_s19 }
 0x3ea   : > { %3670 = vrot.lane.b32.xlu0 %v3669_v4, %s8668_s19 }
 0x3ed   : > { %3793 = vrot.lane.b32.xlu1 %v3792_v15, %s8668_s19 }
 0x3ee   : > { %3759 = vrot.lane.b32.xlu0 %v3758_v37, %s8668_s19  ;;  %s246_s19 = scalar_lea.vmem [#allocation3], %s245_s16 }
 0x3f1   : > { %3715 = vrot.lane.b32.xlu1 %v3711_v45, %s8669_s11 }
 0x3f2   : > { %3681 = vrot.lane.b32.xlu0 %v3677_v9, %s8669_s11 }
 0x3f3   : > { %v3038_v33 = vpop.permute.xlu1 %3037 }
 0x3f4   : > { %v3041_v38 = vsel %vm10070_vm4, %v3038_v33, %v3040_v35  ;;  %v2943_v6 = vpop.permute.xlu0 %2942 }
 0x3f5   : > { %3042 = vst [vmem:[#allocation2 + $0x2] sm:$0x1] %v3041_v38  ;;  %v2948_v41 = vsel %vm10070_vm4, %v2943_v6, %v2947_v19  ;;  %3804 = vrot.lane.b32.xlu1 %v3800_v36, %s8669_s11 }
 0x3f6   : > { %2949 = vst [vmem:[#allocation2] sm:$0x1] %v2948_v41  ;;  %3770 = vrot.lane.b32.xlu0 %v3766_v40, %s8669_s11  ;;  %s6575_s11 = sshll.u32 %s246_s19, 4  ;;  %s11143_s11 = int_to_ptr.vmem [resolvable:$true] %s6575_s11 }
 0x3f7   : > { %v3079_v47 = vpop.permute.xlu1 %3078  ;;  %s8601_s25 = scalar_lea.vmem %s11143_s11, 16  ;;  %p8608_p0 = scmp.lt.s32.totalorder %s11143_s11, %s8606_s12 }
 0x3f8   : > { %v3082_v22 = vsel %vm10070_vm4, %v3079_v47, %v3081_v46  ;;  %v2959_v55 = vpop.permute.xlu0 %2958  ;;  %p8602_p11 = scmp.ne.s32.totalorder %s11143_s11, %s8601_s25  ;;  %p8609_p1 = scmp.lt.s32.totalorder %s8607_s13, %s8601_s25 }
 0x3f9   : > { %3083 = vst [vmem:[#allocation2 + $0x3] sm:$0x1] %v3082_v22 }
 0x3fa   : > { %p8603_p12 = pnand %p8602_p11, %p8744_p5  ;;  %p8610_p2 = por %p8609_p1, %p8608_p0 }
 0x3fb   : > { %v2997_v57 = vpop.permute.xlu1 %2996 }
 0x3fc   : > { %v3054_v59 = vld [vmem:[#allocation2 + $0x2] sm:$0x1]  ;;  %v3052_v7 = vpop.permute.xlu0 %3051  ;;  %p8604_p13 = pneg %p8603_p12 }
 0x3fd   : > { %v2963_v29 = vld [vmem:[#allocation2] sm:$0x1]  ;;  %v3055_v10 = vsel %vm10084_vm6, %v3052_v7, %v3054_v59 }
 0x3fe   : > { %v2964_v60 = vsel %vm10084_vm6, %v2959_v55, %v2963_v29  ;;  %3056 = vst [vmem:[#allocation2 + $0x2] sm:$0x1] %v3055_v10  ;;  %p8611_p3 = pnand %p8610_p2, %p8604_p13 }
 0x3ff   : > { %2965 = vst [vmem:[#allocation2] sm:$0x1] %v2964_v60  ;;  %v3086_v20 = vpop.permute.xlu1 %3085 }
 0x400   : > { %v3088_v50 = vld [vmem:[#allocation2 + $0x3] sm:$0x1]  ;;  %v2990_v63 = vpop.permute.xlu0 %2989 }
 0x401   : > { %v3089_v8 = vsel %vm10084_vm6, %v3086_v20, %v3088_v50  ;;  %v2993_v30 = vsel %vm10070_vm4, %v2990_v63, %v2992_v61  ;;  %v3346_v20 = vld [vmem:[#allocation2 + $0x9] sm:$0x1]  ;;  %v3305_v63 = vld [vmem:[#allocation2 + $0x8] sm:$0x1] }
 0x402   : > { %3090 = vst [vmem:[#allocation2 + $0x3] sm:$0x1] %v3089_v8  ;;  %2994 = vst [vmem:[#allocation2 + $0x1] sm:$0x1] %v2993_v30 }
 0x403   : > { %v3008_v1 = vpop.permute.xlu1 %3007 }
 0x404   : > { %v2972_v27 = vpop.permute.xlu0 %2971 }
 0x405   : > { %v3065_v38 = vld [vmem:[#allocation2 + $0x2] sm:$0x1] }
 0x406   : > { %v2976_v2 = vld [vmem:[#allocation2] sm:$0x1] }
 0x407   : > { %v2977_v3 = vsel %vm10097_vm8, %v2972_v27, %v2976_v2  ;;  %v3167_v12 = vpop.permute.xlu1 %3166 }
 0x408   : > { %2978 = vst [vmem:[#allocation2] sm:$0x1] %v2977_v3  ;;  %v3170_v13 = vsel %vm10070_vm4, %v3167_v12, %v3169_v5  ;;  %v3126_v52 = vpop.permute.xlu0 %3125  ;;  %v3394_v3 = vld [vmem:[#allocation2 + $0xa] sm:$0x1] }
 0x409   : > { %v2999_v53 = vld [vmem:[#allocation2 + $0x1] sm:$0x1]  ;;  %3171 = vst [vmem:[#allocation2 + $0x5] sm:$0x1] %v3170_v13  ;;  %v3129_v17 = vsel %vm10070_vm4, %v3126_v52, %v3128_v16  ;;  %v3099_v33 = vld [vmem:[#allocation2 + $0x3] sm:$0x1] }
 0x40a   : > { %v3000_v54 = vsel %vm10084_vm6, %v2997_v57, %v2999_v53  ;;  %3130 = vst [vmem:[#allocation2 + $0x4] sm:$0x1] %v3129_v17 }
 0x40b   : > { %3001 = vst [vmem:[#allocation2 + $0x1] sm:$0x1] %v3000_v54  ;;  %v3256_v44 = vpop.permute.xlu1 %3255 }
 0x40c   : > { %v3259_v26 = vsel %vm10070_vm4, %v3256_v44, %v3258_v0  ;;  %v3215_v62 = vpop.permute.xlu0 %3214 }
 0x40d   : > { %3260 = vst [vmem:[#allocation2 + $0x7] sm:$0x1] %v3259_v26  ;;  %v3218_v18 = vsel %vm10070_vm4, %v3215_v62, %v3217_v11 }
 0x40e   : > { %3219 = vst [vmem:[#allocation2 + $0x6] sm:$0x1] %v3218_v18 }
 0x40f   : > { %v3174_v21 = vpop.permute.xlu1 %3173 }
 0x410   : > { %v3176_v32 = vld [vmem:[#allocation2 + $0x5] sm:$0x1]  ;;  %v3140_v23 = vpop.permute.xlu0 %3139 }
 0x411   : > { %v3177_v24 = vsel %vm10084_vm6, %v3174_v21, %v3176_v32  ;;  %v3142_v28 = vld [vmem:[#allocation2 + $0x4] sm:$0x1] }
 0x412   : > { %v3010_v39 = vld [vmem:[#allocation2 + $0x1] sm:$0x1]  ;;  %3178 = vst [vmem:[#allocation2 + $0x5] sm:$0x1] %v3177_v24  ;;  %v3143_v42 = vsel %vm10084_vm6, %v3140_v23, %v3142_v28 }
 0x413   : > { %v3011_v4 = vsel %vm10097_vm8, %v3008_v1, %v3010_v39  ;;  %3144 = vst [vmem:[#allocation2 + $0x4] sm:$0x1] %v3143_v42  ;;  %v3263_v31 = vpop.permute.xlu1 %3262  ;;  %v3435_v1 = vld [vmem:[#allocation2 + $0xb] sm:$0x1] }
 0x414   : > { %3012 = vst [vmem:[#allocation2 + $0x1] sm:$0x1] %v3011_v4  ;;  %v3265_v43 = vld [vmem:[#allocation2 + $0x7] sm:$0x1]  ;;  %v3229_v37 = vpop.permute.xlu0 %3228  ;;  %v8192_v42 = vld [vmem:[%s11186_s3 + $0x200] ss:$8 sps:$4 sm:$0xff]  }
 0x415   : > { %v3266_v15 = vsel %vm10084_vm6, %v3263_v31, %v3265_v43  ;;  %v3231_v45 = vld [vmem:[#allocation2 + $0x6] sm:$0x1] }
 0x416   : > { %3267 = vst [vmem:[#allocation2 + $0x7] sm:$0x1] %v3266_v15  ;;  %v3232_v9 = vsel %vm10084_vm6, %v3229_v37, %v3231_v45  ;;  %v8198_v37 = vld [vmem:[%s11186_s3 + $0x214] ss:$8 sps:$4 sm:$0xff]  }
 0x417   : > { %3233 = vst [vmem:[#allocation2 + $0x6] sm:$0x1] %v3232_v9  ;;  %v3097_v35 = vpop.permute.xlu1 %3096 }
 0x418   : > { %v3100_v36 = vsel %vm10097_vm8, %v3097_v35, %v3099_v33  ;;  %v3063_v6 = vpop.permute.xlu0 %3062  ;;  %v8196_v35 = vld [vmem:[%s11186_s3 + $0x210] ss:$8 sps:$4 sm:$0xff]  }
 0x419   : > { %3101 = vst [vmem:[#allocation2 + $0x3] sm:$0x1] %v3100_v36  ;;  %v3066_v19 = vsel %vm10097_vm8, %v3063_v6, %v3065_v38  ;;  %v3187_v40 = vld [vmem:[#allocation2 + $0x5] sm:$0x1] }
 0x41a   : > { %3067 = vst [vmem:[#allocation2 + $0x2] sm:$0x1] %v3066_v19  ;;  %v3153_v47 = vld [vmem:[#allocation2 + $0x4] sm:$0x1] }
 0x41b   : > { %v3185_v41 = vpop.permute.xlu1 %3184  ;;  %v8201_v38 = vld [vmem:[%s11186_s3 + $0x224] ss:$8 sps:$4 sm:$0xff]  }
 0x41c   : > { %v3188_v46 = vsel %vm10097_vm8, %v3185_v41, %v3187_v40  ;;  %v3151_v22 = vpop.permute.xlu0 %3150  ;;  %v3523_v41 = vld [vmem:[#allocation2 + $0xd] sm:$0x1] }
 0x41d   : > { %3189 = vst [vmem:[#allocation2 + $0x5] sm:$0x1] %v3188_v46  ;;  %v3154_v55 = vsel %vm10097_vm8, %v3151_v22, %v3153_v47  ;;  %v3276_v57 = vld [vmem:[#allocation2 + $0x7] sm:$0x1]  ;;  %v3482_v22 = vld [vmem:[#allocation2 + $0xc] sm:$0x1] }
 0x41e   : > { %3155 = vst [vmem:[#allocation2 + $0x4] sm:$0x1] %v3154_v55  ;;  %v3242_v29 = vld [vmem:[#allocation2 + $0x6] sm:$0x1] }
 0x41f   : > { %v3274_v59 = vpop.permute.xlu1 %3273 }
 0x420   : > { %v3277_v7 = vsel %vm10097_vm8, %v3274_v59, %v3276_v57  ;;  %v3240_v10 = vpop.permute.xlu0 %3239  ;;  %v8199_v57 = vld [vmem:[%s11186_s3 + $0x220] ss:$8 sps:$4 sm:$0xff]  }
 0x421   : > { %3278 = vst [vmem:[#allocation2 + $0x7] sm:$0x1] %v3277_v7  ;;  %v3243_v60 = vsel %vm10097_vm8, %v3240_v10, %v3242_v29  ;;  %v8204_v7 = vld [vmem:[%s11186_s3 + $0x234] ss:$8 sps:$4 sm:$0xff]   ;;  %v3612_v29 = vld [vmem:[#allocation2 + $0xf] sm:$0x1] }
 0x422   : > { %3244 = vst [vmem:[#allocation2 + $0x6] sm:$0x1] %v3243_v60 }
 0x423   : > { %v3344_v50 = vpop.permute.xlu1 %3343 }
 0x424   : > { %v3347_v61 = vsel %vm10070_vm4, %v3344_v50, %v3346_v20  ;;  %v3303_v8 = vpop.permute.xlu0 %3302  ;;  %v3571_v20 = vld [vmem:[#allocation2 + $0xe] sm:$0x1] }
 0x425   : > { %3348 = vst [vmem:[#allocation2 + $0x9] sm:$0x1] %v3347_v61  ;;  %v3306_v30 = vsel %vm10070_vm4, %v3303_v8, %v3305_v63  ;;  %v8202_v61 = vld [vmem:[%s11186_s3 + $0x230] ss:$8 sps:$4 sm:$0xff]   ;;  %v8207_v8 = vld [vmem:[%s11186_s3 + $0x244] ss:$8 sps:$4 sm:$0xff]  }
 0x426   : > { %3307 = vst [vmem:[#allocation2 + $0x8] sm:$0x1] %v3306_v30 }
 0x427   : > { %v3433_v27 = vpop.permute.xlu1 %3432 }
 0x428   : > { %v3436_v2 = vsel %vm10070_vm4, %v3433_v27, %v3435_v1  ;;  %v3392_v5 = vpop.permute.xlu0 %3391 }
 0x429   : > { %3437 = vst [vmem:[#allocation2 + $0xb] sm:$0x1] %v3436_v2  ;;  %v3395_v12 = vsel %vm10070_vm4, %v3392_v5, %v3394_v3  ;;  %v3813_v13 = vld [vmem:[#allocation2] sm:$0xff] }
 0x42a   : > { %3396 = vst [vmem:[#allocation2 + $0xa] sm:$0x1] %v3395_v12  ;;  %v4151_v16 = vrot.slane %v3813_v13, %v9584_v34  ;;  %v4144_v52 = vcombine.high %v3813_v13, %v3813_v13  ;;  %v8205_v2 = vld [vmem:[%s11186_s3 + $0x240] ss:$8 sps:$4 sm:$0xff]   ;;  %v8210_v12 = vld [vmem:[%s11186_s3 + $0x254] ss:$8 sps:$4 sm:$0xff]  }
 0x42b   : > { %v3351_v53 = vpop.permute.xlu1 %3350 }
 0x42c   : > { %v3353_v17 = vld [vmem:[#allocation2 + $0x9] sm:$0x1]  ;;  %v3317_v54 = vpop.permute.xlu0 %3316  ;;  %v4159_v0 = vcombine.high %v4151_v16, %v4151_v16  ;;  %v10145_v44 = vrot.slane %v4144_v52, %v9584_v34  ;;  %v4167_v62 = vrot.slane %v4151_v16, %v9584_v34 }
 0x42d   : > { %v3354_v26 = vsel %vm10084_vm6, %v3351_v53, %v3353_v17  ;;  %v3319_v11 = vld [vmem:[#allocation2 + $0x8] sm:$0x1]  ;;  %v8208_v17 = vld [vmem:[%s11186_s3 + $0x250] ss:$8 sps:$4 sm:$0xff]  }
 0x42e   : > { %3355 = vst [vmem:[#allocation2 + $0x9] sm:$0x1] %v3354_v26  ;;  %v3320_v18 = vsel %vm10084_vm6, %v3317_v54, %v3319_v11  ;;  %v4181_v21 = vrot.slane %v4159_v0, %v9584_v34  ;;  %v4160_v32 = vcombine.high %v10145_v44, %v10145_v44  ;;  %v4189_v43 = vcombine.high %v4167_v62, %v4167_v62  ;;  %v8213_v26 = vld [vmem:[%s11186_s3 + $0x264] ss:$8 sps:$4 sm:$0xff]  }
 0x42f   : > { %3321 = vst [vmem:[#allocation2 + $0x8] sm:$0x1] %v3320_v18  ;;  %v3440_v23 = vpop.permute.xlu1 %3439  ;;  %v10320_v14 = vrot.slane %v10145_v44, %v9584_v34  ;;  %v8249_v44 = vld [vmem:[%s11186_s3 + $0x324] ss:$8 sps:$4 sm:$0xff]  }
 0x430   : > { %v3442_v24 = vld [vmem:[#allocation2 + $0xb] sm:$0x1]  ;;  %v3406_v28 = vpop.permute.xlu0 %3405  ;;  %5968 = vmatprep.mubr.bf16.mxu0 %v4181_v21  ;;  %v4191_v39 = vcombine.high %v4181_v21, %v4181_v21  ;;  %v10166_v45 = vrot.slane %v4160_v32, %v9584_v34 }
 0x431   : > { %v3443_v4 = vsel %vm10084_vm6, %v3440_v23, %v3442_v24  ;;  %v3408_v31 = vld [vmem:[#allocation2 + $0xa] sm:$0x1]  ;;  %5969 = vmatmul.mubr.bf16.vlgmr.msra.gmra.mrb[48].mxu0 %v4167_v62 }
 0x432   : > { %3444 = vst [vmem:[#allocation2 + $0xb] sm:$0x1] %v3443_v4  ;;  %v3409_v15 = vsel %vm10084_vm6, %v3406_v28, %v3408_v31  ;;  %6009 = vmatprep.mubr.bf16.mxu1 %v4191_v39  ;;  %v8211_v24 = vld [vmem:[%s11186_s3 + $0x260] ss:$8 sps:$4 sm:$0xff]   ;;  %v8216_v39 = vld [vmem:[%s11186_s3 + $0x274] ss:$8 sps:$4 sm:$0xff]  }
 0x433   : > { %3410 = vst [vmem:[#allocation2 + $0xa] sm:$0x1] %v3409_v15  ;;  %6010 = vmatmul.mubr.bf16.vlgmr.msra.gmra.mrb[0].mxu1 %v4189_v43  ;;  %v3362_v9 = vpop.permute.xlu1 %3361  ;;  %v8214_v15 = vld [vmem:[%s11186_s3 + $0x270] ss:$8 sps:$4 sm:$0xff]  }
 0x434   : > { %6019 = vmatpush1.bf16.msra.mxu1 %v8192_v42  ;;  %v3328_v33 = vpop.permute.xlu0 %3327  ;;  %6050 = vmatprep.mubr.bf16.mxu1 %v10166_v45 }
 0x435   : > { %v3364_v36 = vld [vmem:[#allocation2 + $0x9] sm:$0x1]  ;;  %6020 = vmatprep.subr.bf16.mxu1 %v8198_v37 }
 0x436   : > { %v3365_v6 = vsel %vm10097_vm8, %v3362_v9, %v3364_v36  ;;  %v3330_v19 = vld [vmem:[#allocation2 + $0x8] sm:$0x1] }
 0x437   : > { %3366 = vst [vmem:[#allocation2 + $0x9] sm:$0x1] %v3365_v6  ;;  %v3331_v40 = vsel %vm10097_vm8, %v3328_v33, %v3330_v19  ;;  %v3521_v46 = vpop.permute.xlu1 %3520  ;;  %v8219_v33 = vld [vmem:[%s11186_s3 + $0x284] ss:$8 sps:$4 sm:$0xff]  }
 0x438   : > { %3332 = vst [vmem:[#allocation2 + $0x8] sm:$0x1] %v3331_v40  ;;  %6021 = vmatpush1.bf16.msra.mxu1 %v8196_v35  ;;  %v3524_v47 = vsel %vm10070_vm4, %v3521_v46, %v3523_v41  ;;  %v3480_v55 = vpop.permute.xlu0 %3479  ;;  %v8217_v40 = vld [vmem:[%s11186_s3 + $0x280] ss:$8 sps:$4 sm:$0xff]   ;;  %v8222_v46 = vld [vmem:[%s11186_s3 + $0x294] ss:$8 sps:$4 sm:$0xff]  }
 0x439   : > { %3525 = vst [vmem:[#allocation2 + $0xd] sm:$0x1] %v3524_v47  ;;  %v3483_v59 = vsel %vm10070_vm4, %v3480_v55, %v3482_v22  ;;  %6022 = vmatprep.subr.bf16.mxu1 %v8201_v38  ;;  %v3453_v62 = vld [vmem:[#allocation2 + $0xb] sm:$0x1]  ;;  %v3700_v47 = vld [vmem:[#allocation2 + $0x11] sm:$0x1] }
 0x43a   : > { %3484 = vst [vmem:[#allocation2 + $0xc] sm:$0x1] %v3483_v59  ;;  %v3419_v32 = vld [vmem:[#allocation2 + $0xa] sm:$0x1] }
 0x43b   : > { %v3610_v10 = vpop.permute.xlu1 %3609 }
 0x43c   : > { %6023 = vmatpush1.bf16.msra.mxu1 %v8199_v57  ;;  %v3613_v60 = vsel %vm10070_vm4, %v3610_v10, %v3612_v29  ;;  %v3569_v50 = vpop.permute.xlu0 %3568  ;;  %v3659_v57 = vld [vmem:[#allocation2 + $0x10] sm:$0x1]  ;;  %v8225_v10 = vld [vmem:[%s11186_s3 + $0x2a4] ss:$8 sps:$4 sm:$0xff]  }
 0x43d   : > { %3614 = vst [vmem:[#allocation2 + $0xf] sm:$0x1] %v3613_v60  ;;  %v3572_v63 = vsel %vm10070_vm4, %v3569_v50, %v3571_v20  ;;  %6024 = vmatprep.subr.bf16.mxu1 %v8204_v7  ;;  %v8220_v7 = vld [vmem:[%s11186_s3 + $0x290] ss:$8 sps:$4 sm:$0xff]  }
 0x43e   : > { %3573 = vst [vmem:[#allocation2 + $0xe] sm:$0x1] %v3572_v63  ;;  %v3789_v60 = vld [vmem:[#allocation2 + $0x13] sm:$0x1] }
 0x43f   : > { %v3528_v30 = vpop.permute.xlu1 %3527 }
 0x440   : > { %6025 = vmatpush1.bf16.msra.mxu1 %v8202_v61  ;;  %v3530_v1 = vld [vmem:[#allocation2 + $0xd] sm:$0x1]  ;;  %v3494_v27 = vpop.permute.xlu0 %3493  ;;  %v3748_v61 = vld [vmem:[#allocation2 + $0x12] sm:$0x1] }
 0x441   : > { %v3531_v3 = vsel %vm10084_vm6, %v3528_v30, %v3530_v1  ;;  %v3496_v5 = vld [vmem:[#allocation2 + $0xc] sm:$0x1]  ;;  %6026 = vmatprep.subr.bf16.mxu1 %v8207_v8  ;;  %v8223_v8 = vld [vmem:[%s11186_s3 + $0x2a0] ss:$8 sps:$4 sm:$0xff]   ;;  %v8228_v1 = vld [vmem:[%s11186_s3 + $0x2b4] ss:$8 sps:$4 sm:$0xff]  }
 0x442   : > { %3532 = vst [vmem:[#allocation2 + $0xd] sm:$0x1] %v3531_v3  ;;  %v3497_v13 = vsel %vm10084_vm6, %v3494_v27, %v3496_v5  ;;  %v8226_v5 = vld [vmem:[%s11186_s3 + $0x2b0] ss:$8 sps:$4 sm:$0xff]  }
 0x443   : > { %3498 = vst [vmem:[#allocation2 + $0xc] sm:$0x1] %v3497_v13  ;;  %v3617_v16 = vpop.permute.xlu1 %3616 }
 0x444   : > { %6027 = vmatpush1.bf16.msra.mxu1 %v8205_v2  ;;  %v3619_v52 = vld [vmem:[#allocation2 + $0xf] sm:$0x1]  ;;  %v3583_v53 = vpop.permute.xlu0 %3582 }
 0x445   : > { %v3620_v54 = vsel %vm10084_vm6, %v3617_v16, %v3619_v52  ;;  %v3585_v0 = vld [vmem:[#allocation2 + $0xe] sm:$0x1]  ;;  %6028 = vmatprep.subr.bf16.mxu1 %v8210_v12 }
 0x446   : > { %3621 = vst [vmem:[#allocation2 + $0xf] sm:$0x1] %v3620_v54  ;;  %v3586_v11 = vsel %vm10084_vm6, %v3583_v53, %v3585_v0  ;;  %v8229_v54 = vld [vmem:[%s11186_s3 + $0x2c0] ss:$8 sps:$4 sm:$0xff]  }
 0x447   : > { %3587 = vst [vmem:[#allocation2 + $0xe] sm:$0x1] %v3586_v11  ;;  %v3451_v18 = vpop.permute.xlu1 %3450  ;;  %v8234_v11 = vld [vmem:[%s11186_s3 + $0x2d4] ss:$8 sps:$4 sm:$0xff]  }
 0x448   : > { %6029 = vmatpush1.bf16.msra.mxu1 %v8208_v17  ;;  %v3454_v21 = vsel %vm10097_vm8, %v3451_v18, %v3453_v62  ;;  %v3417_v23 = vpop.permute.xlu0 %3416 }
 0x449   : > { %3455 = vst [vmem:[#allocation2 + $0xb] sm:$0x1] %v3454_v21  ;;  %v3420_v28 = vsel %vm10097_vm8, %v3417_v23, %v3419_v32  ;;  %6030 = vmatprep.subr.bf16.mxu1 %v8213_v26  ;;  %v3541_v42 = vld [vmem:[#allocation2 + $0xd] sm:$0x1]  ;;  %v8232_v32 = vld [vmem:[%s11186_s3 + $0x2d0] ss:$8 sps:$4 sm:$0xff]  }
 0x44a   : > { %3421 = vst [vmem:[#allocation2 + $0xa] sm:$0x1] %v3420_v28  ;;  %v3507_v43 = vld [vmem:[#allocation2 + $0xc] sm:$0x1] }
 0x44b   : > { %v3539_v4 = vpop.permute.xlu1 %3538 }
 0x44c   : > { %6031 = vmatpush1.bf16.msra.mxu1 %v8211_v24  ;;  %v3542_v31 = vsel %vm10097_vm8, %v3539_v4, %v3541_v42  ;;  %v3505_v37 = vpop.permute.xlu0 %3504  ;;  %v8237_v24 = vld [vmem:[%s11186_s3 + $0x2e4] ss:$8 sps:$4 sm:$0xff]   ;;  %v8235_v42 = vld [vmem:[%s11186_s3 + $0x2e0] ss:$8 sps:$4 sm:$0xff]  }
 0x44d   : > { %3543 = vst [vmem:[#allocation2 + $0xd] sm:$0x1] %v3542_v31  ;;  %v3508_v9 = vsel %vm10097_vm8, %v3505_v37, %v3507_v43  ;;  %6032 = vmatprep.subr.bf16.mxu1 %v8216_v39  ;;  %v3630_v35 = vld [vmem:[#allocation2 + $0xf] sm:$0x1]  ;;  %v8240_v43 = vld [vmem:[%s11186_s3 + $0x2f4] ss:$8 sps:$4 sm:$0xff]  }
 0x44e   : > { %3509 = vst [vmem:[#allocation2 + $0xc] sm:$0x1] %v3508_v9  ;;  %v3596_v6 = vld [vmem:[#allocation2 + $0xe] sm:$0x1] }
 0x44f   : > { %v3628_v36 = vpop.permute.xlu1 %3627 }
 0x450   : > { %6033 = vmatpush1.bf16.msra.mxu1 %v8214_v15  ;;  %v3631_v38 = vsel %vm10097_vm8, %v3628_v36, %v3630_v35  ;;  %v3594_v19 = vpop.permute.xlu0 %3593  ;;  %v8238_v35 = vld [vmem:[%s11186_s3 + $0x2f0] ss:$8 sps:$4 sm:$0xff]   ;;  %v8243_v36 = vld [vmem:[%s11186_s3 + $0x304] ss:$8 sps:$4 sm:$0xff]  }
 0x451   : > { %3632 = vst [vmem:[#allocation2 + $0xf] sm:$0x1] %v3631_v38  ;;  %v3597_v41 = vsel %vm10097_vm8, %v3594_v19, %v3596_v6  ;;  %6034 = vmatprep.subr.bf16.mxu1 %v8219_v33  ;;  %v8241_v38 = vld [vmem:[%s11186_s3 + $0x300] ss:$8 sps:$4 sm:$0xff]   ;;  %v8246_v6 = vld [vmem:[%s11186_s3 + $0x314] ss:$8 sps:$4 sm:$0xff]   ;;  %v4192_v19 = vcombine.high %v10166_v45, %v10166_v45 }
 0x452   : > { %3598 = vst [vmem:[#allocation2 + $0xe] sm:$0x1] %v3597_v41  ;;  %v8247_v41 = vld [vmem:[%s11186_s3 + $0x320] ss:$8 sps:$4 sm:$0xff]   ;;  %v8252_v45 = vld [vmem:[%s11186_s3 + $0x334] ss:$8 sps:$4 sm:$0xff]  }
 0x453   : > { %v3698_v22 = vpop.permute.xlu1 %3697 }
 0x454   : > { %6035 = vmatpush1.bf16.msra.mxu1 %v8217_v40  ;;  %v3701_v55 = vsel %vm10070_vm4, %v3698_v22, %v3700_v47  ;;  %v3657_v59 = vpop.permute.xlu0 %3656  ;;  %v8244_v40 = vld [vmem:[%s11186_s3 + $0x310] ss:$8 sps:$4 sm:$0xff]   ;;  %v8255_v47 = vld [vmem:[%s11186_s3 + $0x344] ss:$8 sps:$4 sm:$0xff]   ;;  %v8253_v22 = vld [vmem:[%s11186_s3 + $0x340] ss:$8 sps:$4 sm:$0xff]  }
 0x455   : > { %3702 = vst [vmem:[#allocation2 + $0x11] sm:$0x1] %v3701_v55  ;;  %v3660_v29 = vsel %vm10070_vm4, %v3657_v59, %v3659_v57  ;;  %6036 = vmatprep.subr.bf16.mxu1 %v8222_v46  ;;  %v8250_v46 = vld [vmem:[%s11186_s3 + $0x330] ss:$8 sps:$4 sm:$0xff]   ;;  %v8258_v55 = vld [vmem:[%s11186_s3 + $0x354] ss:$8 sps:$4 sm:$0xff]  }
 0x456   : > { %3661 = vst [vmem:[#allocation2 + $0x10] sm:$0x1] %v3660_v29  ;;  %v8256_v57 = vld [vmem:[%s11186_s3 + $0x350] ss:$8 sps:$4 sm:$0xff]   ;;  %v8261_v59 = vld [vmem:[%s11186_s3 + $0x364] ss:$8 sps:$4 sm:$0xff]  }
 0x457   : > { %v3787_v20 = vpop.permute.xlu1 %3786  ;;  %v8264_v29 = vld [vmem:[%s11186_s3 + $0x374] ss:$8 sps:$4 sm:$0xff]  }
 0x458   : > { %6037 = vmatpush1.bf16.msra.mxu1 %v8220_v7  ;;  %v3790_v50 = vsel %vm10070_vm4, %v3787_v20, %v3789_v60  ;;  %v3746_v63 = vpop.permute.xlu0 %3745  ;;  %v8259_v7 = vld [vmem:[%s11186_s3 + $0x360] ss:$8 sps:$4 sm:$0xff]   ;;  %v8267_v60 = vld [vmem:[%s11186_s3 + $0x384] ss:$8 sps:$4 sm:$0xff]  }
 0x459   : > { %3791 = vst [vmem:[#allocation2 + $0x13] sm:$0x1] %v3790_v50  ;;  %v3749_v30 = vsel %vm10070_vm4, %v3746_v63, %v3748_v61  ;;  %6038 = vmatprep.subr.bf16.mxu1 %v8225_v10  ;;  %v8262_v10 = vld [vmem:[%s11186_s3 + $0x370] ss:$8 sps:$4 sm:$0xff]   ;;  %v8265_v20 = vld [vmem:[%s11186_s3 + $0x380] ss:$8 sps:$4 sm:$0xff]  }
 0x45a   : > { %3750 = vst [vmem:[#allocation2 + $0x12] sm:$0x1] %v3749_v30  ;;  %v8270_v50 = vld [vmem:[%s11186_s3 + $0x394] ss:$8 sps:$4 sm:$0xff]   ;;  %v8268_v61 = vld [vmem:[%s11186_s3 + $0x390] ss:$8 sps:$4 sm:$0xff]  }
 0x45b   : > { %v3705_v27 = vpop.permute.xlu1 %3704  ;;  %v8273_v63 = vld [vmem:[%s11186_s3 + $0x3a4] ss:$8 sps:$4 sm:$0xff]   ;;  %v8276_v30 = vld [vmem:[%s11186_s3 + $0x3b4] ss:$8 sps:$4 sm:$0xff]  }
 0x45c   : > { %6039 = vmatpush1.bf16.msra.mxu1 %v8223_v8  ;;  %v3707_v2 = vld [vmem:[#allocation2 + $0x11] sm:$0x1]  ;;  %v3671_v3 = vpop.permute.xlu0 %3670  ;;  %v8271_v8 = vld [vmem:[%s11186_s3 + $0x3a0] ss:$8 sps:$4 sm:$0xff]  }
 0x45d   : > { %v3708_v12 = vsel %vm10084_vm6, %v3705_v27, %v3707_v2  ;;  %v3673_v13 = vld [vmem:[#allocation2 + $0x10] sm:$0x1]  ;;  %6040 = vmatprep.subr.bf16.mxu1 %v8228_v1  ;;  %v8279_v27 = vld [vmem:[%s11186_s3 + $0x3c4] ss:$8 sps:$4 sm:$0xff]   ;;  %v8277_v2 = vld [vmem:[%s11186_s3 + $0x3c0] ss:$8 sps:$4 sm:$0xff]  }
 0x45e   : > { %3709 = vst [vmem:[#allocation2 + $0x11] sm:$0x1] %v3708_v12  ;;  %v3674_v16 = vsel %vm10084_vm6, %v3671_v3, %v3673_v13  ;;  %v8274_v1 = vld [vmem:[%s11186_s3 + $0x3b0] ss:$8 sps:$4 sm:$0xff]   ;;  %v8282_v3 = vld [vmem:[%s11186_s3 + $0x3d4] ss:$8 sps:$4 sm:$0xff]  }
 0x45f   : > { %3675 = vst [vmem:[#allocation2 + $0x10] sm:$0x1] %v3674_v16  ;;  %v3794_v52 = vpop.permute.xlu1 %3793  ;;  %v8285_v12 = vld [vmem:[%s11186_s3 + $0x3e4] ss:$8 sps:$4 sm:$0xff]   ;;  %v8288_v16 = vld [vmem:[%s11186_s3 + $0x3f4] ss:$8 sps:$4 sm:$0xff]  }
 0x460   : > { %6041 = vmatpush1.bf16.msra.mxu1 %v8226_v5  ;;  %v3796_v53 = vld [vmem:[#allocation2 + $0x13] sm:$0x1]  ;;  %v3760_v17 = vpop.permute.xlu0 %3759  ;;  %v10406_v13 = vld [vmem:[#allocation2 + $0x8] sm:$0xff] }
 0x461   : > { %v3797_v0 = vsel %vm10084_vm6, %v3794_v52, %v3796_v53  ;;  %v3762_v26 = vld [vmem:[#allocation2 + $0x12] sm:$0x1]  ;;  %6042 = vmatprep.subr.bf16.mxu1 %v8231_v58  ;;  %v8283_v58 = vld [vmem:[%s11186_s3 + $0x3e0] ss:$8 sps:$4 sm:$0xff]   ;;  %v10416_v52 = vrot.slane %v10406_v13, %v9584_v34 }
 0x462   : > { %3798 = vst [vmem:[#allocation2 + $0x13] sm:$0x1] %v3797_v0  ;;  %v3763_v62 = vsel %vm10084_vm6, %v3760_v17, %v3762_v26  ;;  %v8280_v5 = vld [vmem:[%s11186_s3 + $0x3d0] ss:$8 sps:$4 sm:$0xff]   ;;  %v8291_v17 = vld [vmem:[%s11186_s3 + $0x404] ss:$8 sps:$4 sm:$0xff]   ;;  %v4190_v26 = vcombine.high %v10320_v14, %v10320_v14 }
 0x463   : > { %3764 = vst [vmem:[#allocation2 + $0x12] sm:$0x1] %v3763_v62  ;;  %v3716_v18 = vpop.permute.xlu1 %3715  ;;  %v8286_v53 = vld [vmem:[%s11186_s3 + $0x3f0] ss:$8 sps:$4 sm:$0xff]   ;;  %v8289_v0 = vld [vmem:[%s11186_s3 + $0x400] ss:$8 sps:$4 sm:$0xff]  }
 0x464   : > { %6043 = vmatpush1.bf16.msra.mxu1 %v8229_v54  ;;  %v3682_v21 = vpop.permute.xlu0 %3681  ;;  %v4208_v54 = vcombine.high %v10416_v52, %v10416_v52 }
 0x465   : > { %v3718_v23 = vld [vmem:[#allocation2 + $0x11] sm:$0x1]  ;;  %6044 = vmatprep.subr.bf16.mxu1 %v8234_v11  ;;  %v8294_v11 = vld [vmem:[%s11186_s3 + $0x414] ss:$8 sps:$4 sm:$0xff]  }
 0x466   : > { %v3719_v28 = vsel %vm10097_vm8, %v3716_v18, %v3718_v23  ;;  %v3684_v39 = vld [vmem:[#allocation2 + $0x10] sm:$0x1]  ;;  %v10435_v62 = vrot.slane %v4208_v54, %v9584_v34  ;;  %v8300_v23 = vld [vmem:[%s11186_s3 + $0x434] ss:$8 sps:$4 sm:$0xff]  }
 0x467   : > { %3720 = vst [vmem:[#allocation2 + $0x11] sm:$0x1] %v3719_v28  ;;  %v3685_v56 = vsel %vm10097_vm8, %v3682_v21, %v3684_v39  ;;  %v3805_v31 = vpop.permute.xlu1 %3804  ;;  %v8292_v18 = vld [vmem:[%s11186_s3 + $0x410] ss:$8 sps:$4 sm:$0xff]   ;;  %v8297_v21 = vld [vmem:[%s11186_s3 + $0x424] ss:$8 sps:$4 sm:$0xff]  }
 0x468   : > { %3686 = vst [vmem:[#allocation2 + $0x10] sm:$0x1] %v3685_v56  ;;  %6045 = vmatpush1.bf16.msra.mxu1 %v8232_v32  ;;  %v3771_v9 = vpop.permute.xlu0 %3770  ;;  %v8295_v32 = vld [vmem:[%s11186_s3 + $0x420] ss:$8 sps:$4 sm:$0xff]   ;;  %v8303_v28 = vld [vmem:[%s11186_s3 + $0x444] ss:$8 sps:$4 sm:$0xff]  }
 0x469   : > { %v3807_v4 = vld [vmem:[#allocation2 + $0x13] sm:$0x1]  ;;  %6046 = vmatprep.subr.bf16.mxu1 %v8237_v24  ;;  %v8301_v39 = vld [vmem:[%s11186_s3 + $0x440] ss:$8 sps:$4 sm:$0xff]   ;;  %v8306_v56 = vld [vmem:[%s11186_s3 + $0x454] ss:$8 sps:$4 sm:$0xff]  }
 0x46a   : > { %v3808_v37 = vsel %vm10097_vm8, %v3805_v31, %v3807_v4  ;;  %v3773_v15 = vld [vmem:[#allocation2 + $0x12] sm:$0x1]  ;;  %v8309_v4 = vld [vmem:[%s11186_s3 + $0x464] ss:$8 sps:$4 sm:$0xff]   ;;  %v8307_v31 = vld [vmem:[%s11186_s3 + $0x460] ss:$8 sps:$4 sm:$0xff]  }
 0x46b   : > { %3809 = vst [vmem:[#allocation2 + $0x13] sm:$0x1] %v3808_v37  ;;  %v3774_v33 = vsel %vm10097_vm8, %v3771_v9, %v3773_v15  ;;  %v8298_v24 = vld [vmem:[%s11186_s3 + $0x430] ss:$8 sps:$4 sm:$0xff]   ;;  %v8315_v15 = vld [vmem:[%s11186_s3 + $0x484] ss:$8 sps:$4 sm:$0xff]  }
 0x46c   : > { %3775 = vst [vmem:[#allocation2 + $0x12] sm:$0x1] %v3774_v33  ;;  %6047 = vmatpush1.bf16.msra.mxu1 %v8235_v42  ;;  %v8304_v42 = vld [vmem:[%s11186_s3 + $0x450] ss:$8 sps:$4 sm:$0xff]   ;;  %v8313_v9 = vld [vmem:[%s11186_s3 + $0x480] ss:$8 sps:$4 sm:$0xff]  }
 0x46d   : > { %6048 = vmatprep.subr.bf16.mxu1 %v8240_v43  ;;  %v8312_v43 = vld [vmem:[%s11186_s3 + $0x474] ss:$8 sps:$4 sm:$0xff]   ;;  %v8310_v37 = vld [vmem:[%s11186_s3 + $0x470] ss:$8 sps:$4 sm:$0xff]  }
 0x46e   : > { %v8318_v33 = vld [vmem:[%s11186_s3 + $0x494] ss:$8 sps:$4 sm:$0xff]  }
 0x46f   : > { %v8366_v54 = vld [vmem:[%s11186_s3 + $0x594] ss:$8 sps:$4 sm:$0xff]  }
 0x470   : > { %6049 = vmatpush1.bf16.msra.mxu1 %v8238_v35  ;;  %v8316_v35 = vld [vmem:[%s11186_s3 + $0x490] ss:$8 sps:$4 sm:$0xff]  }
 0x471   : > { %6059 = vmatprep.subr.bf16.mxu1 %v8243_v36  ;;  %v8321_v36 = vld [vmem:[%s11186_s3 + $0x4a4] ss:$8 sps:$4 sm:$0xff]  }
 0x473   : > { %6051 = vmatmul.mubr.bf16.vlgmr.msra.gmra.mrb[0].mxu1 %v10320_v14  ;;  %v8324_v14 = vld [vmem:[%s11186_s3 + $0x4b4] ss:$8 sps:$4 sm:$0xff]  }
 0x474   : > { %6060 = vmatpush1.bf16.msra.mxu1 %v8241_v38  ;;  %6091 = vmatprep.mubr.bf16.mxu1 %v4192_v19  ;;  %v8319_v38 = vld [vmem:[%s11186_s3 + $0x4a0] ss:$8 sps:$4 sm:$0xff]   ;;  %v8327_v19 = vld [vmem:[%s11186_s3 + $0x4c4] ss:$8 sps:$4 sm:$0xff]  }
 0x475   : > { %6061 = vmatprep.subr.bf16.mxu1 %v8246_v6  ;;  %v8322_v6 = vld [vmem:[%s11186_s3 + $0x4b0] ss:$8 sps:$4 sm:$0xff]  }
 0x478   : > { %6062 = vmatpush1.bf16.msra.mxu1 %v8244_v40  ;;  %v8325_v40 = vld [vmem:[%s11186_s3 + $0x4c0] ss:$8 sps:$4 sm:$0xff]  }
 0x479   : > { %6063 = vmatprep.subr.bf16.mxu1 %v8249_v44  ;;  %v8330_v44 = vld [vmem:[%s11186_s3 + $0x4d4] ss:$8 sps:$4 sm:$0xff]  }
 0x47c   : > { %6064 = vmatpush1.bf16.msra.mxu1 %v8247_v41  ;;  %v8328_v41 = vld [vmem:[%s11186_s3 + $0x4d0] ss:$8 sps:$4 sm:$0xff]  }
 0x47d   : > { %6065 = vmatprep.subr.bf16.mxu1 %v8252_v45  ;;  %v8333_v45 = vld [vmem:[%s11186_s3 + $0x4e4] ss:$8 sps:$4 sm:$0xff]  }
 0x480   : > { %6066 = vmatpush1.bf16.msra.mxu1 %v8250_v46  ;;  %v8331_v46 = vld [vmem:[%s11186_s3 + $0x4e0] ss:$8 sps:$4 sm:$0xff]  }
 0x481   : > { %6067 = vmatprep.subr.bf16.mxu1 %v8255_v47  ;;  %v8336_v47 = vld [vmem:[%s11186_s3 + $0x4f4] ss:$8 sps:$4 sm:$0xff]  }
 0x484   : > { %6068 = vmatpush1.bf16.msra.mxu1 %v8253_v22  ;;  %v8334_v22 = vld [vmem:[%s11186_s3 + $0x4f0] ss:$8 sps:$4 sm:$0xff]  }
 0x485   : > { %6069 = vmatprep.subr.bf16.mxu1 %v8258_v55  ;;  %v8339_v55 = vld [vmem:[%s11186_s3 + $0x504] ss:$8 sps:$4 sm:$0xff]  }
 0x488   : > { %6070 = vmatpush1.bf16.msra.mxu1 %v8256_v57  ;;  %v8337_v57 = vld [vmem:[%s11186_s3 + $0x500] ss:$8 sps:$4 sm:$0xff]  }
 0x489   : > { %6071 = vmatprep.subr.bf16.mxu1 %v8261_v59  ;;  %v10533_v59 = vrot.slane %v10416_v52, %v9584_v34  ;;  %v8358_v52 = vld [vmem:[%s11186_s3 + $0x570] ss:$8 sps:$4 sm:$0xff]  }
 0x48c   : > { %6072 = vmatpush1.bf16.msra.mxu1 %v8259_v7  ;;  %v8342_v7 = vld [vmem:[%s11186_s3 + $0x514] ss:$8 sps:$4 sm:$0xff]  }
 0x48d   : > { %6073 = vmatprep.subr.bf16.mxu1 %v8264_v29  ;;  %v4240_v29 = vcombine.high %v10435_v62, %v10435_v62 }
 0x490   : > { %6074 = vmatpush1.bf16.msra.mxu1 %v8262_v10  ;;  %v8340_v10 = vld [vmem:[%s11186_s3 + $0x510] ss:$8 sps:$4 sm:$0xff]  }
 0x491   : > { %6075 = vmatprep.subr.bf16.mxu1 %v8267_v60  ;;  %v8345_v60 = vld [vmem:[%s11186_s3 + $0x524] ss:$8 sps:$4 sm:$0xff]  }
 0x494   : > { %6076 = vmatpush1.bf16.msra.mxu1 %v8265_v20  ;;  %v8343_v20 = vld [vmem:[%s11186_s3 + $0x520] ss:$8 sps:$4 sm:$0xff]  }
 0x495   : > { %6077 = vmatprep.subr.bf16.mxu1 %v8270_v50  ;;  %v8348_v50 = vld [vmem:[%s11186_s3 + $0x534] ss:$8 sps:$4 sm:$0xff]  }
 0x498   : > { %6078 = vmatpush1.bf16.msra.mxu1 %v8268_v61  ;;  %v8346_v61 = vld [vmem:[%s11186_s3 + $0x530] ss:$8 sps:$4 sm:$0xff]  }
 0x499   : > { %6079 = vmatprep.subr.bf16.mxu1 %v8273_v63  ;;  %v8351_v63 = vld [vmem:[%s11186_s3 + $0x544] ss:$8 sps:$4 sm:$0xff]  }
 0x49c   : > { %6080 = vmatpush1.bf16.msra.mxu1 %v8271_v8  ;;  %v8349_v8 = vld [vmem:[%s11186_s3 + $0x540] ss:$8 sps:$4 sm:$0xff]  }
 0x49d   : > { %6081 = vmatprep.subr.bf16.mxu1 %v8276_v30  ;;  %v8354_v30 = vld [vmem:[%s11186_s3 + $0x554] ss:$8 sps:$4 sm:$0xff]  }
 0x4a0   : > { %6082 = vmatpush1.bf16.msra.mxu1 %v8274_v1 }
 0x4a1   : > { %6083 = vmatprep.subr.bf16.mxu1 %v8279_v27  ;;  %v8352_v27 = vld [vmem:[%s11186_s3 + $0x550] ss:$8 sps:$4 sm:$0xff]  }
 0x4a4   : > { %6084 = vmatpush1.bf16.msra.mxu1 %v8277_v2 }
 0x4a5   : > { %6085 = vmatprep.subr.bf16.mxu1 %v8282_v3  ;;  %v8357_v3 = vld [vmem:[%s11186_s3 + $0x564] ss:$8 sps:$4 sm:$0xff]  }
 0x4a8   : > { %6086 = vmatpush1.bf16.msra.mxu1 %v8280_v5 }
 0x4a9   : > { %6087 = vmatprep.subr.bf16.mxu1 %v8285_v12 }
 0x4ac   : > { %6088 = vmatpush1.bf16.msra.mxu1 %v8283_v58  ;;  %v8355_v58 = vld [vmem:[%s11186_s3 + $0x560] ss:$8 sps:$4 sm:$0xff]  }
 0x4ad   : > { %6089 = vmatprep.subr.bf16.mxu1 %v8288_v16  ;;  %v8360_v16 = vld [vmem:[%s11186_s3 + $0x574] ss:$8 sps:$4 sm:$0xff]  }
 0x4b0   : > { %6090 = vmatpush1.bf16.msra.mxu1 %v8286_v53  ;;  %v8363_v53 = vld [vmem:[%s11186_s3 + $0x584] ss:$8 sps:$4 sm:$0xff]  }
 0x4b1   : > { %6100 = vmatprep.subr.bf16.mxu1 %v8291_v17  ;;  %v8361_v17 = vld [vmem:[%s11186_s3 + $0x580] ss:$8 sps:$4 sm:$0xff]  }
 0x4b3   : > { %6092 = vmatmul.mubr.bf16.vlgmr.msra.gmra.mrb[0].mxu1 %v4190_v26  ;;  %v8369_v26 = vld [vmem:[%s11186_s3 + $0x5a4] ss:$8 sps:$4 sm:$0xff]  }
 0x4b4   : > { %6101 = vmatpush1.bf16.msra.mxu1 %v8289_v0  ;;  %6132 = vmatprep.mubr.bf16.mxu1 %v10435_v62  ;;  %v8364_v0 = vld [vmem:[%s11186_s3 + $0x590] ss:$8 sps:$4 sm:$0xff]   ;;  %v8372_v62 = vld [vmem:[%s11186_s3 + $0x5b4] ss:$8 sps:$4 sm:$0xff]  }
 0x4b5   : > { %6102 = vmatprep.subr.bf16.mxu1 %v8294_v11  ;;  %v8367_v11 = vld [vmem:[%s11186_s3 + $0x5a0] ss:$8 sps:$4 sm:$0xff]  }
 0x4b8   : > { %6103 = vmatpush1.bf16.msra.mxu1 %v8292_v18  ;;  %v8370_v18 = vld [vmem:[%s11186_s3 + $0x5b0] ss:$8 sps:$4 sm:$0xff]  }
 0x4b9   : > { %6104 = vmatprep.subr.bf16.mxu1 %v8297_v21  ;;  %v8375_v21 = vld [vmem:[%s11186_s3 + $0x5c4] ss:$8 sps:$4 sm:$0xff]  }
 0x4bc   : > { %6105 = vmatpush1.bf16.msra.mxu1 %v8295_v32  ;;  %v8373_v32 = vld [vmem:[%s11186_s3 + $0x5c0] ss:$8 sps:$4 sm:$0xff]  }
 0x4bd   : > { %6106 = vmatprep.subr.bf16.mxu1 %v8300_v23  ;;  %v8378_v23 = vld [vmem:[%s11186_s3 + $0x5d4] ss:$8 sps:$4 sm:$0xff]  }
 0x4c0   : > { %6107 = vmatpush1.bf16.msra.mxu1 %v8298_v24  ;;  %v8376_v24 = vld [vmem:[%s11186_s3 + $0x5d0] ss:$8 sps:$4 sm:$0xff]  }
 0x4c1   : > { %6108 = vmatprep.subr.bf16.mxu1 %v8303_v28  ;;  %v8381_v28 = vld [vmem:[%s11186_s3 + $0x5e4] ss:$8 sps:$4 sm:$0xff]  }
 0x4c4   : > { %6109 = vmatpush1.bf16.msra.mxu1 %v8301_v39  ;;  %v4193_v39 = vcombine.high %v10406_v13, %v10406_v13  ;;  %v8387_v13 = vld [vmem:[%s11186_s3 + $0x604] ss:$8 sps:$4 sm:$0xff]  }
 0x4c5   : > { %6110 = vmatprep.subr.bf16.mxu1 %v8306_v56  ;;  %v8379_v56 = vld [vmem:[%s11186_s3 + $0x5e0] ss:$8 sps:$4 sm:$0xff]  }
 0x4c8   : > { %6111 = vmatpush1.bf16.msra.mxu1 %v8304_v42  ;;  %v8384_v42 = vld [vmem:[%s11186_s3 + $0x5f4] ss:$8 sps:$4 sm:$0xff]  }
 0x4c9   : > { %6112 = vmatprep.subr.bf16.mxu1 %v8309_v4  ;;  %v10632_v4 = vrot.slane %v4193_v39, %v9584_v34  ;;  %v8455_v39 = vld [vmem:[%s11186_s3 + $0x770] ss:$8 sps:$4 sm:$0xff]  }
 0x4cc   : > { %6113 = vmatpush1.bf16.msra.mxu1 %v8307_v31  ;;  %v8382_v31 = vld [vmem:[%s11186_s3 + $0x5f0] ss:$8 sps:$4 sm:$0xff]  }
 0x4cd   : > { %6114 = vmatprep.subr.bf16.mxu1 %v8312_v43  ;;  %v4209_v43 = vcombine.high %v10632_v4, %v10632_v4 }
 0x4d0   : > { %6115 = vmatpush1.bf16.msra.mxu1 %v8310_v37  ;;  %v8385_v37 = vld [vmem:[%s11186_s3 + $0x600] ss:$8 sps:$4 sm:$0xff]  }
 0x4d1   : > { %6116 = vmatprep.subr.bf16.mxu1 %v8315_v15  ;;  %v4238_v15 = vcombine.high %v10533_v59, %v10533_v59 }
 0x4d4   : > { %6117 = vmatpush1.bf16.msra.mxu1 %v8313_v9  ;;  %v8391_v9 = vld [vmem:[%s11186_s3 + $0x614] ss:$8 sps:$4 sm:$0xff]  }
 0x4d5   : > { %6118 = vmatprep.subr.bf16.mxu1 %v8318_v33  ;;  %v10651_v33 = vrot.slane %v4209_v43, %v9584_v34  ;;  %v8464_v43 = vld [vmem:[%s11186_s3 + $0x7a0] ss:$8 sps:$4 sm:$0xff]  }
 0x4d8   : > { %6119 = vmatpush1.bf16.msra.mxu1 %v8316_v35  ;;  %v8389_v35 = vld [vmem:[%s11186_s3 + $0x610] ss:$8 sps:$4 sm:$0xff]  }
 0x4d9   : > { %6120 = vmatprep.subr.bf16.mxu1 %v8321_v36  ;;  %v8394_v36 = vld [vmem:[%s11186_s3 + $0x624] ss:$8 sps:$4 sm:$0xff]  }
 0x4dc   : > { %6121 = vmatpush1.bf16.msra.mxu1 %v8319_v38  ;;  %v8392_v38 = vld [vmem:[%s11186_s3 + $0x620] ss:$8 sps:$4 sm:$0xff]  }
 0x4dd   : > { %6122 = vmatprep.subr.bf16.mxu1 %v8324_v14  ;;  %v8397_v14 = vld [vmem:[%s11186_s3 + $0x634] ss:$8 sps:$4 sm:$0xff]  }
 0x4e0   : > { %6123 = vmatpush1.bf16.msra.mxu1 %v8322_v6  ;;  %v8395_v6 = vld [vmem:[%s11186_s3 + $0x630] ss:$8 sps:$4 sm:$0xff]  }
 0x4e1   : > { %6124 = vmatprep.subr.bf16.mxu1 %v8327_v19  ;;  %v8400_v19 = vld [vmem:[%s11186_s3 + $0x644] ss:$8 sps:$4 sm:$0xff]  }
 0x4e4   : > { %6125 = vmatpush1.bf16.msra.mxu1 %v8325_v40  ;;  %v8398_v40 = vld [vmem:[%s11186_s3 + $0x640] ss:$8 sps:$4 sm:$0xff]  }
 0x4e5   : > { %6126 = vmatprep.subr.bf16.mxu1 %v8330_v44  ;;  %v8403_v44 = vld [vmem:[%s11186_s3 + $0x654] ss:$8 sps:$4 sm:$0xff]  }
 0x4e8   : > { %6127 = vmatpush1.bf16.msra.mxu1 %v8328_v41  ;;  %v8401_v41 = vld [vmem:[%s11186_s3 + $0x650] ss:$8 sps:$4 sm:$0xff]  }
 0x4e9   : > { %6128 = vmatprep.subr.bf16.mxu1 %v8333_v45  ;;  %v8406_v45 = vld [vmem:[%s11186_s3 + $0x664] ss:$8 sps:$4 sm:$0xff]  }
 0x4ec   : > { %6129 = vmatpush1.bf16.msra.mxu1 %v8331_v46  ;;  %v8404_v46 = vld [vmem:[%s11186_s3 + $0x660] ss:$8 sps:$4 sm:$0xff]  }
 0x4ed   : > { %6130 = vmatprep.subr.bf16.mxu1 %v8336_v47  ;;  %v8409_v47 = vld [vmem:[%s11186_s3 + $0x674] ss:$8 sps:$4 sm:$0xff]  }
 0x4f0   : > { %6131 = vmatpush1.bf16.msra.mxu1 %v8334_v22  ;;  %v8407_v22 = vld [vmem:[%s11186_s3 + $0x670] ss:$8 sps:$4 sm:$0xff]  }
 0x4f1   : > { %6141 = vmatprep.subr.bf16.mxu1 %v8339_v55  ;;  %v8412_v55 = vld [vmem:[%s11186_s3 + $0x684] ss:$8 sps:$4 sm:$0xff]  }
 0x4f3   : > { %6133 = vmatmul.mubr.bf16.vlgmr.msra.gmra.mrb[0].mxu1 %v10533_v59  ;;  %v8415_v59 = vld [vmem:[%s11186_s3 + $0x694] ss:$8 sps:$4 sm:$0xff]  }
 0x4f4   : > { %6142 = vmatpush1.bf16.msra.mxu1 %v8337_v57  ;;  %6173 = vmatprep.mubr.bf16.mxu1 %v4240_v29  ;;  %v8410_v57 = vld [vmem:[%s11186_s3 + $0x680] ss:$8 sps:$4 sm:$0xff]   ;;  %v8418_v29 = vld [vmem:[%s11186_s3 + $0x6a4] ss:$8 sps:$4 sm:$0xff]  }
 0x4f5   : > { %6143 = vmatprep.subr.bf16.mxu1 %v8342_v7  ;;  %v8413_v7 = vld [vmem:[%s11186_s3 + $0x690] ss:$8 sps:$4 sm:$0xff]  }
 0x4f8   : > { %6144 = vmatpush1.bf16.msra.mxu1 %v8340_v10  ;;  %v8416_v10 = vld [vmem:[%s11186_s3 + $0x6a0] ss:$8 sps:$4 sm:$0xff]  }
 0x4f9   : > { %6145 = vmatprep.subr.bf16.mxu1 %v8345_v60  ;;  %v8421_v60 = vld [vmem:[%s11186_s3 + $0x6b4] ss:$8 sps:$4 sm:$0xff]  }
 0x4fc   : > { %6146 = vmatpush1.bf16.msra.mxu1 %v8343_v20  ;;  %v8419_v20 = vld [vmem:[%s11186_s3 + $0x6b0] ss:$8 sps:$4 sm:$0xff]  }
 0x4fd   : > { %6147 = vmatprep.subr.bf16.mxu1 %v8348_v50  ;;  %v8424_v50 = vld [vmem:[%s11186_s3 + $0x6c4] ss:$8 sps:$4 sm:$0xff]  }
 0x500   : > { %6148 = vmatpush1.bf16.msra.mxu1 %v8346_v61  ;;  %v8422_v61 = vld [vmem:[%s11186_s3 + $0x6c0] ss:$8 sps:$4 sm:$0xff]  }
 0x501   : > { %6149 = vmatprep.subr.bf16.mxu1 %v8351_v63  ;;  %v8427_v63 = vld [vmem:[%s11186_s3 + $0x6d4] ss:$8 sps:$4 sm:$0xff]  }
 0x504   : > { %6150 = vmatpush1.bf16.msra.mxu1 %v8349_v8  ;;  %v10565_v1 = vpop.f32.mrb[48].mxu0  ;;  %v8425_v8 = vld [vmem:[%s11186_s3 + $0x6d0] ss:$8 sps:$4 sm:$0xff]  }
 0x505   : > { %v10570_v2 = vpop.f32.mrb[49].mxu0  ;;  %6151 = vmatprep.subr.bf16.mxu1 %v8354_v30  ;;  %v8430_v30 = vld [vmem:[%s11186_s3 + $0x6e4] ss:$8 sps:$4 sm:$0xff]  }
 0x506   : > { %v5974_v5 = vpop.f32.mrb[50].mxu0 }
 0x507   : > { %v5975_v12 = vpop.f32.mrb[51].mxu0  ;;  %v8431_v5 = vld [vmem:[%s11186_s3 + $0x6f0] ss:$8 sps:$4 sm:$0xff]  }
 0x508   : > { %6152 = vmatpush1.bf16.msra.mxu1 %v8352_v27  ;;  %v8428_v27 = vld [vmem:[%s11186_s3 + $0x6e0] ss:$8 sps:$4 sm:$0xff]   ;;  %v8436_v12 = vld [vmem:[%s11186_s3 + $0x704] ss:$8 sps:$4 sm:$0xff]  }
 0x509   : > { %6153 = vmatprep.subr.bf16.mxu1 %v8357_v3  ;;  %v8433_v3 = vld [vmem:[%s11186_s3 + $0x6f4] ss:$8 sps:$4 sm:$0xff]  }
 0x50c   : > { %6154 = vmatpush1.bf16.msra.mxu1 %v8355_v58  ;;  %v8434_v58 = vld [vmem:[%s11186_s3 + $0x700] ss:$8 sps:$4 sm:$0xff]  }
 0x50d   : > { %6155 = vmatprep.subr.bf16.mxu1 %v8360_v16  ;;  %v10749_v16 = vrot.slane %v10632_v4, %v9584_v34  ;;  %v8463_v4 = vld [vmem:[%s11186_s3 + $0x794] ss:$8 sps:$4 sm:$0xff]  }
 0x510   : > { %6156 = vmatpush1.bf16.msra.mxu1 %v8358_v52  ;;  %v8439_v52 = vld [vmem:[%s11186_s3 + $0x714] ss:$8 sps:$4 sm:$0xff]  }
 0x511   : > { %6157 = vmatprep.subr.bf16.mxu1 %v8363_v53  ;;  %v4241_v53 = vcombine.high %v10651_v33, %v10651_v33 }
 0x514   : > { %6158 = vmatpush1.bf16.msra.mxu1 %v8361_v17  ;;  %v8437_v17 = vld [vmem:[%s11186_s3 + $0x710] ss:$8 sps:$4 sm:$0xff]  }
 0x515   : > { %6159 = vmatprep.subr.bf16.mxu1 %v8366_v54  ;;  %v8442_v54 = vld [vmem:[%s11186_s3 + $0x724] ss:$8 sps:$4 sm:$0xff]  }
 0x518   : > { %6160 = vmatpush1.bf16.msra.mxu1 %v8364_v0  ;;  %v8440_v0 = vld [vmem:[%s11186_s3 + $0x720] ss:$8 sps:$4 sm:$0xff]  }
 0x519   : > { %6161 = vmatprep.subr.bf16.mxu1 %v8369_v26  ;;  %v8445_v26 = vld [vmem:[%s11186_s3 + $0x734] ss:$8 sps:$4 sm:$0xff]  }
 0x51c   : > { %6162 = vmatpush1.bf16.msra.mxu1 %v8367_v11  ;;  %v8443_v11 = vld [vmem:[%s11186_s3 + $0x730] ss:$8 sps:$4 sm:$0xff]  }
 0x51d   : > { %6163 = vmatprep.subr.bf16.mxu1 %v8372_v62  ;;  %v8448_v62 = vld [vmem:[%s11186_s3 + $0x744] ss:$8 sps:$4 sm:$0xff]  }
 0x520   : > { %6164 = vmatpush1.bf16.msra.mxu1 %v8370_v18  ;;  %v8446_v18 = vld [vmem:[%s11186_s3 + $0x740] ss:$8 sps:$4 sm:$0xff]  }
 0x521   : > { %6165 = vmatprep.subr.bf16.mxu1 %v8375_v21  ;;  %v8451_v21 = vld [vmem:[%s11186_s3 + $0x754] ss:$8 sps:$4 sm:$0xff]  }
 0x524   : > { %6166 = vmatpush1.bf16.msra.mxu1 %v8373_v32  ;;  %v8449_v32 = vld [vmem:[%s11186_s3 + $0x750] ss:$8 sps:$4 sm:$0xff]  }
 0x525   : > { %6167 = vmatprep.subr.bf16.mxu1 %v8378_v23  ;;  %v8454_v23 = vld [vmem:[%s11186_s3 + $0x764] ss:$8 sps:$4 sm:$0xff]  }
 0x528   : > { %6168 = vmatpush1.bf16.msra.mxu1 %v8376_v24  ;;  %v8452_v24 = vld [vmem:[%s11186_s3 + $0x760] ss:$8 sps:$4 sm:$0xff]  }
 0x529   : > { %6169 = vmatprep.subr.bf16.mxu1 %v8381_v28  ;;  %v8457_v28 = vld [vmem:[%s11186_s3 + $0x774] ss:$8 sps:$4 sm:$0xff]  }
 0x52c   : > { %6170 = vmatpush1.bf16.msra.mxu1 %v8379_v56  ;;  %v8460_v56 = vld [vmem:[%s11186_s3 + $0x784] ss:$8 sps:$4 sm:$0xff]  }
 0x52d   : > { %6171 = vmatprep.subr.bf16.mxu1 %v8384_v42  ;;  %v8458_v42 = vld [vmem:[%s11186_s3 + $0x780] ss:$8 sps:$4 sm:$0xff]  }
 0x530   : > { %6172 = vmatpush1.bf16.msra.mxu1 %v8382_v31  ;;  %v8461_v31 = vld [vmem:[%s11186_s3 + $0x790] ss:$8 sps:$4 sm:$0xff]  }
 0x531   : > { %6182 = vmatprep.subr.bf16.mxu1 %v8387_v13  ;;  %v8466_v13 = vld [vmem:[%s11186_s3 + $0x7a4] ss:$8 sps:$4 sm:$0xff]  }
 0x533   : > { %6174 = vmatmul.mubr.bf16.vlgmr.msra.gmra.mrb[0].mxu1 %v4238_v15  ;;  %v8467_v15 = vld [vmem:[%s11186_s3 + $0x7b0] ss:$8 sps:$4 sm:$0xff]  }
 0x534   : > { %6183 = vmatpush1.bf16.msra.mxu1 %v8385_v37  ;;  %6214 = vmatprep.mubr.bf16.mxu1 %v10651_v33  ;;  %v8469_v37 = vld [vmem:[%s11186_s3 + $0x7b4] ss:$8 sps:$4 sm:$0xff]   ;;  %v8470_v33 = vld [vmem:[%s11186_s3 + $0x7c0] ss:$8 sps:$4 sm:$0xff]  }
 0x535   : > { %6184 = vmatprep.subr.bf16.mxu1 %v8391_v9  ;;  %v8472_v9 = vld [vmem:[%s11186_s3 + $0x7c4] ss:$8 sps:$4 sm:$0xff]  }
 0x538   : > { %6185 = vmatpush1.bf16.msra.mxu1 %v8389_v35  ;;  %v8475_v35 = vld [vmem:[%s11186_s3 + $0x7d4] ss:$8 sps:$4 sm:$0xff]  }
 0x539   : > { %6186 = vmatprep.subr.bf16.mxu1 %v8394_v36  ;;  %v8473_v36 = vld [vmem:[%s11186_s3 + $0x7d0] ss:$8 sps:$4 sm:$0xff]  }
 0x53c   : > { %6187 = vmatpush1.bf16.msra.mxu1 %v8392_v38  ;;  %v8478_v38 = vld [vmem:[%s11186_s3 + $0x7e4] ss:$8 sps:$4 sm:$0xff]  }
 0x53d   : > { %6188 = vmatprep.subr.bf16.mxu1 %v8397_v14  ;;  %v10835_v14 = vld [vmem:[#allocation2 + $0x10] sm:$0x1f] }
 0x540   : > { %6189 = vmatpush1.bf16.msra.mxu1 %v8395_v6  ;;  %v8476_v6 = vld [vmem:[%s11186_s3 + $0x7e0] ss:$8 sps:$4 sm:$0xff]  }
 0x541   : > { %6190 = vmatprep.subr.bf16.mxu1 %v8400_v19  ;;  %v8481_v19 = vld [vmem:[%s11186_s3 + $0x7f4] ss:$8 sps:$4 sm:$0xff]  }
 0x544   : > { %6191 = vmatpush1.bf16.msra.mxu1 %v8398_v40  ;;  %v10845_v40 = vrot.slane %v10835_v14, %v9584_v34 }
 0x545   : > { %6192 = vmatprep.subr.bf16.mxu1 %v8403_v44  ;;  %v8479_v44 = vld [vmem:[%s11186_s3 + $0x7f0] ss:$8 sps:$4 sm:$0xff]  }
 0x548   : > { %6193 = vmatpush1.bf16.msra.mxu1 %v8401_v41  ;;  %v8484_v41 = vld [vmem:[%s11186_s3 + $0x804] ss:$8 sps:$4 sm:$0xff]  }
 0x549   : > { %6194 = vmatprep.subr.bf16.mxu1 %v8406_v45  ;;  %v4257_v45 = vcombine.high %v10845_v40, %v10845_v40 }
 0x54c   : > { %6195 = vmatpush1.bf16.msra.mxu1 %v8404_v46  ;;  %v8482_v46 = vld [vmem:[%s11186_s3 + $0x800] ss:$8 sps:$4 sm:$0xff]  }
 0x54d   : > { %6196 = vmatprep.subr.bf16.mxu1 %v8409_v47  ;;  %v4239_v47 = vcombine.high %v10749_v16, %v10749_v16 }
 0x550   : > { %6197 = vmatpush1.bf16.msra.mxu1 %v8407_v22  ;;  %v8488_v22 = vld [vmem:[%s11186_s3 + $0x814] ss:$8 sps:$4 sm:$0xff]  }
 0x551   : > { %6198 = vmatprep.subr.bf16.mxu1 %v8412_v55  ;;  %v10864_v55 = vrot.slane %v4257_v45, %v9584_v34  ;;  %v8545_v45 = vld [vmem:[%s11186_s3 + $0x944] ss:$8 sps:$4 sm:$0xff]  }
 0x554   : > { %6199 = vmatpush1.bf16.msra.mxu1 %v8410_v57  ;;  %v8486_v57 = vld [vmem:[%s11186_s3 + $0x810] ss:$8 sps:$4 sm:$0xff]  }
 0x555   : > { %6200 = vmatprep.subr.bf16.mxu1 %v8415_v59  ;;  %v8491_v59 = vld [vmem:[%s11186_s3 + $0x824] ss:$8 sps:$4 sm:$0xff]  }
 0x558   : > { %6201 = vmatpush1.bf16.msra.mxu1 %v8413_v7  ;;  %v8489_v7 = vld [vmem:[%s11186_s3 + $0x820] ss:$8 sps:$4 sm:$0xff]  }
 0x559   : > { %6202 = vmatprep.subr.bf16.mxu1 %v8418_v29  ;;  %v8494_v29 = vld [vmem:[%s11186_s3 + $0x834] ss:$8 sps:$4 sm:$0xff]  }
 0x55c   : > { %6203 = vmatpush1.bf16.msra.mxu1 %v8416_v10  ;;  %v8492_v10 = vld [vmem:[%s11186_s3 + $0x830] ss:$8 sps:$4 sm:$0xff]  }
 0x55d   : > { %6204 = vmatprep.subr.bf16.mxu1 %v8421_v60  ;;  %v8497_v60 = vld [vmem:[%s11186_s3 + $0x844] ss:$8 sps:$4 sm:$0xff]  }
 0x560   : > { %6205 = vmatpush1.bf16.msra.mxu1 %v8419_v20  ;;  %v8585_v20 = vld [vmem:[%s11187_s4 + $0x40] sm:$0xff]  }
 0x561   : > { %6206 = vmatprep.subr.bf16.mxu1 %v8424_v50  ;;  %v8586_v50 = vld [vmem:[%s11187_s4] sm:$0xff]   ;;  %7379 = vmatprep.subr.bf16.mxu0 %v8585_v20  ;;  %v8558_v20 = vld [vmem:[%s11186_s3 + $0x990] ss:$8 sps:$4 sm:$0xff]  }
 0x562   : > { %7380 = vmatpush3.bf16.msra.mxu0 %v8586_v50  ;;  %v8563_v50 = vld [vmem:[%s11186_s3 + $0x9a4] ss:$8 sps:$4 sm:$0xff]  }
 0x564   : > { %6207 = vmatpush1.bf16.msra.mxu1 %v8422_v61  ;;  %v8587_v61 = vld [vmem:[%s11187_s4 + $0x48] sm:$0xff]  }
 0x565   : > { %6208 = vmatprep.subr.bf16.mxu1 %v8427_v63  ;;  %v8495_v63 = vld [vmem:[%s11186_s3 + $0x840] ss:$8 sps:$4 sm:$0xff]   ;;  %7381 = vmatprep.subr.bf16.mxu0 %v8587_v61 }
 0x566   : > { %v8561_v61 = vld [vmem:[%s11186_s3 + $0x9a0] ss:$8 sps:$4 sm:$0xff]  }
 0x568   : > { %6209 = vmatpush1.bf16.msra.mxu1 %v8425_v8  ;;  %v8500_v8 = vld [vmem:[%s11186_s3 + $0x854] ss:$8 sps:$4 sm:$0xff]  }
 0x569   : > { %6210 = vmatprep.subr.bf16.mxu1 %v8430_v30  ;;  %v8588_v30 = vld [vmem:[%s11187_s4 + $0x8] sm:$0xff]  }
 0x56a   : > { %7382 = vmatpush3.bf16.msra.mxu0 %v8588_v30  ;;  %v8569_v30 = vld [vmem:[%s11186_s3 + $0x9c4] ss:$8 sps:$4 sm:$0xff]  }
 0x56c   : > { %6211 = vmatpush1.bf16.msra.mxu1 %v8428_v27  ;;  %v8589_v27 = vld [vmem:[%s11187_s4 + $0x50] sm:$0xff]  }
 0x56d   : > { %6212 = vmatprep.subr.bf16.mxu1 %v8433_v3  ;;  %v8498_v3 = vld [vmem:[%s11186_s3 + $0x850] ss:$8 sps:$4 sm:$0xff]   ;;  %7383 = vmatprep.subr.bf16.mxu0 %v8589_v27  ;;  %v8567_v27 = vld [vmem:[%s11186_s3 + $0x9c0] ss:$8 sps:$4 sm:$0xff]  }
 0x570   : > { %6213 = vmatpush1.bf16.msra.mxu1 %v8431_v5  ;;  %v8503_v5 = vld [vmem:[%s11186_s3 + $0x864] ss:$8 sps:$4 sm:$0xff]  }
 0x571   : > { %6223 = vmatprep.subr.bf16.mxu1 %v8436_v12  ;;  %v8590_v12 = vld [vmem:[%s11187_s4 + $0x10] sm:$0xff]  }
 0x572   : > { %7384 = vmatpush3.bf16.msra.mxu0 %v8590_v12  ;;  %v8575_v12 = vld [vmem:[%s11186_s3 + $0x9e4] ss:$8 sps:$4 sm:$0xff]  }
 0x573   : > { %6215 = vmatmul.mubr.bf16.vlgmr.msra.gmra.mrb[0].mxu1 %v10749_v16  ;;  %v8501_v16 = vld [vmem:[%s11186_s3 + $0x860] ss:$8 sps:$4 sm:$0xff]  }
 0x574   : > { %6224 = vmatpush1.bf16.msra.mxu1 %v8434_v58  ;;  %6255 = vmatprep.mubr.bf16.mxu1 %v4241_v53  ;;  %v8591_v58 = vld [vmem:[%s11187_s4 + $0x58] sm:$0xff]  }
 0x575   : > { %6225 = vmatprep.subr.bf16.mxu1 %v8439_v52  ;;  %v8506_v52 = vld [vmem:[%s11186_s3 + $0x874] ss:$8 sps:$4 sm:$0xff]   ;;  %7385 = vmatprep.subr.bf16.mxu0 %v8591_v58  ;;  %v8573_v58 = vld [vmem:[%s11186_s3 + $0x9e0] ss:$8 sps:$4 sm:$0xff]  }
 0x576   : > { %v8592_v53 = vld [vmem:[%s11187_s4 + $0x18] sm:$0xff]  }
 0x577   : > { %7386 = vmatpush3.bf16.msra.mxu0 %v8592_v53  ;;  %v8581_v53 = vld [vmem:[%s11186_s3 + $0xa04] ss:$8 sps:$4 sm:$0xff]  }
 0x578   : > { %6226 = vmatpush1.bf16.msra.mxu1 %v8437_v17  ;;  %v8593_v17 = vld [vmem:[%s11187_s4 + $0x60] sm:$0xff]  }
 0x579   : > { %6227 = vmatprep.subr.bf16.mxu1 %v8442_v54  ;;  %v8504_v54 = vld [vmem:[%s11186_s3 + $0x870] ss:$8 sps:$4 sm:$0xff]   ;;  %7387 = vmatprep.subr.bf16.mxu0 %v8593_v17  ;;  %v8579_v17 = vld [vmem:[%s11186_s3 + $0xa00] ss:$8 sps:$4 sm:$0xff]  }
 0x57c   : > { %6228 = vmatpush1.bf16.msra.mxu1 %v8440_v0  ;;  %v8509_v0 = vld [vmem:[%s11186_s3 + $0x884] ss:$8 sps:$4 sm:$0xff]  }
 0x57d   : > { %6229 = vmatprep.subr.bf16.mxu1 %v8445_v26  ;;  %v8594_v26 = vld [vmem:[%s11187_s4 + $0x20] sm:$0xff]  }
 0x57e   : > { %7388 = vmatpush3.bf16.msra.mxu0 %v8594_v26  ;;  %v8582_v26 = vld [vmem:[%s11186_s3 + $0xa10] ss:$8 sps:$4 sm:$0xff]  }
 0x580   : > { %6230 = vmatpush1.bf16.msra.mxu1 %v8443_v11  ;;  %v8595_v11 = vld [vmem:[%s11187_s4 + $0x68] sm:$0xff]  }
 0x581   : > { %6231 = vmatprep.subr.bf16.mxu1 %v8448_v62  ;;  %v8507_v62 = vld [vmem:[%s11186_s3 + $0x880] ss:$8 sps:$4 sm:$0xff]   ;;  %7389 = vmatprep.subr.bf16.mxu0 %v8595_v11  ;;  %v4242_v11 = vcombine.high %v10835_v14, %v10835_v14  ;;  %v8600_v14 = vld [vmem:[%s11187_s4 + $0x38] sm:$0xff]  }
 0x584   : > { %6232 = vmatpush1.bf16.msra.mxu1 %v8446_v18  ;;  %v8512_v18 = vld [vmem:[%s11186_s3 + $0x894] ss:$8 sps:$4 sm:$0xff]  }
 0x585   : > { %6233 = vmatprep.subr.bf16.mxu1 %v8451_v21  ;;  %v8596_v21 = vld [vmem:[%s11187_s4 + $0x28] sm:$0xff]  }
 0x586   : > { %7390 = vmatpush3.bf16.msra.mxu0 %v8596_v21  ;;  %v8597_v21 = vld [vmem:[%s11187_s4 + $0x70] sm:$0xff]  }
 0x587   : > { %7391 = vmatprep.subr.bf16.mxu0 %v8597_v21 }
 0x588   : > { %6234 = vmatpush1.bf16.msra.mxu1 %v8449_v32  ;;  %v8510_v32 = vld [vmem:[%s11186_s3 + $0x890] ss:$8 sps:$4 sm:$0xff]  }
 0x589   : > { %6235 = vmatprep.subr.bf16.mxu1 %v8454_v23  ;;  %v8515_v23 = vld [vmem:[%s11186_s3 + $0x8a4] ss:$8 sps:$4 sm:$0xff]  }
 0x58c   : > { %6236 = vmatpush1.bf16.msra.mxu1 %v8452_v24  ;;  %v8513_v24 = vld [vmem:[%s11186_s3 + $0x8a0] ss:$8 sps:$4 sm:$0xff]  }
 0x58d   : > { %6237 = vmatprep.subr.bf16.mxu1 %v8457_v28  ;;  %v8518_v28 = vld [vmem:[%s11186_s3 + $0x8b4] ss:$8 sps:$4 sm:$0xff]  }
 0x590   : > { %6238 = vmatpush1.bf16.msra.mxu1 %v8455_v39  ;;  %v8516_v39 = vld [vmem:[%s11186_s3 + $0x8b0] ss:$8 sps:$4 sm:$0xff]  }
 0x591   : > { %6239 = vmatprep.subr.bf16.mxu1 %v8460_v56  ;;  %v8521_v56 = vld [vmem:[%s11186_s3 + $0x8c4] ss:$8 sps:$4 sm:$0xff]  }
 0x594   : > { %6240 = vmatpush1.bf16.msra.mxu1 %v8458_v42  ;;  %v8519_v42 = vld [vmem:[%s11186_s3 + $0x8c0] ss:$8 sps:$4 sm:$0xff]  }
 0x595   : > { %6241 = vmatprep.subr.bf16.mxu1 %v8463_v4  ;;  %v8524_v4 = vld [vmem:[%s11186_s3 + $0x8d4] ss:$8 sps:$4 sm:$0xff]  }
 0x598   : > { %6242 = vmatpush1.bf16.msra.mxu1 %v8461_v31  ;;  %v8522_v31 = vld [vmem:[%s11186_s3 + $0x8d0] ss:$8 sps:$4 sm:$0xff]  }
 0x599   : > { %6243 = vmatprep.subr.bf16.mxu1 %v8466_v13  ;;  %v8527_v13 = vld [vmem:[%s11186_s3 + $0x8e4] ss:$8 sps:$4 sm:$0xff]  }
 0x59c   : > { %6244 = vmatpush1.bf16.msra.mxu1 %v8464_v43  ;;  %v8525_v43 = vld [vmem:[%s11186_s3 + $0x8e0] ss:$8 sps:$4 sm:$0xff]  }
 0x59d   : > { %6245 = vmatprep.subr.bf16.mxu1 %v8469_v37  ;;  %v8530_v37 = vld [vmem:[%s11186_s3 + $0x8f4] ss:$8 sps:$4 sm:$0xff]  }
 0x5a0   : > { %6246 = vmatpush1.bf16.msra.mxu1 %v8467_v15  ;;  %v8528_v15 = vld [vmem:[%s11186_s3 + $0x8f0] ss:$8 sps:$4 sm:$0xff]  }
 0x5a1   : > { %6247 = vmatprep.subr.bf16.mxu1 %v8472_v9  ;;  %v8533_v9 = vld [vmem:[%s11186_s3 + $0x904] ss:$8 sps:$4 sm:$0xff]  }
 0x5a4   : > { %6248 = vmatpush1.bf16.msra.mxu1 %v8470_v33  ;;  %v8531_v33 = vld [vmem:[%s11186_s3 + $0x900] ss:$8 sps:$4 sm:$0xff]  }
 0x5a5   : > { %6249 = vmatprep.subr.bf16.mxu1 %v8475_v35  ;;  %v10998_v35 = vrot.slane %v10845_v40, %v9584_v34  ;;  %v8537_v40 = vld [vmem:[%s11186_s3 + $0x920] ss:$8 sps:$4 sm:$0xff]  }
 0x5a8   : > { %6250 = vmatpush1.bf16.msra.mxu1 %v8473_v36  ;;  %v8536_v36 = vld [vmem:[%s11186_s3 + $0x914] ss:$8 sps:$4 sm:$0xff]  }
 0x5a9   : > { %6251 = vmatprep.subr.bf16.mxu1 %v8478_v38  ;;  %v4280_v38 = vcombine.high %v10864_v55, %v10864_v55 }
 0x5ac   : > { %6252 = vmatpush1.bf16.msra.mxu1 %v8476_v6  ;;  %v8534_v6 = vld [vmem:[%s11186_s3 + $0x910] ss:$8 sps:$4 sm:$0xff]  }
 0x5ad   : > { %6253 = vmatprep.subr.bf16.mxu1 %v8481_v19  ;;  %v8539_v19 = vld [vmem:[%s11186_s3 + $0x924] ss:$8 sps:$4 sm:$0xff]  }
 0x5b0   : > { %6254 = vmatpush1.bf16.msra.mxu1 %v8479_v44  ;;  %v8542_v44 = vld [vmem:[%s11186_s3 + $0x934] ss:$8 sps:$4 sm:$0xff]  }
 0x5b1   : > { %6264 = vmatprep.subr.bf16.mxu1 %v8484_v41  ;;  %v8540_v41 = vld [vmem:[%s11186_s3 + $0x930] ss:$8 sps:$4 sm:$0xff]  }
 0x5b3   : > { %6256 = vmatmul.mubr.bf16.vlgmr.msra.gmra.mrb[0].mxu1 %v4239_v47  ;;  %v8548_v47 = vld [vmem:[%s11186_s3 + $0x954] ss:$8 sps:$4 sm:$0xff]  }
 0x5b4   : > { %6265 = vmatpush1.bf16.msra.mxu1 %v8482_v46  ;;  %6296 = vmatprep.mubr.bf16.mxu1 %v10864_v55  ;;  %v8543_v46 = vld [vmem:[%s11186_s3 + $0x940] ss:$8 sps:$4 sm:$0xff]   ;;  %v8551_v55 = vld [vmem:[%s11186_s3 + $0x964] ss:$8 sps:$4 sm:$0xff]  }
 0x5b5   : > { %6266 = vmatprep.subr.bf16.mxu1 %v8488_v22  ;;  %v8546_v22 = vld [vmem:[%s11186_s3 + $0x950] ss:$8 sps:$4 sm:$0xff]  }
 0x5b8   : > { %6267 = vmatpush1.bf16.msra.mxu1 %v8486_v57  ;;  %v8549_v57 = vld [vmem:[%s11186_s3 + $0x960] ss:$8 sps:$4 sm:$0xff]  }
 0x5b9   : > { %6268 = vmatprep.subr.bf16.mxu1 %v8491_v59  ;;  %v8554_v59 = vld [vmem:[%s11186_s3 + $0x974] ss:$8 sps:$4 sm:$0xff]  }
 0x5bc   : > { %6269 = vmatpush1.bf16.msra.mxu1 %v8489_v7  ;;  %v8552_v7 = vld [vmem:[%s11186_s3 + $0x970] ss:$8 sps:$4 sm:$0xff]  }
 0x5bd   : > { %6270 = vmatprep.subr.bf16.mxu1 %v8494_v29  ;;  %v8557_v29 = vld [vmem:[%s11186_s3 + $0x984] ss:$8 sps:$4 sm:$0xff]  }
 0x5c0   : > { %6271 = vmatpush1.bf16.msra.mxu1 %v8492_v10  ;;  %v8555_v10 = vld [vmem:[%s11186_s3 + $0x980] ss:$8 sps:$4 sm:$0xff]  }
 0x5c1   : > { %6272 = vmatprep.subr.bf16.mxu1 %v8497_v60  ;;  %v8560_v60 = vld [vmem:[%s11186_s3 + $0x994] ss:$8 sps:$4 sm:$0xff]  }
 0x5c4   : > { %6273 = vmatpush1.bf16.msra.mxu1 %v8495_v63  ;;  %v8566_v63 = vld [vmem:[%s11186_s3 + $0x9b4] ss:$8 sps:$4 sm:$0xff]  }
 0x5c5   : > { %6274 = vmatprep.subr.bf16.mxu1 %v8500_v8  ;;  %v8564_v8 = vld [vmem:[%s11186_s3 + $0x9b0] ss:$8 sps:$4 sm:$0xff]  }
 0x5c8   : > { %6275 = vmatpush1.bf16.msra.mxu1 %v8498_v3  ;;  %v8572_v3 = vld [vmem:[%s11186_s3 + $0x9d4] ss:$8 sps:$4 sm:$0xff]  }
 0x5c9   : > { %6276 = vmatprep.subr.bf16.mxu1 %v8503_v5  ;;  %v8570_v5 = vld [vmem:[%s11186_s3 + $0x9d0] ss:$8 sps:$4 sm:$0xff]  }
 0x5cc   : > { %6277 = vmatpush1.bf16.msra.mxu1 %v8501_v16  ;;  %v8578_v16 = vld [vmem:[%s11186_s3 + $0x9f4] ss:$8 sps:$4 sm:$0xff]  }
 0x5cd   : > { %6278 = vmatprep.subr.bf16.mxu1 %v8506_v52  ;;  %v8576_v52 = vld [vmem:[%s11186_s3 + $0x9f0] ss:$8 sps:$4 sm:$0xff]  }
 0x5d0   : > { %6279 = vmatpush1.bf16.msra.mxu1 %v8504_v54  ;;  %v4279_v54 = vcombine.high %v10998_v35, %v10998_v35 }
 0x5d1   : > { %6280 = vmatprep.subr.bf16.mxu1 %v8509_v0  ;;  %v8584_v0 = vld [vmem:[%s11186_s3 + $0xa14] ss:$8 sps:$4 sm:$0xff]  }
 0x5d4   : > { %6281 = vmatpush1.bf16.msra.mxu1 %v8507_v62  ;;  %v4256_v62 = vrot.slane %v4242_v11, %v9584_v34 }
 0x5d5   : > { %6282 = vmatprep.subr.bf16.mxu1 %v8512_v18 }
 0x5d6   : > { %v4271_v18 = vrot.slane %v4256_v62, %v9584_v34  ;;  %v4140_v34 = vld [vmem:[%s11188_s5 + $0x3] sm:$0x3] }
 0x5d8   : > { %6283 = vmatpush1.bf16.msra.mxu1 %v8510_v32  ;;  %v8598_v32 = vld [vmem:[%s11187_s4 + $0x30] sm:$0xff]  }
 0x5d9   : > { %6284 = vmatprep.subr.bf16.mxu1 %v8515_v23  ;;  %7392 = vmatpush3.bf16.msra.mxu0 %v8598_v32  ;;  %v5925_v23 = vrot.slane %v4140_v34, %v551_v49  ;;  %v6423_v49 = vld [vmem:[%s11188_s5 + $0x5] sm:$0x1] }
 0x5dc   : > { %6285 = vmatpush1.bf16.msra.mxu1 %v8513_v24  ;;  %v5929_v24 = vrot.slane %v4140_v34, %v555_v51 }
 0x5dd   : > { %6286 = vmatprep.subr.bf16.mxu1 %v8518_v28  ;;  %v5971_v28 = vadd.f32 %v10565_v1, %v5925_v23 }
 0x5e0   : > { %6287 = vmatpush1.bf16.msra.mxu1 %v8516_v39  ;;  %v5973_v39 = vadd.f32 %v10570_v2, %v5929_v24 }
 0x5e1   : > { %6288 = vmatprep.subr.bf16.mxu1 %v8521_v56 }
 0x5e4   : > { %6289 = vmatpush1.bf16.msra.mxu1 %v8519_v42 }
 0x5e5   : > { %6290 = vmatprep.subr.bf16.mxu1 %v8524_v4 }
 0x5e8   : > { %6291 = vmatpush1.bf16.msra.mxu1 %v8522_v31 }
 0x5e9   : > { %6292 = vmatprep.subr.bf16.mxu1 %v8527_v13 }
 0x5ec   : > { %6293 = vmatpush1.bf16.msra.mxu1 %v8525_v43 }
 0x5ed   : > { %6294 = vmatprep.subr.bf16.mxu1 %v8530_v37 }
 0x5f0   : > { %6295 = vmatpush1.bf16.msra.mxu1 %v8528_v15 }
 0x5f1   : > { %6305 = vmatprep.subr.bf16.mxu1 %v8533_v9 }
 0x5f3   : > { %6297 = vmatmul.mubr.bf16.vlgmr.msra.gmra.mrb[0].mxu1 %v10998_v35 }
 0x5f4   : > { %6306 = vmatpush1.bf16.msra.mxu1 %v8531_v33  ;;  %6337 = vmatprep.mubr.bf16.mxu1 %v4280_v38 }
 0x5f5   : > { %6307 = vmatprep.subr.bf16.mxu1 %v8536_v36 }
 0x5f8   : > { %6308 = vmatpush1.bf16.msra.mxu1 %v8534_v6 }
 0x5f9   : > { %6309 = vmatprep.subr.bf16.mxu1 %v8539_v19 }
 0x5fc   : > { %6310 = vmatpush1.bf16.msra.mxu1 %v8537_v40 }
 0x5fd   : > { %6311 = vmatprep.subr.bf16.mxu1 %v8542_v44 }
 0x600   : > { %6312 = vmatpush1.bf16.msra.mxu1 %v8540_v41 }
 0x601   : > { %6313 = vmatprep.subr.bf16.mxu1 %v8545_v45 }
 0x604   : > { %6314 = vmatpush1.bf16.msra.mxu1 %v8543_v46 }
 0x605   : > { %6315 = vmatprep.subr.bf16.mxu1 %v8548_v47 }
 0x608   : > { %6316 = vmatpush1.bf16.msra.mxu1 %v8546_v22 }
 0x609   : > { %6317 = vmatprep.subr.bf16.mxu1 %v8551_v55 }
 0x60c   : > { %6318 = vmatpush1.bf16.msra.mxu1 %v8549_v57 }
 0x60d   : > { %6319 = vmatprep.subr.bf16.mxu1 %v8554_v59 }
 0x610   : > { %6320 = vmatpush1.bf16.msra.mxu1 %v8552_v7 }
 0x611   : > { %6321 = vmatprep.subr.bf16.mxu1 %v8557_v29 }
 0x614   : > { %6322 = vmatpush1.bf16.msra.mxu1 %v8555_v10 }
 0x615   : > { %6323 = vmatprep.subr.bf16.mxu1 %v8560_v60 }
 0x618   : > { %6324 = vmatpush1.bf16.msra.mxu1 %v8558_v20 }
 0x619   : > { %6325 = vmatprep.subr.bf16.mxu1 %v8563_v50 }
 0x61c   : > { %6326 = vmatpush1.bf16.msra.mxu1 %v8561_v61 }
 0x61d   : > { %6327 = vmatprep.subr.bf16.mxu1 %v8566_v63 }
 0x620   : > { %6328 = vmatpush1.bf16.msra.mxu1 %v8564_v8 }
 0x621   : > { %6329 = vmatprep.subr.bf16.mxu1 %v8569_v30 }
 0x624   : > { %6330 = vmatpush1.bf16.msra.mxu1 %v8567_v27 }
 0x625   : > { %6331 = vmatprep.subr.bf16.mxu1 %v8572_v3 }
 0x628   : > { %6332 = vmatpush1.bf16.msra.mxu1 %v8570_v5 }
 0x629   : > { %6333 = vmatprep.subr.bf16.mxu1 %v8575_v12 }
 0x62c   : > { %6334 = vmatpush1.bf16.msra.mxu1 %v8573_v58 }
 0x62d   : > { %6335 = vmatprep.subr.bf16.mxu1 %v8578_v16 }
 0x630   : > { %6336 = vmatpush1.bf16.msra.mxu1 %v8576_v52 }
 0x631   : > { %6346 = vmatprep.subr.bf16.mxu1 %v8581_v53 }
 0x633   : > { %6338 = vmatmul.mubr.bf16.vlgmr.msra.gmra.mrb[0].mxu1 %v4279_v54 }
 0x634   : > { %6347 = vmatpush1.bf16.msra.mxu1 %v8579_v17  ;;  %6378 = vmatprep.mubr.bf16.mxu1 %v8665_v25  ;;  %v8599_v25 = vld [vmem:[%s11187_s4 + $0x78] sm:$0xff]  }
 0x635   : > { %6348 = vmatprep.subr.bf16.mxu1 %v8584_v0  ;;  %7393 = vmatprep.subr.bf16.mxu0 %v8599_v25 }
 0x636   : > { %7394 = vmatpush3.bf16.msra.mxu0 %v8600_v14 }
 0x638   : > { %6349 = vmatpush1.bf16.msra.mxu1 %v8582_v26 }
 0x63f   : > { %7307 = vmatmul.mubr.msk.bf16.vlgmr.msra.gmra.mrb[0].mxu1 %vm5932_vm9, %v4271_v18 }
 0x712   : > { %v6380_v56 = vpop.f32.mrb[0].mxu1 }
 0x713   : > { %v7426_v42 = vadd.f32 %v6380_v56, %v5971_v28  ;;  %v6382_v4 = vpop.f32.mrb[1].mxu1 }
 0x714   : > { %v7428_v31 = vadd.f32 %v6382_v4, %v5973_v39  ;;  %v6384_v13 = vpop.f32.mrb[2].mxu1 }
 0x715   : > { %v6387_v43 = vmax.f32 %v7426_v42, 0.0  ;;  %v6385_v37 = vpop.f32.mrb[3].mxu1 }
 0x716   : > { %v6388_v15 = vmax.f32 %v7428_v31, 0.0 }
 0x717   : > { %v6389_v33 = vpack.c.bf16 %v6387_v43, %v6387_v43 }
 0x718   : > { %v6390_v9 = vpack.c.bf16 %v6388_v15, %v6388_v15 }
 0x71a   : > { %6552 = vmatprep.mubr.bf16.mxu0 %v6390_v9 }
 0x71b   : > { %6553 = vmatmul.mubr.bf16.vlgmr.msra.gmra.mrb[52].mxu0 %v6389_v33 }
 0x7ee   : > { %v7395_v48 = vpop.f32.mrb[52].mxu0 }
 0x7ef   : > { %v7396_v51 = vpop.f32.mrb[53].mxu0 }
 0x7f0   : > { %v7397_v1 = vadd.f32 %v7396_v51, %v7395_v48  ;;  %v7398_v2 = vpop.f32.mrb[54].mxu0 }
 0x7f1   : > { %v7399_v35 = vpop.f32.mrb[55].mxu0 }
 0x7f2   : > { %v6555_v36 = vadd.f32 %v7397_v1, %v6423_v49 }
 0x7f4   : > { %6561 = vst.msk [vmem:[%s246_s19] sm:$0x1] %vm6560_vm10, %v6555_v36 }
 0x7f5   : > { %8614 = shalt.err (!%p8611_p3)
}
 0x7f6   : > { %s8615_s14 = scalar_lea.hbm %s11141_s10, 16  ;;  %s8619_s18 = scalar_lea.hbm %s11189_s6, 32 }
 0x7f7   : > { %p8616_p4 = scmp.ne.s32.totalorder %s11141_s10, %s8615_s14  ;;  %p8620_p9 = scmp.lt.u32.totalorder %s11141_s10, %s11189_s6 }
 0x7f8   : > { %p8621_p10 = scmp.lt.u32.totalorder %s8619_s18, %s8615_s14  ;;  %p8623_p12 = scmp.lt.u32.totalorder %s8615_s14, %s11141_s10 }
 0x7f9   : > { %p8617_p7 = pnand %p8616_p4, %p8744_p5 }
 0x7fa   : > { %p8622_p11 = por %p8621_p10, %p8620_p9 }
 0x7fb   : > { %p8618_p8 = pneg %p8617_p7 }
 0x7fc   : > { %p8624_p13 = por %p8623_p12, %p8622_p11 }
 0x7fe   : > { %p8625_p0 = pnand %p8624_p13, %p8618_p8 }
 0x800   : > { %8628 = shalt.err (!%p8625_p0)
}
 0x801   : > { %7610 = dma.vmem_to_hbm [thread:$0]  (%p8744_p5), %s11143_s11, 16, %s11141_s10, %s6563_s17  }
 0x802 PF: > { %p7616_p1 = scmp.ge.s32.totalorder %s8663_s24, 2  ;;  %s6587_s19 = sand.u32 1, %s8651_s21  }
 0x803   : > { %s6588_s26 = scalar_lea.sflag [#allocation4], %s6587_s19 }
 0x804   : > { %p7613_p2 = pnand %p7616_p1, %p8748_p6 }
 0x806   : > { %8646 = dma.done.wait (!%p7613_p2), %s6588_s26, 16  }
 0x807   : > { %8648 = vsyncadd (!%p7613_p2), %s6588_s26, 4294967280  ;;  %p16_p3 = scmp.ge.s32.totalorder %s8731_s27, 4   ;;  %s11200_s21 = smov %s8655_s22 }
 0x808   : > { %s11201_s22 = smov %s8659_s23  ;;  %s11202_s23 = smov %s8742_s30 }
 0x809   : > { %s11203_s24 = smov %s8731_s27  ;;  %18 = sbr.rel (!%p16_p3) target bundleno = 3 (0x3), region = 79 }
 0x810   :  { %6592 = vsyncpa [#allocation4], 1 }
 0x811   :  { %6594 = vsyncpa [#allocation4 + $0x1], 1 }

</bundles_post_ra>
